<compile_context>
chip_gen: v7x
topology: tpu7x:2x2x1
jax: 0.10.0
libtpu: 0.0.40
codegen_flags: <defaults>
</compile_context>

<pallas_src>
import functools

import jax
import jax.numpy as jnp
from jax.experimental import pallas as pl
from jax.experimental.pallas import tpu as pltpu

# problem sizes (small, consistent with the module's forward)
N_X = 64       # collocation points from `sampler`
N_INT = 32     # integral quadrature points from `integral_sampler`
D = 4          # input dimension of x
D_INT = 2      # dimension of the integral variable (replaces last D_INT columns of x)
HIDDEN = 32    # MLP hidden width
C = 4          # MLP output dimension


@functools.partial(jax.jit, static_argnames=("num_tiles",))
def integro_pinn_loss(x, x_int, w1, b1, w2, b2, *, num_tiles=1):
    n_x, d = x.shape
    n_int, d_int = x_int.shape
    hidden = w1.shape[1]
    c = w2.shape[1]
    f32 = jnp.float32

    # lane packing: `pack` quadrature points per 128-lane vreg
    assert 128 % hidden == 0, "HIDDEN must divide 128 for lane packing"
    pack = 128 // hidden
    assert n_int % pack == 0, "N_INT must be a multiple of the packing factor"
    groups = n_int // pack
    lanes = pack * hidden  # == 128

    # tail safety (grid must not drop points)
    assert n_x % num_tiles == 0, "N_X must be divisible by the number of tiles"
    tm = n_x // num_tiles
    assert tm % 8 == 0, "per-tile collocation count must be sublane aligned"

    # ---- grid-invariant prep, hoisted out of the kernel and packed into ONE slab --
    def pad_lanes(a):
        a = a.astype(f32)
        return jnp.pad(a, ((0, 0), (0, lanes - a.shape[-1])))

    wa = pad_lanes(w1)                                                    # (D,128)  [w1 | 0]
    wb = jnp.pad(jnp.tile(w1[: d - d_int, :].astype(f32), (1, pack)),
                 ((0, d_int), (0, 0)))                                    # (D,128)  tiled W1_top ; 0
    b1_row = pad_lanes(b1)                                                # (1,128)
    b2_row = pad_lanes(b2)                                                # (1,128)
    xint_rows = pad_lanes(x_int.T)                                        # (D_INT,128) lanes 0:N_INT
    eexp = jnp.repeat(jnp.eye(pack, dtype=f32), hidden, axis=1)           # (PACK,128) one-hot expander
    hs_b = (x_int.astype(f32) @ w1[d - d_int:, :].astype(f32)
            + b1.astype(f32)).reshape(groups, lanes)                      # (G,128)   packed x_int@W1_bot+b1
    w2n = pad_lanes(jnp.tile(w2.astype(f32), (pack, 1)) * (1.0 / n_int))  # (128,128) tile(W2)/N in lanes 0:C

    slab = jnp.concatenate(
        [wa, wb, b1_row, b2_row, xint_rows, eexp, hs_b, w2n], axis=0)
    k_rows = slab.shape[0]

    # static row offsets inside the slab
    r_wa = 0
    r_wb = r_wa + d
    r_b1 = r_wb + d
    r_b2 = r_b1 + 1
    r_xi = r_b2 + 1
    r_ee = r_xi + d_int
    r_hs = r_ee + pack
    r_w2 = r_hs + groups

    inv_n_x = 1.0 / n_x
    inv_n_int = 1.0 / n_int

    def kernel(x_ref, slab_ref, out_ref):
        x_t = x_ref[...]                                            # (TM, D)

        # ---- fused x-side contraction: x @ [w1|0 , tiled W1_top|0] -> (TM, 256) ----
        wcat = jnp.concatenate([slab_ref[r_wa:r_wa + d, :],
                                slab_ref[r_wb:r_wb + d, :]], axis=1)     # (D, 256)
        hfused = jnp.dot(x_t, wcat, preferred_element_type=f32)          # (TM, 256)

        b1_v = slab_ref[r_b1:r_b1 + 1, :hidden]                          # (1, HIDDEN)
        b2_v = slab_ref[r_b2:r_b2 + 1, :c]                               # (1, C)

        # ---- y = module(x) on collocation points -----------------------------------
        h = jnp.tanh(hfused[:, :hidden] + b1_v)                          # (TM, HIDDEN)
        w2_v = slab_ref[r_w2:r_w2 + hidden, :c] * float(n_int)           # (HIDDEN, C)
        y = jnp.dot(h, w2_v, preferred_element_type=f32) + b2_v          # (TM, C)

        # ---- compact quadrature weights kern[i,j] = exp(-||xu_i - s_j||^2) ---------
        xu = x_t[:, d - d_int:]                                          # (TM, D_INT)
        xi = slab_ref[r_xi:r_xi + d_int, :]                              # (D_INT, 128)
        arg = None
        for dd in range(d_int):
            diff = xu[:, dd:dd + 1] - xi[dd:dd + 1, :n_int]              # (TM, N_INT)
            sq = diff * diff
            arg = sq if arg is None else arg + sq
        kern = jnp.exp(-arg)                                             # (TM, N_INT): 2048 exps
        ksum = jnp.sum(kern, axis=1, keepdims=True)                      # (TM, 1)

        # ---- quadrature-group accumulation loop (no (TM,G,128) intermediates) ------
        hx_t = hfused[:, lanes:]                                         # (TM, 128)
        hs_all = slab_ref[r_hs:r_hs + groups, :]                         # (G, 128)
        ee = slab_ref[r_ee:r_ee + pack, :]                               # (PACK, 128)
        w128 = None
        for g in range(groups):
            t_g = jnp.tanh(hx_t + hs_all[g:g + 1, :])                    # (TM, 128)
            k_g = jnp.dot(kern[:, g * pack:(g + 1) * pack], ee,
                          preferred_element_type=f32)                    # (TM, 128)
            contrib = k_g * t_g
            w128 = contrib if w128 is None else w128 + contrib

        # ---- quadrature sum folded into the HIDDEN contraction ---------------------
        w2n_v = slab_ref[r_w2:r_w2 + lanes, :c]                          # (128, C), already / N_INT
        integral = (jnp.dot(w128, w2n_v, preferred_element_type=f32)
                    + b2_v * (ksum * inv_n_int))                         # (TM, C)

        # ---- residual_fn + error_fn + reduce_fn (partial mean, fused epilogue) -----
        rhs = jnp.sin(jnp.sum(x_t, axis=1, keepdims=True))               # (TM, 1)
        r = y - integral - rhs                                           # (TM, C)
        out_ref[0, 0] = jnp.sum(r * r) * inv_n_x                         # scalar SMEM store

    if num_tiles == 2:
        dim_sem = (pltpu.CORE_PARALLEL,)        # v7x: one collocation tile per TensorCore
    else:
        dim_sem = (pltpu.ARBITRARY,)            # v5e/v6e: single sequential step

    partial = pl.pallas_call(
        kernel,
        out_shape=jax.ShapeDtypeStruct((num_tiles, 1), f32),
        grid_spec=pltpu.PrefetchScalarGridSpec(
            num_scalar_prefetch=0,
            grid=(num_tiles,),
            in_specs=[
                pl.BlockSpec((tm, d), lambda i: (i, 0)),
                pl.BlockSpec((k_rows, lanes), lambda i: (0, 0)),
            ],
            out_specs=pl.BlockSpec((1, 1), lambda i: (i, 0),
                                   memory_space=pltpu.MemorySpace.SMEM),
        ),
        compiler_params=pltpu.CompilerParams(dimension_semantics=dim_sem),
    )(x.astype(f32), slab)

    # reduce_fn = torch.mean: already divided by N_X in-kernel.
    if num_tiles == 1:
        return partial[0, 0]
    return jnp.sum(partial)


def _pick_num_tiles(n_x):
    """grid=(1,) on single-TC chips (v5e/v6e); 2 CORE_PARALLEL tiles on v7x."""
    try:
        kind = jax.devices()[0].device_kind.lower()
    except Exception:
        kind = ""
    if "v7" in kind and n_x % 2 == 0 and (n_x // 2) % 8 == 0:
        return 2
    return 1


def _reference_loss(x, x_int, w1, b1, w2, b2):
    """Pure-JAX mirror of the forward semantics (explicit x_combined build)."""
    def mlp(z):
        return jnp.tanh(z @ w1 + b1) @ w2 + b2
    n_x, d = x.shape
    n_int, d_int = x_int.shape
    y = mlp(x)
    x_comb = jnp.concatenate(
        [jnp.broadcast_to(x[:, None, : d - d_int], (n_x, n_int, d - d_int)),
         jnp.broadcast_to(x_int[None, :, :], (n_x, n_int, d_int))], axis=-1)
    y_int = mlp(x_comb.reshape(n_x * n_int, d)).reshape(n_x, n_int, -1)
    diff = x[:, None, d - d_int:] - x_int[None, :, :]
    kern = jnp.exp(-jnp.sum(diff * diff, axis=-1))
    integral = jnp.sum(kern[:, :, None] * y_int, axis=1) / n_int
    rhs = jnp.sin(jnp.sum(x, axis=-1, keepdims=True))
    residual = y - integral - rhs
    unreduced = jnp.sum(residual * residual, axis=1)   # SquaredError over dim=1
    return jnp.mean(unreduced)                          # reduce_fn = mean


if __name__ == "__main__":
    key = jax.random.PRNGKey(0)
    k1, k2, k3, k4 = jax.random.split(key, 4)

    # "sampler" / "integral_sampler" outputs (deterministic synthetic samples)
    x = jax.random.normal(k1, (N_X, D), dtype=jnp.float32)
    x_int = jax.random.uniform(k2, (N_INT, D_INT), dtype=jnp.float32,
                               minval=-1.0, maxval=1.0)

    # "module" parameters (deterministic init, no checkpoint load)
    w1 = 0.5 * jax.random.normal(k3, (D, HIDDEN), dtype=jnp.float32)
    b1 = jnp.full((1, HIDDEN), 0.1, dtype=jnp.float32)
    w2 = 0.3 * jax.random.normal(k4, (HIDDEN, C), dtype=jnp.float32)
    b2 = jnp.full((1, C), -0.05, dtype=jnp.float32)

    tiles = _pick_num_tiles(N_X)
    loss = jax.block_until_ready(
        integro_pinn_loss(x, x_int, w1, b1, w2, b2, num_tiles=tiles))
    ref = jax.block_until_ready(_reference_loss(x, x_int, w1, b1, w2, b2))

    assert jnp.isfinite(loss), "kernel produced non-finite loss"
    assert abs(float(loss) - float(ref)) <= 1e-4 * (1.0 + abs(float(ref))), (
        f"mismatch: kernel={float(loss)} ref={float(ref)}")
    print("KERNEL_OK")
</pallas_src>

<mosaic_0001>
module attributes {stable_mosaic.version = 11 : i64} {
  func.func @kernel(%arg0: i32, %arg1: memref<64x4xf32, #tpu.memory_space<vmem>>, %arg2: memref<152x128xf32, #tpu.memory_space<vmem>>, %arg3: memref<1x1xf32, #tpu.memory_space<smem>>) attributes {dimension_semantics = [#tpu.dimension_semantics<arbitrary>], iteration_bounds = array<i64: 1>, scalar_prefetch = 0 : i64, scratch_operands = 0 : i64, tpu.core_type = #tpu.core_type<tc>, window_params = [{transform_indices = @transform_0, window_bounds = array<i64: 64, 4>}, {pipeline_mode = #tpu.pipeline_mode<synchronous>, transform_indices = @transform_1, window_bounds = array<i64: 152, 128>}, {transform_indices = @transform_2, window_bounds = array<i64: 1, 1>}]} {
    %c0 = arith.constant 0 : index
    %c0_0 = arith.constant 0 : index
    %0 = vector.load %arg1[%c0, %c0_0] : memref<64x4xf32, #tpu.memory_space<vmem>>, vector<64x4xf32>
    %c0_1 = arith.constant 0 : index
    %c0_2 = arith.constant 0 : index
    %1 = vector.load %arg2[%c0_1, %c0_2] : memref<152x128xf32, #tpu.memory_space<vmem>>, vector<4x128xf32>
    %c4 = arith.constant 4 : index
    %c0_3 = arith.constant 0 : index
    %2 = vector.load %arg2[%c4, %c0_3] : memref<152x128xf32, #tpu.memory_space<vmem>>, vector<4x128xf32>
    %3 = tpu.concatenate %1, %2 in 1 : vector<4x128xf32>, vector<4x128xf32> -> vector<4x256xf32>
    %cst = arith.constant dense<0.000000e+00> : vector<64x256xf32>
    %4 = tpu.matmul %0, %3, %cst {dimension_numbers = #tpu.dot_dimension_numbers<[1], [0], [0], [1], [0, 0, 1, 1], [], []>} : vector<64x4xf32>, vector<4x256xf32>, vector<64x256xf32> -> vector<64x256xf32>
    %c8 = arith.constant 8 : index
    %c0_4 = arith.constant 0 : index
    %5 = vector.load %arg2[%c8, %c0_4] : memref<152x128xf32, #tpu.memory_space<vmem>>, vector<1x32xf32>
    %c9 = arith.constant 9 : index
    %c0_5 = arith.constant 0 : index
    %6 = vector.load %arg2[%c9, %c0_5] : memref<152x128xf32, #tpu.memory_space<vmem>>, vector<1x4xf32>
    %7 = vector.extract_strided_slice %4 {offsets = [0, 0], sizes = [64, 32], strides = [1, 1]} : vector<64x256xf32> to vector<64x32xf32>
    %8 = vector.broadcast %5 : vector<1x32xf32> to vector<64x32xf32>
    %9 = arith.addf %7, %8 : vector<64x32xf32>
    %10 = math.tanh %9 : vector<64x32xf32>
    %c24 = arith.constant 24 : index
    %c0_6 = arith.constant 0 : index
    %11 = vector.load %arg2[%c24, %c0_6] : memref<152x128xf32, #tpu.memory_space<vmem>>, vector<32x4xf32>
    %cst_7 = arith.constant 3.200000e+01 : f32
    %12 = vector.broadcast %cst_7 : f32 to vector<32x4xf32>
    %13 = arith.mulf %11, %12 : vector<32x4xf32>
    %cst_8 = arith.constant dense<0.000000e+00> : vector<64x4xf32>
    %14 = tpu.matmul %10, %13, %cst_8 {dimension_numbers = #tpu.dot_dimension_numbers<[1], [0], [0], [1], [0, 0, 1, 1], [], []>} : vector<64x32xf32>, vector<32x4xf32>, vector<64x4xf32> -> vector<64x4xf32>
    %15 = vector.broadcast %6 : vector<1x4xf32> to vector<64x4xf32>
    %16 = arith.addf %14, %15 : vector<64x4xf32>
    %17 = vector.extract_strided_slice %0 {offsets = [0, 2], sizes = [64, 2], strides = [1, 1]} : vector<64x4xf32> to vector<64x2xf32>
    %c10 = arith.constant 10 : index
    %c0_9 = arith.constant 0 : index
    %18 = vector.load %arg2[%c10, %c0_9] : memref<152x128xf32, #tpu.memory_space<vmem>>, vector<2x128xf32>
    %19 = vector.extract_strided_slice %17 {offsets = [0, 0], sizes = [64, 1], strides = [1, 1]} : vector<64x2xf32> to vector<64x1xf32>
    %20 = vector.extract_strided_slice %18 {offsets = [0, 0], sizes = [1, 32], strides = [1, 1]} : vector<2x128xf32> to vector<1x32xf32>
    %21 = vector.broadcast %19 : vector<64x1xf32> to vector<64x32xf32>
    %22 = vector.broadcast %20 : vector<1x32xf32> to vector<64x32xf32>
    %23 = arith.subf %21, %22 : vector<64x32xf32>
    %24 = arith.mulf %23, %23 : vector<64x32xf32>
    %25 = vector.extract_strided_slice %17 {offsets = [0, 1], sizes = [64, 1], strides = [1, 1]} : vector<64x2xf32> to vector<64x1xf32>
    %26 = vector.extract_strided_slice %18 {offsets = [1, 0], sizes = [1, 32], strides = [1, 1]} : vector<2x128xf32> to vector<1x32xf32>
    %27 = vector.broadcast %25 : vector<64x1xf32> to vector<64x32xf32>
    %28 = vector.broadcast %26 : vector<1x32xf32> to vector<64x32xf32>
    %29 = arith.subf %27, %28 : vector<64x32xf32>
    %30 = arith.mulf %29, %29 : vector<64x32xf32>
    %31 = arith.addf %24, %30 : vector<64x32xf32>
    %cst_10 = arith.constant 0.000000e+00 : f32
    %32 = vector.broadcast %cst_10 : f32 to vector<64x32xf32>
    %33 = arith.subf %32, %31 : vector<64x32xf32>
    %34 = math.exp %33 : vector<64x32xf32>
    %cst_11 = arith.constant dense<0.000000e+00> : vector<64xf32>
    %35 = vector.multi_reduction <add>, %34, %cst_11 [1] : vector<64x32xf32> to vector<64xf32>
    %36 = vector.shape_cast %35 : vector<64xf32> to vector<64x1xf32>
    %37 = vector.extract_strided_slice %4 {offsets = [0, 128], sizes = [64, 128], strides = [1, 1]} : vector<64x256xf32> to vector<64x128xf32>
    %c16 = arith.constant 16 : index
    %c0_12 = arith.constant 0 : index
    %38 = vector.load %arg2[%c16, %c0_12] : memref<152x128xf32, #tpu.memory_space<vmem>>, vector<8x128xf32>
    %c12 = arith.constant 12 : index
    %c0_13 = arith.constant 0 : index
    %39 = vector.load %arg2[%c12, %c0_13] : memref<152x128xf32, #tpu.memory_space<vmem>>, vector<4x128xf32>
    %40 = vector.extract_strided_slice %38 {offsets = [0, 0], sizes = [1, 128], strides = [1, 1]} : vector<8x128xf32> to vector<1x128xf32>
    %41 = vector.broadcast %40 : vector<1x128xf32> to vector<64x128xf32>
    %42 = arith.addf %37, %41 : vector<64x128xf32>
    %43 = math.tanh %42 : vector<64x128xf32>
    %44 = vector.extract_strided_slice %34 {offsets = [0, 0], sizes = [64, 4], strides = [1, 1]} : vector<64x32xf32> to vector<64x4xf32>
    %cst_14 = arith.constant dense<0.000000e+00> : vector<64x128xf32>
    %45 = tpu.matmul %44, %39, %cst_14 {dimension_numbers = #tpu.dot_dimension_numbers<[1], [0], [0], [1], [0, 0, 1, 1], [], []>} : vector<64x4xf32>, vector<4x128xf32>, vector<64x128xf32> -> vector<64x128xf32>
    %46 = arith.mulf %45, %43 : vector<64x128xf32>
    %47 = vector.extract_strided_slice %38 {offsets = [1, 0], sizes = [1, 128], strides = [1, 1]} : vector<8x128xf32> to vector<1x128xf32>
    %48 = vector.broadcast %47 : vector<1x128xf32> to vector<64x128xf32>
    %49 = arith.addf %37, %48 : vector<64x128xf32>
    %50 = math.tanh %49 : vector<64x128xf32>
    %51 = vector.extract_strided_slice %34 {offsets = [0, 4], sizes = [64, 4], strides = [1, 1]} : vector<64x32xf32> to vector<64x4xf32>
    %cst_15 = arith.constant dense<0.000000e+00> : vector<64x128xf32>
    %52 = tpu.matmul %51, %39, %cst_15 {dimension_numbers = #tpu.dot_dimension_numbers<[1], [0], [0], [1], [0, 0, 1, 1], [], []>} : vector<64x4xf32>, vector<4x128xf32>, vector<64x128xf32> -> vector<64x128xf32>
    %53 = arith.mulf %52, %50 : vector<64x128xf32>
    %54 = arith.addf %46, %53 : vector<64x128xf32>
    %55 = vector.extract_strided_slice %38 {offsets = [2, 0], sizes = [1, 128], strides = [1, 1]} : vector<8x128xf32> to vector<1x128xf32>
    %56 = vector.broadcast %55 : vector<1x128xf32> to vector<64x128xf32>
    %57 = arith.addf %37, %56 : vector<64x128xf32>
    %58 = math.tanh %57 : vector<64x128xf32>
    %59 = vector.extract_strided_slice %34 {offsets = [0, 8], sizes = [64, 4], strides = [1, 1]} : vector<64x32xf32> to vector<64x4xf32>
    %cst_16 = arith.constant dense<0.000000e+00> : vector<64x128xf32>
    %60 = tpu.matmul %59, %39, %cst_16 {dimension_numbers = #tpu.dot_dimension_numbers<[1], [0], [0], [1], [0, 0, 1, 1], [], []>} : vector<64x4xf32>, vector<4x128xf32>, vector<64x128xf32> -> vector<64x128xf32>
    %61 = arith.mulf %60, %58 : vector<64x128xf32>
    %62 = arith.addf %54, %61 : vector<64x128xf32>
    %63 = vector.extract_strided_slice %38 {offsets = [3, 0], sizes = [1, 128], strides = [1, 1]} : vector<8x128xf32> to vector<1x128xf32>
    %64 = vector.broadcast %63 : vector<1x128xf32> to vector<64x128xf32>
    %65 = arith.addf %37, %64 : vector<64x128xf32>
    %66 = math.tanh %65 : vector<64x128xf32>
    %67 = vector.extract_strided_slice %34 {offsets = [0, 12], sizes = [64, 4], strides = [1, 1]} : vector<64x32xf32> to vector<64x4xf32>
    %cst_17 = arith.constant dense<0.000000e+00> : vector<64x128xf32>
    %68 = tpu.matmul %67, %39, %cst_17 {dimension_numbers = #tpu.dot_dimension_numbers<[1], [0], [0], [1], [0, 0, 1, 1], [], []>} : vector<64x4xf32>, vector<4x128xf32>, vector<64x128xf32> -> vector<64x128xf32>
    %69 = arith.mulf %68, %66 : vector<64x128xf32>
    %70 = arith.addf %62, %69 : vector<64x128xf32>
    %71 = vector.extract_strided_slice %38 {offsets = [4, 0], sizes = [1, 128], strides = [1, 1]} : vector<8x128xf32> to vector<1x128xf32>
    %72 = vector.broadcast %71 : vector<1x128xf32> to vector<64x128xf32>
    %73 = arith.addf %37, %72 : vector<64x128xf32>
    %74 = math.tanh %73 : vector<64x128xf32>
    %75 = vector.extract_strided_slice %34 {offsets = [0, 16], sizes = [64, 4], strides = [1, 1]} : vector<64x32xf32> to vector<64x4xf32>
    %cst_18 = arith.constant dense<0.000000e+00> : vector<64x128xf32>
    %76 = tpu.matmul %75, %39, %cst_18 {dimension_numbers = #tpu.dot_dimension_numbers<[1], [0], [0], [1], [0, 0, 1, 1], [], []>} : vector<64x4xf32>, vector<4x128xf32>, vector<64x128xf32> -> vector<64x128xf32>
    %77 = arith.mulf %76, %74 : vector<64x128xf32>
    %78 = arith.addf %70, %77 : vector<64x128xf32>
    %79 = vector.extract_strided_slice %38 {offsets = [5, 0], sizes = [1, 128], strides = [1, 1]} : vector<8x128xf32> to vector<1x128xf32>
    %80 = vector.broadcast %79 : vector<1x128xf32> to vector<64x128xf32>
    %81 = arith.addf %37, %80 : vector<64x128xf32>
    %82 = math.tanh %81 : vector<64x128xf32>
    %83 = vector.extract_strided_slice %34 {offsets = [0, 20], sizes = [64, 4], strides = [1, 1]} : vector<64x32xf32> to vector<64x4xf32>
    %cst_19 = arith.constant dense<0.000000e+00> : vector<64x128xf32>
    %84 = tpu.matmul %83, %39, %cst_19 {dimension_numbers = #tpu.dot_dimension_numbers<[1], [0], [0], [1], [0, 0, 1, 1], [], []>} : vector<64x4xf32>, vector<4x128xf32>, vector<64x128xf32> -> vector<64x128xf32>
    %85 = arith.mulf %84, %82 : vector<64x128xf32>
    %86 = arith.addf %78, %85 : vector<64x128xf32>
    %87 = vector.extract_strided_slice %38 {offsets = [6, 0], sizes = [1, 128], strides = [1, 1]} : vector<8x128xf32> to vector<1x128xf32>
    %88 = vector.broadcast %87 : vector<1x128xf32> to vector<64x128xf32>
    %89 = arith.addf %37, %88 : vector<64x128xf32>
    %90 = math.tanh %89 : vector<64x128xf32>
    %91 = vector.extract_strided_slice %34 {offsets = [0, 24], sizes = [64, 4], strides = [1, 1]} : vector<64x32xf32> to vector<64x4xf32>
    %cst_20 = arith.constant dense<0.000000e+00> : vector<64x128xf32>
    %92 = tpu.matmul %91, %39, %cst_20 {dimension_numbers = #tpu.dot_dimension_numbers<[1], [0], [0], [1], [0, 0, 1, 1], [], []>} : vector<64x4xf32>, vector<4x128xf32>, vector<64x128xf32> -> vector<64x128xf32>
    %93 = arith.mulf %92, %90 : vector<64x128xf32>
    %94 = arith.addf %86, %93 : vector<64x128xf32>
    %95 = vector.extract_strided_slice %38 {offsets = [7, 0], sizes = [1, 128], strides = [1, 1]} : vector<8x128xf32> to vector<1x128xf32>
    %96 = vector.broadcast %95 : vector<1x128xf32> to vector<64x128xf32>
    %97 = arith.addf %37, %96 : vector<64x128xf32>
    %98 = math.tanh %97 : vector<64x128xf32>
    %99 = vector.extract_strided_slice %34 {offsets = [0, 28], sizes = [64, 4], strides = [1, 1]} : vector<64x32xf32> to vector<64x4xf32>
    %cst_21 = arith.constant dense<0.000000e+00> : vector<64x128xf32>
    %100 = tpu.matmul %99, %39, %cst_21 {dimension_numbers = #tpu.dot_dimension_numbers<[1], [0], [0], [1], [0, 0, 1, 1], [], []>} : vector<64x4xf32>, vector<4x128xf32>, vector<64x128xf32> -> vector<64x128xf32>
    %101 = arith.mulf %100, %98 : vector<64x128xf32>
    %102 = arith.addf %94, %101 : vector<64x128xf32>
    %c24_22 = arith.constant 24 : index
    %c0_23 = arith.constant 0 : index
    %103 = vector.load %arg2[%c24_22, %c0_23] : memref<152x128xf32, #tpu.memory_space<vmem>>, vector<128x4xf32>
    %cst_24 = arith.constant dense<0.000000e+00> : vector<64x4xf32>
    %104 = tpu.matmul %102, %103, %cst_24 {dimension_numbers = #tpu.dot_dimension_numbers<[1], [0], [0], [1], [0, 0, 1, 1], [], []>} : vector<64x128xf32>, vector<128x4xf32>, vector<64x4xf32> -> vector<64x4xf32>
    %cst_25 = arith.constant 3.125000e-02 : f32
    %105 = vector.broadcast %cst_25 : f32 to vector<64x1xf32>
    %106 = arith.mulf %36, %105 : vector<64x1xf32>
    %107 = vector.broadcast %6 : vector<1x4xf32> to vector<64x4xf32>
    %108 = vector.broadcast %106 : vector<64x1xf32> to vector<64x4xf32>
    %109 = arith.mulf %107, %108 : vector<64x4xf32>
    %110 = arith.addf %104, %109 : vector<64x4xf32>
    %cst_26 = arith.constant dense<0.000000e+00> : vector<64xf32>
    %111 = vector.multi_reduction <add>, %0, %cst_26 [1] : vector<64x4xf32> to vector<64xf32>
    %112 = vector.shape_cast %111 : vector<64xf32> to vector<64x1xf32>
    %113 = math.sin %112 : vector<64x1xf32>
    %114 = arith.subf %16, %110 : vector<64x4xf32>
    %115 = vector.broadcast %113 : vector<64x1xf32> to vector<64x4xf32>
    %116 = arith.subf %114, %115 : vector<64x4xf32>
    %117 = arith.mulf %116, %116 : vector<64x4xf32>
    %118 = vector.shape_cast %117 : vector<64x4xf32> to vector<1x64x4xf32>
    %cst_27 = arith.constant dense<0.000000e+00> : vector<1xf32>
    %119 = vector.multi_reduction <add>, %118, %cst_27 [1, 2] : vector<1x64x4xf32> to vector<1xf32>
    %120 = vector.shape_cast %119 : vector<1xf32> to vector<1x1x1xf32>
    %121 = vector.extract %120[0, 0, 0] : f32 from vector<1x1x1xf32>
    %cst_28 = arith.constant 1.562500e-02 : f32
    %122 = arith.mulf %121, %cst_28 : f32
    %c0_29 = arith.constant 0 : index
    %c0_30 = arith.constant 0 : index
    %123 = memref.load %arg3[%c0_29, %c0_30] : memref<1x1xf32, #tpu.memory_space<smem>>
    memref.store %122, %arg3[%c0_29, %c0_30] : memref<1x1xf32, #tpu.memory_space<smem>>
    return
  }
  func.func @transform_0(%arg0: i32) -> (i32, i32) {
    %c0_i32 = arith.constant 0 : i32
    %c0_i32_0 = arith.constant 0 : i32
    return %arg0, %c0_i32 : i32, i32
  }
  func.func @transform_1(%arg0: i32) -> (i32, i32) {
    %c0_i32 = arith.constant 0 : i32
    %c0_i32_0 = arith.constant 0 : i32
    %c0_i32_1 = arith.constant 0 : i32
    return %c0_i32, %c0_i32_0 : i32, i32
  }
  func.func @transform_2(%arg0: i32) -> (i32, i32) {
    %c0_i32 = arith.constant 0 : i32
    %c0_i32_0 = arith.constant 0 : i32
    return %arg0, %c0_i32 : i32, i32
  }
}

</mosaic_0001>

<bundles_post_ra>
// kernel: tile.14
= control target key start
LH: loop header
LB: loop body
LE: loop exit
PB: predicated region body
PF: predicated region fallthrough
CT: control target
= control target key end

     0   :  { %s29_s10 = smov 3  ;;  %s10_s11 = smov 3  ;;  %vm12_vm0 = vcmask 261120   ;;  %vm19_vm1 = vcmask 1048320   ;;  %vm26_vm2 = vcmask 785920   ;;  %vm33_vm3 = vcmask 523520   ;;  %s67_s0 = inlined_call_operand.vmem [shape: f32[2,4,32], index: 0, kind: input, shape index: {}]   ;;  %s68_s1 = inlined_call_operand.vmem [shape: f32[2,128], index: 1, kind: output, shape index: {}]  }
   0x1   :  { %v41_v0 = vld [vmem:[%s67_s0 + $0x4] sm:$0xf]  ;;  %v8_v1 = vld [vmem:[%s67_s0] sm:$0xf]  ;;  %s15_s0 = smov 3  ;;  %s22_s12 = smov 3 }
   0x2   :  { %7 = vst [vmem:[#allocation1 + $0x8] sm:$0xf] %v41_v0  ;;  %9 = vst [vmem:[#allocation1] sm:$0xf] %v8_v1  ;;  %s45_s13 = smov 96   ;;  %s46_s14 = smov 32  }
   0x3   :  { %s47_s15 = smov 64  }
   0x9   :  { %v16_v2 = vld [vmem:[#allocation1 + $0x3] ss:$8 sm:%s15_s0]   ;;  %v30_v3 = vld [vmem:[#allocation1 + $0x1] ss:$8 sm:%s29_s10]   ;;  %v11_v4 = vld [vmem:[#allocation1] ss:$8 sm:%s10_s11]  }
   0xa   :  { %17 = vrot.lane.b32.xlu0 %v16_v2, %s45_s13  ;;  %31 = vrot.lane.b32.xlu1 %v30_v3, %s46_s14  ;;  %v23_v5 = vld [vmem:[#allocation1 + $0x2] ss:$8 sm:%s22_s12]   ;;  %13 = vst.msk [vmem:[#allocation0] sm:$0x3] %vm12_vm0, %v11_v4  }
   0xe   :  { %24 = vrot.lane.b32.xlu0 %v23_v5, %s47_s15 }
  0x7c   :  { %v18_v6 = vpop.permute.xlu0 %17   ;;  %v32_v7 = vpop.permute.xlu1 %31  }
  0x7d   :  { %20 = vst.msk [vmem:[#allocation0] sm:$0x3] %vm19_vm1, %v18_v6  }
  0x80   :  { %v25_v8 = vpop.permute.xlu0 %24  }
  0x81   :  { %27 = vst.msk [vmem:[#allocation0] sm:$0x3] %vm26_vm2, %v25_v8  }
  0x82   :  { %34 = vst.msk [vmem:[#allocation0] sm:$0x3] %vm33_vm3, %v32_v7  }
  0x89   :  { %v38_v9 = vld [vmem:[#allocation0] sm:$0x3] }
  0x8a   :  { %40 = vst [vmem:[%s68_s1] sm:$0x3] %v38_v9 }

// kernel: integro_pinn_loss.1
= control target key start
LH: loop header
LB: loop body
LE: loop exit
PB: predicated region body
PF: predicated region fallthrough
CT: control target
= control target key end

     0   :  { %vm47_vm0 = vcmask 1043456   ;;  %v3634_v2 = vmov 2   ;;  %vm22_vm1 = vcmask 31744   ;;  %v3635_v5 = vmov 0.0   ;;  %s5840_s0 = inlined_call_operand.vmem [shape: f32[64,4], index: 0, kind: input, shape index: {}]   ;;  %s5841_s1 = inlined_call_operand.vmem [shape: f32[152,128], index: 1, kind: input, shape index: {}]   ;;  %s5842_s2 = inlined_call_operand.hbm [shape: f32[1,1], index: 2, kind: output, shape index: {}]  }
   0x1   :  { %v21_v0 = vld [vmem:[%s5841_s1 + $0x4] sm:$0xf]  ;;  %v20_v1 = vld [vmem:[%s5841_s1] sm:$0xf]  ;;  %3427 = vset.pattern.permute.xlu1 %v3634_v2  ;;  %3425 = vset.pattern.permute.xlu0 %v3634_v2  ;;  %v3675_v3 = vld [vmem:[%s5840_s0 + $0x8] sm:$0xff] }
   0x2   :  { %v3680_v4 = vld [vmem:[%s5840_s0] sm:$0xff]  ;;  %2922 = vmatprep.subr.msk.mxu0 %vm47_vm0, %v21_v0  ;;  %118 = vmatprep.mubr.f32.mxu0 %v3635_v5 }
   0x3   :  { %2923 = vmatpush1.msk.msra.mxu0 %vm47_vm0, %v20_v1  ;;  %337 = vperm.xlu1 %3427, %v3675_v3  }
   0x4   :  { %333 = vperm.xlu0 %3425, %v3680_v4   ;;  %2924 = vmatmul.mubr.msk.f32.vlgmr.msra.gmra.mrb[0].mxu0 %vm22_vm1, %v3680_v4 }
   0x5   :  { %7 = vsyncpa [#allocation3], 0  ;;  %124 = vmatprep.mubr.f32.mxu0 %v3635_v5  ;;  %v3636_v6 = vmov 3   ;;  %v3695_v7 = vld [vmem:[%s5840_s0 + $0x10] sm:$0xff]  ;;  %v3704_v8 = vld [vmem:[%s5840_s0 + $0x18] sm:$0xff]  ;;  %v364_v15 = vlaneseq  ;;  %s3637_s12 = smov 124  }
   0x6   :  { %v3713_v9 = vld [vmem:[%s5840_s0 + $0x20] sm:$0xff]  ;;  %v3722_v10 = vld [vmem:[%s5840_s0 + $0x28] sm:$0xff]  ;;  %v3731_v11 = vld [vmem:[%s5840_s0 + $0x30] sm:$0xff]  ;;  %s3638_s13 = smov 120   ;;  %s3639_s14 = smov 116   ;;  %vm201_vm2 = vcmask 261120  }
   0x7   :  { %3428 = vset.pattern.permute.xlu1 %v3636_v6  ;;  %v3740_v12 = vld [vmem:[%s5840_s0 + $0x38] sm:$0xff]  ;;  %v190_v14 = vld [vmem:[%s5841_s1 + $0x20] sm:$0xff]  ;;  %v191_v19 = vld [vmem:[%s5841_s1 + $0x28] sm:$0xff]  ;;  %v3758_v21 = vshrl.u32 %v364_v15, 7  ;;  %s3640_s15 = smov 112   ;;  %s3641_s18 = smov 108  }
   0x8   :  { %3426 = vset.pattern.permute.xlu0 %v3636_v6  ;;  %389 = vperm.xlu1 %3428, %v3675_v3   ;;  %v189_v13 = vld [vmem:[%s5841_s1 + $0x18] sm:$0xff]  ;;  %v194_v17 = vmul.f32 32.0, %v190_v14  ;;  %v192_v20 = vld [vmem:[%s5841_s1 + $0x30] sm:$0xff]  ;;  %v195_v22 = vmul.f32 32.0, %v191_v19  ;;  %v331_v26 = vld [vmem:[%s5841_s1 + $0xa] sm:$0x3] }
   0x9   :  { %385 = vperm.xlu0 %3426, %v3680_v4   ;;  %2925 = vmatmul.mubr.msk.f32.gmra.mrb[2].mxu0 %vm22_vm1, %v3675_v3  ;;  %v193_v16 = vmul.f32 32.0, %v189_v13  ;;  %v196_v23 = vmul.f32 32.0, %v192_v20  ;;  %v366_v25 = vsub.s32 0, %v3758_v21  ;;  %v418_v27 = vsub.s32 1, %v3758_v21  ;;  %v3776_v32 = vld [vmem:[%s5841_s1 + $0xc] sm:$0xf] }
   0xa   :  { %130 = vmatprep.mubr.f32.mxu0 %v3635_v5  ;;  %s3642_s19 = smov 104   ;;  %s3643_s20 = smov 100  }
   0xb   :  { %v3330_v18 = vpack.c.bf16 %v194_v17, %v193_v16  ;;  %v3334_v24 = vpack.c.bf16 %v196_v23, %v195_v22  ;;  %v3767_v28 = vrot.slane %v331_v26, %v366_v25  ;;  %v3771_v31 = vrot.slane %v331_v26, %v418_v27  ;;  %s3622_s3 = scalar_lea.hbm %s5842_s2, 16 }
   0xc   :  { %3429 = vset.pattern.permute.xlu1 %v3634_v2  ;;  %p3623_p0 = scmp.ne.s32.totalorder %s5842_s2, %s3622_s3  ;;  %p3626_p1 = scmp.lt.u32.totalorder %s3622_s3, %s5842_s2 }
   0xd   :  { %393 = vperm.xlu0 %3426, %v3695_v7   ;;  %2926 = vmatmul.mubr.msk.f32.gmra.mrb[4].mxu0 %vm22_vm1, %v3695_v7 }
   0xe   :  { %341 = vperm.xlu1 %3429, %v3695_v7   ;;  %136 = vmatprep.mubr.f32.mxu0 %v3635_v5  ;;  %p3628_p2 = pnand %p3626_p1, %p3623_p0 }
   0xf   :  { %3370 = vmatprep.subr.bf16.mxu1 %v3330_v18  ;;  %3331 = vmatprep.subr.bf16.mxu0 %v3330_v18 }
  0x10   :  { %3372 = vmatpush3.bf16.msra.mxu1 %v3330_v18  ;;  %3333 = vmatpush3.bf16.msra.mxu0 %v3330_v18 }
  0x11   :  { %397 = vperm.xlu0 %3426, %v3704_v8   ;;  %2927 = vmatmul.mubr.msk.f32.gmra.mrb[6].mxu0 %vm22_vm1, %v3704_v8 }
  0x12   :  { %345 = vperm.xlu1 %3429, %v3704_v8   ;;  %142 = vmatprep.mubr.f32.mxu0 %v3635_v5 }
  0x13   :  { %3371 = vmatprep.subr.bf16.mxu1 %v3334_v24  ;;  %3335 = vmatprep.subr.bf16.mxu0 %v3334_v24 }
  0x14   :  { %3373 = vmatpush3.bf16.msra.mxu1 %v3334_v24  ;;  %3337 = vmatpush3.bf16.msra.mxu0 %v3334_v24 }
  0x15   :  { %401 = vperm.xlu0 %3426, %v3713_v9   ;;  %2928 = vmatmul.mubr.msk.f32.gmra.mrb[8].mxu0 %vm22_vm1, %v3713_v9 }
  0x16   :  { %349 = vperm.xlu1 %3429, %v3713_v9   ;;  %148 = vmatprep.mubr.f32.mxu0 %v3635_v5 }
  0x17   :  { %3174 = vmatprep.subr.msk.mxu1 %vm47_vm0, %v3776_v32  ;;  %3188 = vmatprep.subr.msk.mxu0 %vm47_vm0, %v3776_v32 }
  0x19   :  { %405 = vperm.xlu0 %3426, %v3722_v10   ;;  %2929 = vmatmul.mubr.msk.f32.gmra.mrb[10].mxu0 %vm22_vm1, %v3722_v10 }
  0x1a   :  { %353 = vperm.xlu1 %3429, %v3722_v10   ;;  %154 = vmatprep.mubr.f32.mxu0 %v3635_v5 }
  0x1d   :  { %409 = vperm.xlu0 %3426, %v3731_v11   ;;  %2930 = vmatmul.mubr.msk.f32.gmra.mrb[12].mxu0 %vm22_vm1, %v3731_v11 }
  0x1e   :  { %357 = vperm.xlu1 %3429, %v3731_v11   ;;  %160 = vmatprep.mubr.f32.mxu0 %v3635_v5 }
  0x21   :  { %413 = vperm.xlu0 %3426, %v3740_v12   ;;  %2931 = vmatmul.mubr.msk.f32.gmra.mrb[14].mxu0 %vm22_vm1, %v3740_v12 }
  0x22   :  { %361 = vperm.xlu1 %3429, %v3740_v12  }
  0x82   :  { %v338_v29 = vpop.permute.xlu1 %337 }
  0x83   :  { %v334_v30 = vpop.permute.xlu0 %333  ;;  %v369_v33 = vsub.f32 %v338_v29, %v3767_v28 }
  0x84   :  { %v368_v34 = vsub.f32 %v334_v30, %v3767_v28 }
  0x85   :  { %v377_v39 = vmul.f32 %v369_v33, %v369_v33 }
  0x86   :  { %v376_v41 = vmul.f32 %v368_v34, %v368_v34 }
  0x87   :  { %v390_v35 = vpop.permute.xlu1 %389 }
  0x88   :  { %v421_v36 = vsub.f32 %v390_v35, %v3771_v31  ;;  %v386_v37 = vpop.permute.xlu0 %385 }
  0x89   :  { %v420_v38 = vsub.f32 %v386_v37, %v3771_v31 }
  0x8a   :  { %v429_v40 = vmul.f32 %v421_v36, %v421_v36 }
  0x8b   :  { %v428_v42 = vmul.f32 %v420_v38, %v420_v38 }
  0x8c   :  { %v437_v43 = vadd.f32 %v429_v40, %v377_v39  ;;  %v394_v44 = vpop.permute.xlu0 %393 }
  0x8d   :  { %v436_v45 = vadd.f32 %v428_v42, %v376_v41  ;;  %v422_v46 = vsub.f32 %v394_v44, %v3771_v31  ;;  %v342_v47 = vpop.permute.xlu1 %341 }
  0x8e   :  { %v445_v48 = vsub.f32 0.0, %v437_v43  ;;  %v370_v49 = vsub.f32 %v342_v47, %v3767_v28 }
  0x8f   :  { %v444_v50 = vsub.f32 0.0, %v436_v45  ;;  %v430_v51 = vmul.f32 %v422_v46, %v422_v46 }
  0x90   :  { %v454_v52 = vmul.f32 1.442695, %v445_v48  ;;  %v378_v53 = vmul.f32 %v370_v49, %v370_v49  ;;  %v398_v54 = vpop.permute.xlu0 %397 }
  0x91   :  { %v452_v55 = vmul.f32 1.442695, %v444_v50  ;;  %v423_v56 = vsub.f32 %v398_v54, %v3771_v31  ;;  %v346_v57 = vpop.permute.xlu1 %345 }
  0x92   :  { %3430 = vpow2.f32 %v454_v52  ;;  %v438_v58 = vadd.f32 %v430_v51, %v378_v53  ;;  %v371_v59 = vsub.f32 %v346_v57, %v3767_v28 }
  0x93   :  { %3432 = vpow2.f32 %v452_v55  ;;  %v431_v60 = vmul.f32 %v423_v56, %v423_v56 }
  0x94   :  { %v446_v61 = vsub.f32 0.0, %v438_v58  ;;  %v379_v62 = vmul.f32 %v371_v59, %v371_v59  ;;  %v402_v63 = vpop.permute.xlu0 %401 }
  0x95   :  { %v424_v0 = vsub.f32 %v402_v63, %v3771_v31  ;;  %v350_v1 = vpop.permute.xlu1 %349 }
  0x96   :  { %v456_v2 = vmul.f32 1.442695, %v446_v61  ;;  %v439_v5 = vadd.f32 %v431_v60, %v379_v62  ;;  %v372_v6 = vsub.f32 %v350_v1, %v3767_v28  ;;  %v2932_v60 = vld [vmem:[%s5841_s1 + $0x8] ss:$0 sm:$0xff] }
  0x97   :  { %v432_v13 = vmul.f32 %v424_v0, %v424_v0 }
  0x98   :  { %3434 = vpow2.f32 %v456_v2  ;;  %v447_v14 = vsub.f32 0.0, %v439_v5  ;;  %v380_v15 = vmul.f32 %v372_v6, %v372_v6  ;;  %v406_v16 = vpop.permute.xlu0 %405 }
  0x99   :  { %v425_v17 = vsub.f32 %v406_v16, %v3771_v31  ;;  %v354_v18 = vpop.permute.xlu1 %353 }
  0x9a   :  { %v458_v19 = vmul.f32 1.442695, %v447_v14  ;;  %v440_v20 = vadd.f32 %v432_v13, %v380_v15  ;;  %v373_v22 = vsub.f32 %v354_v18, %v3767_v28 }
  0x9b   :  { %v433_v23 = vmul.f32 %v425_v17, %v425_v17 }
  0x9c   :  { %v3794_v24 = vpop.eup %3430  ;;  %3436 = vpow2.f32 %v458_v19  ;;  %v448_v26 = vsub.f32 0.0, %v440_v20  ;;  %v381_v29 = vmul.f32 %v373_v22, %v373_v22  ;;  %v410_v30 = vpop.permute.xlu0 %409 }
  0x9d   :  { %v3796_v33 = vpop.eup %3432  ;;  %v426_v34 = vsub.f32 %v410_v30, %v3771_v31  ;;  %v358_v35 = vpop.permute.xlu1 %357  ;;  %676 = vrot.lane.b32.xlu0 %v3794_v24, %s3637_s12 }
  0x9e   :  { %v460_v36 = vmul.f32 1.442695, %v448_v26  ;;  %v441_v37 = vadd.f32 %v433_v23, %v381_v29  ;;  %v374_v38 = vsub.f32 %v358_v35, %v3767_v28  ;;  %674 = vrot.lane.b32.xlu1 %v3796_v33, %s3637_s12 }
  0x9f   :  { %v434_v39 = vmul.f32 %v426_v34, %v426_v34 }
  0xa0   :  { %3438 = vpow2.f32 %v460_v36  ;;  %v449_v40 = vsub.f32 0.0, %v441_v37  ;;  %v382_v41 = vmul.f32 %v374_v38, %v374_v38  ;;  %v414_v42 = vpop.permute.xlu0 %413 }
  0xa1   :  { %v427_v43 = vsub.f32 %v414_v42, %v3771_v31  ;;  %v362_v44 = vpop.permute.xlu1 %361 }
  0xa2   :  { %v3805_v45 = vpop.eup %3434  ;;  %v462_v46 = vmul.f32 1.442695, %v449_v40  ;;  %v442_v47 = vadd.f32 %v434_v39, %v382_v41  ;;  %v375_v48 = vsub.f32 %v362_v44, %v3767_v28  ;;  %v3944_v44 = vld [vmem:[%s5841_s1 + $0x10] sm:$0xff] }
  0xa3   :  { %v435_v49 = vmul.f32 %v427_v43, %v427_v43  ;;  %678 = vrot.lane.b32.xlu1 %v3805_v45, %s3637_s12 }
  0xa4   :  { %3440 = vpow2.f32 %v462_v46  ;;  %v450_v50 = vsub.f32 0.0, %v442_v47  ;;  %v383_v51 = vmul.f32 %v375_v48, %v375_v48  ;;  %v3957_v46 = vrot.slane %v3944_v44, %v366_v25 }
  0xa6   :  { %v3810_v52 = vpop.eup %3436  ;;  %v464_v53 = vmul.f32 1.442695, %v450_v50  ;;  %v443_v54 = vadd.f32 %v435_v49, %v383_v51 }
  0xa7   :  { %680 = vrot.lane.b32.xlu0 %v3810_v52, %s3637_s12 }
  0xa8   :  { %3442 = vpow2.f32 %v464_v53  ;;  %v451_v31 = vsub.f32 0.0, %v443_v54 }
  0xaa   :  { %v3814_v55 = vpop.eup %3438  ;;  %v466_v56 = vmul.f32 1.442695, %v451_v31  ;;  %v3993_v31 = vrot.slane %v3944_v44, %v418_v27 }
  0xab   :  { %682 = vrot.lane.b32.xlu1 %v3814_v55, %s3637_s12 }
  0xac   :  { %3444 = vpow2.f32 %v466_v56 }
  0xae   :  { %v3818_v28 = vpop.eup %3440 }
  0xaf   :  { %684 = vrot.lane.b32.xlu0 %v3818_v28, %s3637_s12 }
  0xb2   :  { %v3822_v57 = vpop.eup %3442 }
  0xb3   :  { %686 = vrot.lane.b32.xlu1 %v3822_v57, %s3637_s12 }
  0xb6   :  { %v3826_v58 = vpop.eup %3444 }
  0xb7   :  { %847 = vrot.lane.b32.xlu1 %v3796_v33, %s3638_s13  ;;  %688 = vrot.lane.b32.xlu0 %v3826_v58, %s3637_s12 }
  0xbb   :  { %1020 = vrot.lane.b32.xlu1 %v3796_v33, %s3639_s14  ;;  %849 = vrot.lane.b32.xlu0 %v3794_v24, %s3638_s13 }
  0xbf   :  { %851 = vrot.lane.b32.xlu1 %v3805_v45, %s3638_s13  ;;  %1022 = vrot.lane.b32.xlu0 %v3794_v24, %s3639_s14 }
  0xc3   :  { %1024 = vrot.lane.b32.xlu1 %v3805_v45, %s3639_s14  ;;  %853 = vrot.lane.b32.xlu0 %v3810_v52, %s3638_s13 }
  0xc7   :  { %855 = vrot.lane.b32.xlu1 %v3814_v55, %s3638_s13  ;;  %1026 = vrot.lane.b32.xlu0 %v3810_v52, %s3639_s14 }
  0xcb   :  { %1028 = vrot.lane.b32.xlu1 %v3814_v55, %s3639_s14  ;;  %857 = vrot.lane.b32.xlu0 %v3818_v28, %s3638_s13 }
  0xcf   :  { %859 = vrot.lane.b32.xlu1 %v3822_v57, %s3638_s13  ;;  %1030 = vrot.lane.b32.xlu0 %v3818_v28, %s3639_s14 }
  0xd3   :  { %1032 = vrot.lane.b32.xlu1 %v3822_v57, %s3639_s14  ;;  %861 = vrot.lane.b32.xlu0 %v3826_v58, %s3638_s13 }
  0xd7   :  { %1193 = vrot.lane.b32.xlu1 %v3796_v33, %s3640_s15  ;;  %1034 = vrot.lane.b32.xlu0 %v3826_v58, %s3639_s14  ;;  %v120_v59 = vpop.f32.mrb[0].mxu0 }
  0xd8   :  { %v173_v61 = vadd.f32 %v2932_v60, %v120_v59  ;;  %v3851_v62 = vpop.f32.mrb[1].mxu0 }
  0xda   :  { %3446 = vtanh.f32 %v173_v61 }
  0xdb   :  { %1366 = vrot.lane.b32.xlu1 %v3796_v33, %s3641_s18  ;;  %1195 = vrot.lane.b32.xlu0 %v3794_v24, %s3640_s15 }
  0xdc   :  { %v126_v63 = vpop.f32.mrb[2].mxu0 }
  0xdd   :  { %v174_v0 = vadd.f32 %v2932_v60, %v126_v63  ;;  %v3857_v1 = vpop.f32.mrb[3].mxu0  ;;  %v3999_v63 = vadd.f32 %v3957_v46, %v3851_v62 }
  0xde   :  { %v3967_v48 = vadd.f32 %v3957_v46, %v3857_v1 }
  0xdf   :  { %1197 = vrot.lane.b32.xlu1 %v3805_v45, %s3640_s15  ;;  %1368 = vrot.lane.b32.xlu0 %v3794_v24, %s3641_s18  ;;  %3448 = vtanh.f32 %v174_v0  ;;  %v4003_v0 = vadd.f32 %v3993_v31, %v3851_v62 }
  0xe0   :  { %v132_v2 = vpop.f32.mrb[4].mxu0 }
  0xe1   :  { %v175_v5 = vadd.f32 %v2932_v60, %v132_v2  ;;  %v3863_v6 = vpop.f32.mrb[5].mxu0 }
  0xe3   :  { %1370 = vrot.lane.b32.xlu1 %v3805_v45, %s3641_s18  ;;  %1199 = vrot.lane.b32.xlu0 %v3810_v52, %s3640_s15  ;;  %3450 = vtanh.f32 %v175_v5  ;;  %v4013_v5 = vadd.f32 %v3993_v31, %v3857_v1 }
  0xe4   :  { %v3447_v13 = vpop.eup %3446  ;;  %v138_v14 = vpop.f32.mrb[6].mxu0 }
  0xe5   :  { %v176_v15 = vadd.f32 %v2932_v60, %v138_v14  ;;  %v3869_v16 = vpop.f32.mrb[7].mxu0  ;;  %3162 = vmatprep.mubr.msk.f32.mxu0 %vm201_vm2, %v3447_v13  ;;  %v2005_v13 = vsel %vm22_vm1, %v3675_v3, 0.0  ;;  %v2002_v14 = vsel %vm22_vm1, %v3680_v4, 0.0  ;;  %v2008_v3 = vsel %vm22_vm1, %v3695_v7, 0.0 }
  0xe6   :  { %v2011_v4 = vsel %vm22_vm1, %v3704_v8, 0.0  ;;  %v2014_v7 = vsel %vm22_vm1, %v3713_v9, 0.0  ;;  %v2017_v8 = vsel %vm22_vm1, %v3722_v10, 0.0  ;;  %v2020_v9 = vsel %vm22_vm1, %v3731_v11, 0.0 }
  0xe7   :  { %1201 = vrot.lane.b32.xlu1 %v3814_v55, %s3640_s15  ;;  %1372 = vrot.lane.b32.xlu0 %v3810_v52, %s3641_s18  ;;  %3452 = vtanh.f32 %v176_v15  ;;  %v2023_v10 = vsel %vm22_vm1, %v3740_v12, 0.0  ;;  %v468_v12 = vsel %vm201_vm2, %v3796_v33, 0.0 }
  0xe8   :  { %v144_v17 = vpop.f32.mrb[8].mxu0 }
  0xe9   :  { %v3449_v18 = vpop.eup %3448  ;;  %v177_v19 = vadd.f32 %v2932_v60, %v144_v17  ;;  %v3876_v20 = vpop.f32.mrb[9].mxu0 }
  0xea   :  { %3163 = vmatmul.mubr.msk.f32.vlgmr.msra.gmra.mrb[16].mxu0 %vm201_vm2, %v3449_v18  ;;  %v4027_v18 = vadd.f32 %v3957_v46, %v3863_v6 }
  0xeb   :  { %1374 = vrot.lane.b32.xlu1 %v3814_v55, %s3641_s18  ;;  %1203 = vrot.lane.b32.xlu0 %v3818_v28, %s3640_s15  ;;  %3454 = vtanh.f32 %v177_v19  ;;  %v4031_v19 = vadd.f32 %v3993_v31, %v3863_v6 }
  0xec   :  { %v150_v22 = vpop.f32.mrb[10].mxu0  ;;  %3189 = vmatpush3.msk.msra.mxu0 %vm47_vm0, %v3776_v32 }
  0xed   :  { %v3451_v23 = vpop.eup %3450  ;;  %v178_v26 = vadd.f32 %v2932_v60, %v150_v22  ;;  %v3885_v29 = vpop.f32.mrb[11].mxu0  ;;  %3216 = vmatprep.subr.msk.mxu0 %vm47_vm0, %v3776_v32 }
  0xee   :  { %3165 = vmatprep.mubr.msk.f32.mxu0 %vm201_vm2, %v3451_v23 }
  0xef   :  { %1205 = vrot.lane.b32.xlu1 %v3822_v57, %s3640_s15  ;;  %1376 = vrot.lane.b32.xlu0 %v3818_v28, %s3641_s18  ;;  %3456 = vtanh.f32 %v178_v26  ;;  %v4041_v26 = vadd.f32 %v3957_v46, %v3869_v16 }
  0xf0   :  { %v156_v30 = vpop.f32.mrb[12].mxu0 }
  0xf1   :  { %v3453_v34 = vpop.eup %3452  ;;  %v179_v35 = vadd.f32 %v2932_v60, %v156_v30  ;;  %v3894_v36 = vpop.f32.mrb[13].mxu0  ;;  %v4045_v30 = vadd.f32 %v3993_v31, %v3869_v16 }
  0xf2   :  { %3166 = vmatmul.mubr.msk.f32.gmra.mrb[18].mxu0 %vm201_vm2, %v3453_v34 }
  0xf3   :  { %3458 = vtanh.f32 %v179_v35  ;;  %1378 = vrot.lane.b32.xlu1 %v3822_v57, %s3641_s18  ;;  %1207 = vrot.lane.b32.xlu0 %v3826_v58, %s3640_s15 }
  0xf4   :  { %v162_v37 = vpop.f32.mrb[14].mxu0 }
  0xf5   :  { %v3455_v38 = vpop.eup %3454  ;;  %v180_v39 = vadd.f32 %v2932_v60, %v162_v37  ;;  %v3901_v40 = vpop.f32.mrb[15].mxu0  ;;  %v4055_v37 = vadd.f32 %v3957_v46, %v3876_v20 }
  0xf6   :  { %3168 = vmatprep.mubr.msk.f32.mxu0 %vm201_vm2, %v3455_v38  ;;  %v4059_v38 = vadd.f32 %v3993_v31, %v3876_v20 }
  0xf7   :  { %3460 = vtanh.f32 %v180_v39  ;;  %1539 = vrot.lane.b32.xlu1 %v3796_v33, %s3642_s19  ;;  %1380 = vrot.lane.b32.xlu0 %v3826_v58, %s3641_s18 }
  0xf8   :  { %3462 = vtanh.f32 %v3967_v48 }
  0xf9   :  { %v3457_v41 = vpop.eup %3456  ;;  %3464 = vtanh.f32 %v3999_v63 }
  0xfa   :  { %3169 = vmatmul.mubr.msk.f32.gmra.mrb[20].mxu0 %vm201_vm2, %v3457_v41  ;;  %3466 = vtanh.f32 %v4003_v0 }
  0xfb   :  { %1712 = vrot.lane.b32.xlu1 %v3796_v33, %s3643_s20  ;;  %1541 = vrot.lane.b32.xlu0 %v3794_v24, %s3642_s19 }
  0xfd   :  { %v3459_v42 = vpop.eup %3458 }
  0xfe   :  { %3171 = vmatprep.mubr.msk.f32.mxu1 %vm201_vm2, %v3459_v42  ;;  %v4069_v42 = vadd.f32 %v3957_v46, %v3885_v29 }
  0xff   :  { %1543 = vrot.lane.b32.xlu1 %v3805_v45, %s3642_s19  ;;  %1714 = vrot.lane.b32.xlu0 %v3794_v24, %s3643_s20 }
 0x101   :  { %v3461_v43 = vpop.eup %3460 }
 0x102   :  { %3172 = vmatmul.mubr.msk.f32.vlgmr.msra.gmra.mrb[0].mxu1 %vm201_vm2, %v3461_v43  ;;  %v4073_v43 = vadd.f32 %v3993_v31, %v3885_v29 }
 0x103   :  { %1716 = vrot.lane.b32.xlu1 %v3805_v45, %s3643_s20  ;;  %1545 = vrot.lane.b32.xlu0 %v3810_v52, %s3642_s19 }
 0x104   :  { %3176 = vmatprep.mubr.msk.f32.mxu1 %vm22_vm1, %v3796_v33  ;;  %3175 = vmatpush3.msk.msra.mxu1 %vm47_vm0, %v3776_v32  ;;  %v474_v33 = vsel %vm201_vm2, %v3805_v45, 0.0 }
 0x105   :  { %3202 = vmatprep.subr.msk.mxu1 %vm47_vm0, %v3776_v32 }
 0x106   :  { %3177 = vmatmul.mubr.msk.f32.vlgmr.msra.gmra.mrb[2].mxu1 %vm22_vm1, %v3794_v24 }
 0x107   :  { %1547 = vrot.lane.b32.xlu1 %v3814_v55, %s3642_s19  ;;  %1718 = vrot.lane.b32.xlu0 %v3810_v52, %s3643_s20 }
 0x108   :  { %3179 = vmatprep.mubr.msk.f32.mxu1 %vm22_vm1, %v3805_v45  ;;  %3203 = vmatpush3.msk.msra.mxu1 %vm47_vm0, %v3776_v32  ;;  %v480_v45 = vsel %vm201_vm2, %v3814_v55, 0.0 }
 0x109   :  { %3230 = vmatprep.subr.msk.mxu1 %vm47_vm0, %v3776_v32 }
 0x10a   :  { %3180 = vmatmul.mubr.msk.f32.gmra.mrb[4].mxu1 %vm22_vm1, %v3810_v52 }
 0x10b   :  { %1720 = vrot.lane.b32.xlu1 %v3814_v55, %s3643_s20  ;;  %1549 = vrot.lane.b32.xlu0 %v3818_v28, %s3642_s19 }
 0x10c   :  { %3182 = vmatprep.mubr.msk.f32.mxu1 %vm22_vm1, %v3814_v55  ;;  %v489_v55 = vsel %vm201_vm2, %v3826_v58, 0.0 }
 0x10e   :  { %3183 = vmatmul.mubr.msk.f32.gmra.mrb[6].mxu1 %vm22_vm1, %v3818_v28 }
 0x10f   :  { %1551 = vrot.lane.b32.xlu1 %v3822_v57, %s3642_s19  ;;  %1722 = vrot.lane.b32.xlu0 %v3818_v28, %s3643_s20  ;;  %v677_v47 = vpop.permute.xlu0 %676 }
 0x110   :  { %3185 = vmatprep.mubr.msk.f32.mxu1 %vm22_vm1, %v3822_v57  ;;  %v675_v49 = vpop.permute.xlu1 %674 }
 0x111   :  { %3190 = vmatprep.mubr.msk.f32.mxu0 %vm22_vm1, %v675_v49  ;;  %v4081_v49 = vadd.f32 %v3957_v46, %v3894_v36 }
 0x112   :  { %3186 = vmatmul.mubr.msk.f32.gmra.mrb[8].mxu1 %vm22_vm1, %v3826_v58  ;;  %3191 = vmatmul.mubr.msk.f32.vlgmr.msra.gmra.mrb[22].mxu0 %vm22_vm1, %v677_v47 }
 0x113   :  { %1724 = vrot.lane.b32.xlu1 %v3822_v57, %s3643_s20  ;;  %1553 = vrot.lane.b32.xlu0 %v3826_v58, %s3642_s19 }
 0x114   :  { %3217 = vmatpush3.msk.msra.mxu0 %vm47_vm0, %v3776_v32 }
 0x115   :  { %v679_v25 = vpop.permute.xlu1 %678  ;;  %3244 = vmatprep.subr.msk.mxu0 %vm47_vm0, %v3776_v32 }
 0x116   :  { %3193 = vmatprep.mubr.msk.f32.mxu0 %vm22_vm1, %v679_v25  ;;  %v4085_v25 = vadd.f32 %v3993_v31, %v3894_v36 }
 0x117   :  { %1726 = vrot.lane.b32.xlu0 %v3826_v58, %s3643_s20 }
 0x119   :  { %v681_v50 = vpop.permute.xlu0 %680 }
 0x11a   :  { %3194 = vmatmul.mubr.msk.f32.gmra.mrb[24].mxu0 %vm22_vm1, %v681_v50  ;;  %v471_v50 = vsel %vm201_vm2, %v3794_v24, 0.0  ;;  %v477_v24 = vsel %vm201_vm2, %v3810_v52, 0.0 }
 0x11d   :  { %v683_v51 = vpop.permute.xlu1 %682 }
 0x11e   :  { %3196 = vmatprep.mubr.msk.f32.mxu0 %vm22_vm1, %v683_v51 }
 0x121   :  { %v685_v53 = vpop.permute.xlu0 %684 }
 0x122   :  { %3197 = vmatmul.mubr.msk.f32.gmra.mrb[26].mxu0 %vm22_vm1, %v685_v53 }
 0x125   :  { %v687_v54 = vpop.permute.xlu1 %686 }
 0x126   :  { %3199 = vmatprep.mubr.msk.f32.mxu0 %vm22_vm1, %v687_v54  ;;  %v4095_v54 = vadd.f32 %v3957_v46, %v3901_v40  ;;  %v483_v46 = vsel %vm201_vm2, %v3818_v28, 0.0 }
 0x129   :  { %v848_v56 = vpop.permute.xlu1 %847  ;;  %v689_v59 = vpop.permute.xlu0 %688 }
 0x12a   :  { %3200 = vmatmul.mubr.msk.f32.gmra.mrb[28].mxu0 %vm22_vm1, %v689_v59  ;;  %3204 = vmatprep.mubr.msk.f32.mxu1 %vm22_vm1, %v848_v56  ;;  %v4099_v56 = vadd.f32 %v3993_v31, %v3901_v40 }
 0x12d   :  { %v1021_v60 = vpop.permute.xlu1 %1020  ;;  %v850_v61 = vpop.permute.xlu0 %849 }
 0x12e   :  { %3205 = vmatmul.mubr.msk.f32.vlgmr.msra.gmra.mrb[10].mxu1 %vm22_vm1, %v850_v61  ;;  %3218 = vmatprep.mubr.msk.f32.mxu0 %vm22_vm1, %v1021_v60  ;;  %v486_v61 = vsel %vm201_vm2, %v3822_v57, 0.0 }
 0x12f   :  { %3231 = vmatpush3.msk.msra.mxu1 %vm47_vm0, %v3776_v32 }
 0x130   :  { %3258 = vmatprep.subr.msk.mxu1 %vm47_vm0, %v3776_v32 }
 0x131   :  { %v852_v27 = vpop.permute.xlu1 %851  ;;  %v1023_v2 = vpop.permute.xlu0 %1022 }
 0x132   :  { %3207 = vmatprep.mubr.msk.f32.mxu1 %vm22_vm1, %v852_v27  ;;  %3219 = vmatmul.mubr.msk.f32.vlgmr.msra.gmra.mrb[30].mxu0 %vm22_vm1, %v1023_v2 }
 0x133   :  { %3245 = vmatpush3.msk.msra.mxu0 %vm47_vm0, %v3776_v32 }
 0x134   :  { %3272 = vmatprep.subr.msk.mxu0 %vm47_vm0, %v3776_v32 }
 0x135   :  { %v1025_v15 = vpop.permute.xlu1 %1024  ;;  %v854_v17 = vpop.permute.xlu0 %853 }
 0x136   :  { %2006 = vadd.xlane.f32.xlu0 %v2005_v13  ;;  %3208 = vmatmul.mubr.msk.f32.gmra.mrb[12].mxu1 %vm22_vm1, %v854_v17 }
 0x137   :  { %3221 = vmatprep.mubr.msk.f32.mxu0 %vm22_vm1, %v1025_v15  ;;  %2003 = vadd.xlane.f32.xlu1 %v2002_v14 }
 0x139   :  { %v856_v22 = vpop.permute.xlu1 %855  ;;  %v1027_v23 = vpop.permute.xlu0 %1026 }
 0x13a   :  { %2009 = vadd.xlane.f32.xlu0 %v2008_v3  ;;  %3210 = vmatprep.mubr.msk.f32.mxu1 %vm22_vm1, %v856_v22 }
 0x13b   :  { %3222 = vmatmul.mubr.msk.f32.gmra.mrb[32].mxu0 %vm22_vm1, %v1027_v23  ;;  %2012 = vadd.xlane.f32.xlu1 %v2011_v4 }
 0x13d   :  { %v1029_v34 = vpop.permute.xlu1 %1028  ;;  %v858_v35 = vpop.permute.xlu0 %857 }
 0x13e   :  { %2015 = vadd.xlane.f32.xlu0 %v2014_v7  ;;  %3211 = vmatmul.mubr.msk.f32.gmra.mrb[14].mxu1 %vm22_vm1, %v858_v35 }
 0x13f   :  { %3224 = vmatprep.mubr.msk.f32.mxu0 %vm22_vm1, %v1029_v34  ;;  %2018 = vadd.xlane.f32.xlu1 %v2017_v8 }
 0x141   :  { %v860_v39 = vpop.permute.xlu1 %859  ;;  %v1031_v41 = vpop.permute.xlu0 %1030 }
 0x142   :  { %2021 = vadd.xlane.f32.xlu0 %v2020_v9  ;;  %3213 = vmatprep.mubr.msk.f32.mxu1 %vm22_vm1, %v860_v39 }
 0x143   :  { %3225 = vmatmul.mubr.msk.f32.gmra.mrb[34].mxu0 %vm22_vm1, %v1031_v41  ;;  %2024 = vadd.xlane.f32.xlu1 %v2023_v10 }
 0x145   :  { %v1033_v11 = vpop.permute.xlu1 %1032  ;;  %v862_v47 = vpop.permute.xlu0 %861 }
 0x146   :  { %469 = vadd.xlane.f32.xlu0 %v468_v12  ;;  %3214 = vmatmul.mubr.msk.f32.gmra.mrb[16].mxu1 %vm22_vm1, %v862_v47 }
 0x147   :  { %3227 = vmatprep.mubr.msk.f32.mxu0 %vm22_vm1, %v1033_v11  ;;  %472 = vadd.xlane.f32.xlu1 %v471_v50 }
 0x149   :  { %v1194_v51 = vpop.permute.xlu1 %1193  ;;  %v1035_v53 = vpop.permute.xlu0 %1034 }
 0x14a   :  { %475 = vadd.xlane.f32.xlu0 %v474_v33  ;;  %3228 = vmatmul.mubr.msk.f32.gmra.mrb[36].mxu0 %vm22_vm1, %v1035_v53 }
 0x14b   :  { %3232 = vmatprep.mubr.msk.f32.mxu1 %vm22_vm1, %v1194_v51  ;;  %478 = vadd.xlane.f32.xlu1 %v477_v24 }
 0x14d   :  { %v1367_v59 = vpop.permute.xlu1 %1366  ;;  %v1196_v60 = vpop.permute.xlu0 %1195 }
 0x14e   :  { %481 = vadd.xlane.f32.xlu0 %v480_v45  ;;  %3233 = vmatmul.mubr.msk.f32.vlgmr.msra.gmra.mrb[18].mxu1 %vm22_vm1, %v1196_v60 }
 0x14f   :  { %3246 = vmatprep.mubr.msk.f32.mxu0 %vm22_vm1, %v1367_v59  ;;  %484 = vadd.xlane.f32.xlu1 %v483_v46 }
 0x150   :  { %3259 = vmatpush3.msk.msra.mxu1 %vm47_vm0, %v3776_v32 }
 0x151   :  { %v1198_v52 = vpop.permute.xlu1 %1197  ;;  %v1369_v31 = vpop.permute.xlu0 %1368 }
 0x152   :  { %487 = vadd.xlane.f32.xlu0 %v486_v61  ;;  %3235 = vmatprep.mubr.msk.f32.mxu1 %vm22_vm1, %v1198_v52 }
 0x153   :  { %3247 = vmatmul.mubr.msk.f32.vlgmr.msra.gmra.mrb[38].mxu0 %vm22_vm1, %v1369_v31  ;;  %490 = vadd.xlane.f32.xlu1 %v489_v55 }
 0x154   :  { %3273 = vmatpush3.msk.msra.mxu0 %vm47_vm0, %v3776_v32 }
 0x155   :  { %v1371_v28 = vpop.permute.xlu1 %1370  ;;  %v1200_v27 = vpop.permute.xlu0 %1199 }
 0x156   :  { %3236 = vmatmul.mubr.msk.f32.gmra.mrb[20].mxu1 %vm22_vm1, %v1200_v27  ;;  %3249 = vmatprep.mubr.msk.f32.mxu0 %vm22_vm1, %v1371_v28 }
 0x159   :  { %v1202_v2 = vpop.permute.xlu1 %1201  ;;  %v1373_v57 = vpop.permute.xlu0 %1372 }
 0x15a   :  { %3238 = vmatprep.mubr.msk.f32.mxu1 %vm22_vm1, %v1202_v2  ;;  %3250 = vmatmul.mubr.msk.f32.gmra.mrb[40].mxu0 %vm22_vm1, %v1373_v57 }
 0x15d   :  { %v1375_v13 = vpop.permute.xlu1 %1374  ;;  %v1204_v58 = vpop.permute.xlu0 %1203 }
 0x15e   :  { %3239 = vmatmul.mubr.msk.f32.gmra.mrb[22].mxu1 %vm22_vm1, %v1204_v58  ;;  %3252 = vmatprep.mubr.msk.f32.mxu0 %vm22_vm1, %v1375_v13 }
 0x161   :  { %v1206_v14 = vpop.permute.xlu1 %1205  ;;  %v1377_v32 = vpop.permute.xlu0 %1376 }
 0x162   :  { %3241 = vmatprep.mubr.msk.f32.mxu1 %vm22_vm1, %v1206_v14  ;;  %3253 = vmatmul.mubr.msk.f32.gmra.mrb[42].mxu0 %vm22_vm1, %v1377_v32 }
 0x165   :  { %v1379_v15 = vpop.permute.xlu1 %1378  ;;  %v1208_v17 = vpop.permute.xlu0 %1207 }
 0x166   :  { %3242 = vmatmul.mubr.msk.f32.gmra.mrb[24].mxu1 %vm22_vm1, %v1208_v17  ;;  %3255 = vmatprep.mubr.msk.f32.mxu0 %vm22_vm1, %v1379_v15 }
 0x169   :  { %v1540_v3 = vpop.permute.xlu1 %1539  ;;  %v1381_v4 = vpop.permute.xlu0 %1380 }
 0x16a   :  { %3256 = vmatmul.mubr.msk.f32.gmra.mrb[44].mxu0 %vm22_vm1, %v1381_v4  ;;  %3260 = vmatprep.mubr.msk.f32.mxu1 %vm22_vm1, %v1540_v3 }
 0x16d   :  { %v1713_v22 = vpop.permute.xlu1 %1712  ;;  %v1542_v23 = vpop.permute.xlu0 %1541 }
 0x16e   :  { %3261 = vmatmul.mubr.msk.f32.vlgmr.msra.gmra.mrb[26].mxu1 %vm22_vm1, %v1542_v23  ;;  %3274 = vmatprep.mubr.msk.f32.mxu0 %vm22_vm1, %v1713_v22 }
 0x171   :  { %v1544_v7 = vpop.permute.xlu1 %1543  ;;  %v1715_v8 = vpop.permute.xlu0 %1714 }
 0x172   :  { %3263 = vmatprep.mubr.msk.f32.mxu1 %vm22_vm1, %v1544_v7  ;;  %3275 = vmatmul.mubr.msk.f32.vlgmr.msra.gmra.mrb[46].mxu0 %vm22_vm1, %v1715_v8 }
 0x175   :  { %v1717_v34 = vpop.permute.xlu1 %1716  ;;  %v1546_v35 = vpop.permute.xlu0 %1545 }
 0x176   :  { %3264 = vmatmul.mubr.msk.f32.gmra.mrb[28].mxu1 %vm22_vm1, %v1546_v35  ;;  %3277 = vmatprep.mubr.msk.f32.mxu0 %vm22_vm1, %v1717_v34 }
 0x179   :  { %v1548_v9 = vpop.permute.xlu1 %1547  ;;  %v1719_v10 = vpop.permute.xlu0 %1718 }
 0x17a   :  { %3266 = vmatprep.mubr.msk.f32.mxu1 %vm22_vm1, %v1548_v9  ;;  %3278 = vmatmul.mubr.msk.f32.gmra.mrb[48].mxu0 %vm22_vm1, %v1719_v10 }
 0x17d   :  { %v1721_v39 = vpop.permute.xlu1 %1720  ;;  %v1550_v41 = vpop.permute.xlu0 %1549 }
 0x17e   :  { %3267 = vmatmul.mubr.msk.f32.gmra.mrb[30].mxu1 %vm22_vm1, %v1550_v41  ;;  %3280 = vmatprep.mubr.msk.f32.mxu0 %vm22_vm1, %v1721_v39 }
 0x181   :  { %v1552_v11 = vpop.permute.xlu1 %1551  ;;  %v1723_v47 = vpop.permute.xlu0 %1722 }
 0x182   :  { %3269 = vmatprep.mubr.msk.f32.mxu1 %vm22_vm1, %v1552_v11  ;;  %3281 = vmatmul.mubr.msk.f32.gmra.mrb[50].mxu0 %vm22_vm1, %v1723_v47 }
 0x185   :  { %v1725_v12 = vpop.permute.xlu1 %1724  ;;  %v1554_v50 = vpop.permute.xlu0 %1553 }
 0x186   :  { %3270 = vmatmul.mubr.msk.f32.gmra.mrb[32].mxu1 %vm22_vm1, %v1554_v50  ;;  %3283 = vmatprep.mubr.msk.f32.mxu0 %vm22_vm1, %v1725_v12 }
 0x189   :  { %v1727_v51 = vpop.permute.xlu0 %1726 }
 0x18a   :  { %3284 = vmatmul.mubr.msk.f32.gmra.mrb[52].mxu0 %vm22_vm1, %v1727_v51 }
 0x1bd   :  { %v4160_v46 = vpop.f32.mrb[16].mxu0 }
 0x1be   :  { %5886 = vst [vmem:[#allocation7_spill] sm:$0xff] %v4160_v46  ;;  %v4162_v52 = vpop.f32.mrb[17].mxu0 }
 0x1bf   :  { %5887 = vst [vmem:[#allocation8_spill] sm:$0xff] %v4162_v52 }
 0x1c5   :  { %v4164_v31 = vpop.f32.mrb[18].mxu0 }
 0x1c6   :  { %5888 = vst [vmem:[#allocation9_spill] sm:$0xff] %v4164_v31  ;;  %v4168_v55 = vpop.f32.mrb[19].mxu0 }
 0x1c7   :  { %5889 = vst [vmem:[#allocation10_spill] sm:$0xff] %v4168_v55 }
 0x1cd   :  { %v4172_v27 = vpop.f32.mrb[20].mxu0 }
 0x1ce   :  { %5890 = vst [vmem:[#allocation11_spill] sm:$0xff] %v4172_v27  ;;  %v4174_v2 = vpop.f32.mrb[21].mxu0 }
 0x1cf   :  { %5891 = vst [vmem:[#allocation12_spill] sm:$0xff] %v4174_v2 }
 0x1d5   :  { %v4148_v53 = vpop.f32.mrb[0].mxu1 }
 0x1d6   :  { %5884 = vst [vmem:[#allocation5_spill] sm:$0xff] %v4148_v53  ;;  %v4150_v33 = vpop.f32.mrb[1].mxu1 }
 0x1d7   :  { %5885 = vst [vmem:[#allocation6_spill] sm:$0xff] %v4150_v33 }
 0x1d9   :  { %v4152_v24 = vpop.f32.mrb[2].mxu1 }
 0x1da   :  { %v4154_v59 = vpop.f32.mrb[3].mxu1 }
 0x1dd   :  { %v4156_v60 = vpop.f32.mrb[4].mxu1 }
 0x1de   :  { %v4158_v45 = vpop.f32.mrb[5].mxu1 }
 0x1e1   :  { %v4166_v61 = vpop.f32.mrb[6].mxu1 }
 0x1e2   :  { %v4170_v28 = vpop.f32.mrb[7].mxu1 }
 0x1e5   :  { %v4176_v57 = vpop.f32.mrb[8].mxu1  ;;  %v4178_v13 = vpop.f32.mrb[22].mxu0 }
 0x1e6   :  { %v4180_v58 = vpop.f32.mrb[9].mxu1  ;;  %v4182_v14 = vpop.f32.mrb[23].mxu0 }
 0x1ed   :  { %v4184_v32 = vpop.f32.mrb[24].mxu0 }
 0x1ee   :  { %v4186_v15 = vpop.f32.mrb[25].mxu0 }
 0x1f5   :  { %v4188_v17 = vpop.f32.mrb[26].mxu0 }
 0x1f6   :  { %v4190_v3 = vpop.f32.mrb[27].mxu0 }
 0x1fd   :  { %v4192_v4 = vpop.f32.mrb[28].mxu0 }
 0x1fe   :  { %v4194_v22 = vpop.f32.mrb[29].mxu0 }
 0x201   :  { %v4196_v23 = vpop.f32.mrb[10].mxu1 }
 0x202   :  { %v4198_v7 = vpop.f32.mrb[11].mxu1 }
 0x205   :  { %v4200_v8 = vpop.f32.mrb[30].mxu0 }
 0x206   :  { %v4204_v35 = vpop.f32.mrb[31].mxu0 }
 0x209   :  { %v4202_v34 = vpop.f32.mrb[12].mxu1 }
 0x20a   :  { %v4206_v9 = vpop.f32.mrb[13].mxu1 }
 0x20e   :  { %v4208_v10 = vpop.f32.mrb[32].mxu0 }
 0x20f   :  { %v4212_v41 = vpop.f32.mrb[33].mxu0 }
 0x210   :  { %5893 = vst [vmem:[#allocation14_spill] sm:$0xff] %v4212_v41 }
 0x211   :  { %v4210_v39 = vpop.f32.mrb[14].mxu1 }
 0x212   :  { %5892 = vst [vmem:[#allocation13_spill] sm:$0xff] %v4210_v39  ;;  %v4214_v11 = vpop.f32.mrb[15].mxu1 }
 0x213   :  { %5894 = vst [vmem:[#allocation15_spill] sm:$0xff] %v4214_v11 }
 0x216   :  { %v4216_v47 = vpop.f32.mrb[34].mxu0 }
 0x217   :  { %5895 = vst [vmem:[#allocation16_spill] sm:$0xff] %v4216_v47  ;;  %v4218_v12 = vpop.f32.mrb[35].mxu0 }
 0x218   :  { %5896 = vst [vmem:[#allocation17_spill] sm:$0xff] %v4218_v12 }
 0x219   :  { %v4220_v50 = vpop.f32.mrb[16].mxu1 }
 0x21a   :  { %5897 = vst [vmem:[#allocation18_spill] sm:$0xff] %v4220_v50  ;;  %v4222_v51 = vpop.f32.mrb[17].mxu1 }
 0x21b   :  { %5898 = vst [vmem:[#allocation19_spill] sm:$0xff] %v4222_v51 }
 0x21d   :  { %v4224_v2 = vpop.f32.mrb[36].mxu0 }
 0x21e   :  { %5899 = vst [vmem:[#allocation20_spill] sm:$0xff] %v4224_v2  ;;  %v4226_v27 = vpop.f32.mrb[37].mxu0 }
 0x21f   :  { %5900 = vst [vmem:[#allocation21_spill] sm:$0xff] %v4226_v27 }
 0x221   :  { %v4228_v55 = vpop.f32.mrb[18].mxu1 }
 0x222   :  { %5901 = vst [vmem:[#allocation22_spill] sm:$0xff] %v4228_v55  ;;  %v4230_v31 = vpop.f32.mrb[19].mxu1 }
 0x223   :  { %5902 = vst [vmem:[#allocation23_spill] sm:$0xff] %v4230_v31 }
 0x226   :  { %v4232_v52 = vpop.f32.mrb[38].mxu0 }
 0x227   :  { %5903 = vst [vmem:[#allocation24_spill] sm:$0xff] %v4232_v52  ;;  %v4234_v46 = vpop.f32.mrb[39].mxu0 }
 0x228   :  { %5904 = vst [vmem:[#allocation25_spill] sm:$0xff] %v4234_v46 }
 0x229   :  { %v4236_v33 = vpop.f32.mrb[20].mxu1 }
 0x22a   :  { %5905 = vst [vmem:[#allocation26_spill] sm:$0xff] %v4236_v33  ;;  %v4238_v53 = vpop.f32.mrb[21].mxu1 }
 0x22b   :  { %5906 = vst [vmem:[#allocation27_spill] sm:$0xff] %v4238_v53 }
 0x22d   :  { %v4240_v12 = vpop.f32.mrb[40].mxu0 }
 0x22e   :  { %5907 = vst [vmem:[#allocation28_spill] sm:$0xff] %v4240_v12  ;;  %v4242_v50 = vpop.f32.mrb[41].mxu0  ;;  %v829_v12 = vsub.s32 2, %v3758_v21 }
 0x22f   :  { %5908 = vst [vmem:[#allocation29_spill] sm:$0xff] %v4242_v50  ;;  %v1002_v50 = vsub.s32 3, %v3758_v21 }
 0x231   :  { %v4244_v51 = vpop.f32.mrb[22].mxu1 }
 0x232   :  { %5909 = vst [vmem:[#allocation30_spill] sm:$0xff] %v4244_v51  ;;  %v4246_v2 = vpop.f32.mrb[23].mxu1 }
 0x233   :  { %5910 = vst [vmem:[#allocation31_spill] sm:$0xff] %v4246_v2 }
 0x235   :  { %v4248_v27 = vpop.f32.mrb[42].mxu0 }
 0x236   :  { %5911 = vst [vmem:[#allocation32_spill] sm:$0xff] %v4248_v27  ;;  %v4250_v55 = vpop.f32.mrb[43].mxu0  ;;  %v4267_v27 = vrot.slane %v3944_v44, %v829_v12 }
 0x237   :  { %5912 = vst [vmem:[#allocation33_spill] sm:$0xff] %v4250_v55  ;;  %v4270_v55 = vrot.slane %v3944_v44, %v1002_v50 }
 0x238   :  { %v832_v50 = vadd.f32 %v4267_v27, %v3857_v1  ;;  %v833_v0 = vadd.f32 %v4267_v27, %v3863_v6  ;;  %v836_v2 = vadd.f32 %v4267_v27, %v3885_v29 }
 0x239   :  { %v4252_v31 = vpop.f32.mrb[24].mxu1  ;;  %v1005_v48 = vadd.f32 %v4270_v55, %v3857_v1  ;;  %v1011_v41 = vadd.f32 %v4270_v55, %v3901_v40 }
 0x23a   :  { %5913 = vst [vmem:[#allocation34_spill] sm:$0xff] %v4252_v31  ;;  %v4254_v52 = vpop.f32.mrb[25].mxu1 }
 0x23b   :  { %5914 = vst [vmem:[#allocation35_spill] sm:$0xff] %v4254_v52 }
 0x23d   :  { %v4256_v46 = vpop.f32.mrb[44].mxu0 }
 0x23e   :  { %5915 = vst [vmem:[#allocation36_spill] sm:$0xff] %v4256_v46  ;;  %v4258_v33 = vpop.f32.mrb[45].mxu0  ;;  %v831_v46 = vadd.f32 %v4267_v27, %v3851_v62 }
 0x23f   :  { %5916 = vst [vmem:[#allocation37_spill] sm:$0xff] %v4258_v33  ;;  %v1175_v33 = vsub.s32 4, %v3758_v21 }
 0x240   :  { %3468 = vtanh.f32 %v831_v46 }
 0x241   :  { %v4262_v53 = vpop.f32.mrb[26].mxu1 }
 0x242   :  { %5917 = vst [vmem:[#allocation38_spill] sm:$0xff] %v4262_v53  ;;  %v4264_v51 = vpop.f32.mrb[27].mxu1 }
 0x243   :  { %5918 = vst [vmem:[#allocation39_spill] sm:$0xff] %v4264_v51  ;;  %v1004_v51 = vadd.f32 %v4270_v55, %v3851_v62 }
 0x245   :  { %v4272_v31 = vpop.f32.mrb[46].mxu0  ;;  %3470 = vtanh.f32 %v1004_v51 }
 0x246   :  { %5919 = vst [vmem:[#allocation40_spill] sm:$0xff] %v4272_v31  ;;  %v4274_v52 = vpop.f32.mrb[47].mxu0  ;;  %3472 = vtanh.f32 %v4013_v5 }
 0x247   :  { %5920 = vst [vmem:[#allocation41_spill] sm:$0xff] %v4274_v52  ;;  %v4291_v52 = vrot.slane %v3944_v44, %v1175_v33  ;;  %3474 = vtanh.f32 %v832_v50  ;;  %v1006_v33 = vadd.f32 %v4270_v55, %v3863_v6  ;;  %v834_v50 = vadd.f32 %v4267_v27, %v3869_v16 }
 0x248   :  { %3476 = vtanh.f32 %v1005_v48 }
 0x249   :  { %v4282_v53 = vpop.f32.mrb[28].mxu1 }
 0x24a   :  { %5921 = vst [vmem:[#allocation42_spill] sm:$0xff] %v4282_v53  ;;  %v4285_v12 = vpop.f32.mrb[29].mxu1  ;;  %v1178_v53 = vadd.f32 %v4291_v52, %v3857_v1 }
 0x24b   :  { %5922 = vst [vmem:[#allocation43_spill] sm:$0xff] %v4285_v12 }
 0x24c   :  { %3478 = vtanh.f32 %v1178_v53  ;;  %v1007_v53 = vadd.f32 %v4270_v55, %v3869_v16 }
 0x24d   :  { %v4297_v31 = vpop.f32.mrb[48].mxu0  ;;  %3480 = vtanh.f32 %v4027_v18 }
 0x24e   :  { %5923 = vst [vmem:[#allocation44_spill] sm:$0xff] %v4297_v31  ;;  %v4300_v63 = vpop.f32.mrb[49].mxu0  ;;  %v4311_v31 = vpop.eup %3462  ;;  %3482 = vtanh.f32 %v4031_v19 }
 0x24f   :  { %5924 = vst [vmem:[#allocation45_spill] sm:$0xff] %v4300_v63  ;;  %v4314_v5 = vpop.eup %3464  ;;  %3484 = vtanh.f32 %v833_v0  ;;  %v835_v0 = vadd.f32 %v4267_v27, %v3876_v20 }
 0x250   :  { %v4318_v48 = vpop.eup %3466  ;;  %3486 = vtanh.f32 %v1006_v33  ;;  %v1008_v33 = vadd.f32 %v4270_v55, %v3876_v20 }
 0x251   :  { %v4306_v46 = vpop.f32.mrb[30].mxu1  ;;  %v4324_v18 = vpop.eup %3468  ;;  %3488 = vtanh.f32 %v4041_v26 }
 0x252   :  { %5925 = vst [vmem:[#allocation46_spill] sm:$0xff] %v4306_v46  ;;  %v4309_v51 = vpop.f32.mrb[31].mxu1  ;;  %v4329_v19 = vpop.eup %3470  ;;  %3490 = vtanh.f32 %v4045_v30 }
 0x253   :  { %5926 = vst [vmem:[#allocation47_spill] sm:$0xff] %v4309_v51  ;;  %v4332_v63 = vpop.eup %3472  ;;  %3492 = vtanh.f32 %v834_v50 }
 0x254   :  { %v4336_v12 = vpop.eup %3474  ;;  %3494 = vtanh.f32 %v1007_v53 }
 0x255   :  { %v4322_v46 = vpop.f32.mrb[50].mxu0  ;;  %v4342_v26 = vpop.eup %3476  ;;  %3496 = vtanh.f32 %v4055_v37 }
 0x256   :  { %5927 = vst [vmem:[#allocation48_spill] sm:$0xff] %v4322_v46  ;;  %v4327_v51 = vpop.f32.mrb[51].mxu0  ;;  %v4347_v30 = vpop.eup %3478  ;;  %3498 = vtanh.f32 %v4059_v38 }
 0x257   :  { %5928 = vst [vmem:[#allocation49_spill] sm:$0xff] %v4327_v51  ;;  %5931 = vst [vmem:[#allocation52_spill] sm:$0xff] %v4347_v30  ;;  %v3481_v50 = vpop.eup %3480  ;;  %3500 = vtanh.f32 %v835_v0  ;;  %v1348_v0 = vsub.s32 5, %v3758_v21 }
 0x258   :  { %v4352_v53 = vpop.eup %3482  ;;  %3502 = vtanh.f32 %v1008_v33  ;;  %v837_v33 = vadd.f32 %v4267_v27, %v3894_v36 }
 0x259   :  { %v4340_v46 = vpop.f32.mrb[32].mxu1  ;;  %v4358_v37 = vpop.eup %3484  ;;  %3504 = vtanh.f32 %v4069_v42  ;;  %v1010_v42 = vadd.f32 %v4270_v55, %v3894_v36 }
 0x25a   :  { %5929 = vst [vmem:[#allocation50_spill] sm:$0xff] %v4340_v46  ;;  %v4345_v51 = vpop.f32.mrb[33].mxu1  ;;  %v1009_v46 = vadd.f32 %v4270_v55, %v3885_v29  ;;  %v4363_v38 = vpop.eup %3486  ;;  %3506 = vtanh.f32 %v4073_v43  ;;  %v1521_v43 = vsub.s32 6, %v3758_v21 }
 0x25b   :  { %5930 = vst [vmem:[#allocation51_spill] sm:$0xff] %v4345_v51  ;;  %5934 = vst [vmem:[#allocation55_spill] sm:$0xff] %v4363_v38  ;;  %v3489_v30 = vpop.eup %3488  ;;  %3508 = vtanh.f32 %v836_v2  ;;  %v1694_v2 = vsub.s32 7, %v3758_v21  ;;  %v4385_v38 = vrot.slane %v3944_v44, %v1348_v0  ;;  %v1177_v21 = vadd.f32 %v4291_v52, %v3851_v62 }
 0x25c   :  { %v4367_v11 = vpop.eup %3490  ;;  %3510 = vtanh.f32 %v1009_v46  ;;  %v838_v46 = vadd.f32 %v4267_v27, %v3901_v40  ;;  %v4401_v27 = vrot.slane %v3944_v44, %v1521_v43  ;;  %v1180_v43 = vadd.f32 %v4291_v52, %v3869_v16 }
 0x25d   :  { %v4356_v47 = vpop.f32.mrb[52].mxu0  ;;  %3512 = vtanh.f32 %v4081_v49  ;;  %v4404_v0 = vrot.slane %v3944_v44, %v1694_v2  ;;  %v648_v2 = vmul.f32 %v3481_v50, %v4158_v45 }
 0x25e   :  { %5932 = vst [vmem:[#allocation53_spill] sm:$0xff] %v4356_v47  ;;  %v4361_v51 = vpop.f32.mrb[53].mxu0  ;;  %v4371_v47 = vpop.eup %3492  ;;  %3514 = vtanh.f32 %v4095_v54  ;;  %v4437_v50 = vadd.f32 %v4401_v27, %v3857_v1 }
 0x25f   :  { %5933 = vst [vmem:[#allocation54_spill] sm:$0xff] %v4361_v51  ;;  %v4376_v51 = vpop.eup %3494  ;;  %3516 = vtanh.f32 %v4085_v25  ;;  %v1351_v25 = vadd.f32 %v4385_v38, %v3857_v1 }
 0x260   :  { %5935 = vst [vmem:[#allocation56_spill] sm:$0xff] %v4376_v51  ;;  %v3497_v39 = vpop.eup %3496  ;;  %3518 = vtanh.f32 %v837_v33  ;;  %v647_v33 = vmul.f32 %v4311_v31, %v4152_v24  ;;  %v1179_v24 = vadd.f32 %v4291_v52, %v3863_v6  ;;  %v1353_v31 = vadd.f32 %v4385_v38, %v3869_v16 }
 0x261   :  { %v4387_v49 = vpop.eup %3498  ;;  %3520 = vtanh.f32 %v1010_v42  ;;  %v646_v42 = vmul.f32 %v4314_v5, %v4154_v59 }
 0x262   :  { %v4391_v54 = vpop.eup %3500  ;;  %3522 = vtanh.f32 %v4099_v56  ;;  %v1350_v56 = vadd.f32 %v4385_v38, %v3851_v62 }
 0x263   :  { %5936 = vst [vmem:[#allocation57_spill] sm:$0xff] %v4391_v54  ;;  %v4395_v51 = vpop.eup %3502  ;;  %3524 = vtanh.f32 %v838_v46  ;;  %v649_v54 = vmul.f32 %v3489_v30, %v4156_v60  ;;  %v4426_v60 = vadd.f32 %v4401_v27, %v3851_v62  ;;  %v1352_v30 = vadd.f32 %v4385_v38, %v3863_v6 }
 0x264   :  { %5937 = vst [vmem:[#allocation58_spill] sm:$0xff] %v4395_v51  ;;  %v3505_v55 = vpop.eup %3504  ;;  %3526 = vtanh.f32 %v1011_v41  ;;  %v4430_v41 = vadd.f32 %v4404_v0, %v3851_v62  ;;  %v4444_v62 = vadd.f32 %v4404_v0, %v3857_v1  ;;  %v811_v1 = vmul.f32 %v4318_v48, %v4182_v14 }
 0x265   :  { %v3507_v51 = vpop.eup %3506  ;;  %3528 = vtanh.f32 %v1177_v21  ;;  %v651_v45 = vmul.f32 %v3505_v55, %v4166_v61  ;;  %v650_v21 = vmul.f32 %v3497_v39, %v4170_v28  ;;  %v812_v28 = vmul.f32 %v4332_v63, %v4178_v13 }
 0x266   :  { %v4415_v44 = vpop.eup %3508  ;;  %3530 = vtanh.f32 %v1351_v25  ;;  %v1182_v25 = vadd.f32 %v4291_v52, %v3885_v29  ;;  %v4470_v14 = vadd.f32 %v4401_v27, %v3863_v6 }
 0x267   :  { %5938 = vst [vmem:[#allocation59_spill] sm:$0xff] %v4415_v44  ;;  %v4420_v59 = vpop.eup %3510  ;;  %3532 = vtanh.f32 %v1350_v56  ;;  %v1181_v56 = vadd.f32 %v4291_v52, %v3876_v20  ;;  %v820_v13 = vadd.f32 %v812_v28, %v647_v33  ;;  %v816_v33 = vmul.f32 %v3507_v51, %v4188_v17 }
 0x268   :  { %5939 = vst [vmem:[#allocation60_spill] sm:$0xff] %v4420_v59  ;;  %v3513_v5 = vpop.eup %3512  ;;  %3534 = vtanh.f32 %v1180_v43  ;;  %v1355_v59 = vadd.f32 %v4385_v38, %v3885_v29  ;;  %v1526_v17 = vadd.f32 %v4401_v27, %v3869_v16  ;;  %v1698_v51 = vadd.f32 %v4404_v0, %v3863_v6 }
 0x269   :  { %v3515_v46 = vpop.eup %3514  ;;  %3536 = vtanh.f32 %v1179_v24  ;;  %v652_v39 = vmul.f32 %v3513_v5, %v4180_v58  ;;  %v813_v24 = vmul.f32 %v4352_v53, %v4186_v15  ;;  %v1184_v58 = vadd.f32 %v4291_v52, %v3901_v40 }
 0x26a   :  { %v3517_v61 = vpop.eup %3516  ;;  %v653_v55 = vmul.f32 %v3515_v46, %v4176_v57  ;;  %3538 = vtanh.f32 %v1353_v31  ;;  %v814_v57 = vmul.f32 %v4367_v11, %v4184_v32  ;;  %v1354_v46 = vadd.f32 %v4385_v38, %v3876_v20 }
 0x26b   :  { %v4451_v44 = vpop.eup %3518  ;;  %3540 = vtanh.f32 %v1352_v30  ;;  %v819_v32 = vadd.f32 %v811_v1, %v646_v42  ;;  %v1183_v15 = vadd.f32 %v4291_v52, %v3894_v36  ;;  %v821_v53 = vadd.f32 %v813_v24, %v648_v2 }
 0x26c   :  { %5940 = vst [vmem:[#allocation61_spill] sm:$0xff] %v4451_v44  ;;  %v4458_v43 = vpop.eup %3520  ;;  %3542 = vtanh.f32 %v1182_v25  ;;  %v822_v11 = vadd.f32 %v814_v57, %v649_v54  ;;  %v1357_v31 = vadd.f32 %v4385_v38, %v3901_v40  ;;  %v815_v30 = vmul.f32 %v4387_v49, %v4190_v3 }
 0x26d   :  { %v3523_v44 = vpop.eup %3522  ;;  %3544 = vtanh.f32 %v1181_v56  ;;  %v1356_v52 = vadd.f32 %v4385_v38, %v3894_v36  ;;  %v824_v2 = vadd.f32 %v816_v33, %v651_v45  ;;  %v817_v38 = vmul.f32 %v3517_v61, %v4194_v22 }
 0x26e   :  { %v4472_v63 = vpop.eup %3524  ;;  %3546 = vtanh.f32 %v1355_v59  ;;  %v818_v54 = vmul.f32 %v3523_v44, %v4192_v4  ;;  %v823_v25 = vadd.f32 %v815_v30, %v650_v21  ;;  %v1699_v4 = vadd.f32 %v4404_v0, %v3869_v16 }
 0x26f   :  { %v4476_v48 = vpop.eup %3526  ;;  %3548 = vtanh.f32 %v1354_v46  ;;  %v985_v44 = vmul.f32 %v4336_v12, %v4196_v23  ;;  %v1527_v45 = vadd.f32 %v4401_v27, %v3876_v20  ;;  %v984_v21 = vmul.f32 %v4324_v18, %v4198_v7 }
 0x270   :  { %v4481_v5 = vpop.eup %3528  ;;  %3550 = vtanh.f32 %v1184_v58  ;;  %v826_v3 = vadd.f32 %v818_v54, %v653_v55  ;;  %v1158_v55 = vmul.f32 %v4342_v26, %v4200_v8  ;;  %v1528_v16 = vadd.f32 %v4401_v27, %v3885_v29  ;;  %v5947_v58 = vld [vmem:[#allocation57_spill] sm:$0xff] }
 0x271   :  { %v4488_v42 = vpop.eup %3530  ;;  %3552 = vtanh.f32 %v1183_v15  ;;  %v825_v61 = vadd.f32 %v817_v38, %v652_v39  ;;  %v993_v23 = vadd.f32 %v985_v44, %v820_v13  ;;  %v1157_v12 = vmul.f32 %v4329_v19, %v4204_v35  ;;  %v5941_v39 = vld [vmem:[#allocation56_spill] sm:$0xff]  ;;  %v5942_v35 = vld [vmem:[#allocation14_spill] sm:$0xff]  ;;  %v5943_v19 = vld [vmem:[#allocation55_spill] sm:$0xff] }
 0x272   :  { %v4494_v59 = vpop.eup %3532  ;;  %3554 = vtanh.f32 %v1357_v31  ;;  %v992_v28 = vadd.f32 %v984_v21, %v819_v32  ;;  %v987_v7 = vmul.f32 %v4371_v47, %v4202_v34  ;;  %v986_v8 = vmul.f32 %v4358_v37, %v4206_v9  ;;  %v5944_v37 = vld [vmem:[#allocation13_spill] sm:$0xff]  ;;  %v5946_v13 = vld [vmem:[#allocation15_spill] sm:$0xff]  ;;  %v5948_v32 = vld [vmem:[#allocation16_spill] sm:$0xff] }
 0x273   :  { %v4498_v49 = vpop.eup %3534  ;;  %3556 = vtanh.f32 %v1356_v52  ;;  %v1166_v26 = vadd.f32 %v1158_v55, %v993_v23  ;;  %v1160_v1 = vmul.f32 %v5941_v39, %v4208_v10  ;;  %v988_v10 = vmul.f32 %v5947_v58, %v5946_v13  ;;  %v5949_v15 = vld [vmem:[#allocation60_spill] sm:$0xff] }
 0x274   :  { %v4505_v6 = vpop.eup %3536  ;;  %3558 = vtanh.f32 %v4437_v50  ;;  %v1159_v50 = vmul.f32 %v5943_v19, %v5942_v35  ;;  %v1165_v24 = vadd.f32 %v1157_v12, %v992_v28  ;;  %v995_v34 = vadd.f32 %v987_v7, %v822_v11  ;;  %v5950_v11 = vld [vmem:[#allocation17_spill] sm:$0xff]  ;;  %v5955_v39 = vld [vmem:[#allocation20_spill] sm:$0xff]  ;;  %v5957_v35 = vld [vmem:[#allocation22_spill] sm:$0xff] }
 0x275   :  { %v4513_v22 = vpop.eup %3538  ;;  %3560 = vtanh.f32 %v4426_v60  ;;  %v994_v47 = vadd.f32 %v986_v8, %v821_v53  ;;  %v5945_v60 = vld [vmem:[#allocation59_spill] sm:$0xff]  ;;  %v1162_v33 = vmul.f32 %v5949_v15, %v5948_v32  ;;  %v5951_v53 = vld [vmem:[#allocation58_spill] sm:$0xff]  ;;  %v996_v38 = vadd.f32 %v988_v10, %v823_v25  ;;  %v5958_v19 = vld [vmem:[#allocation52_spill] sm:$0xff] }
 0x276   :  { %v4518_v56 = vpop.eup %3540  ;;  %3562 = vtanh.f32 %v4444_v62  ;;  %v989_v46 = vmul.f32 %v5945_v60, %v5944_v37  ;;  %v1168_v31 = vadd.f32 %v1160_v1, %v995_v34  ;;  %v1161_v54 = vmul.f32 %v5951_v53, %v5950_v11  ;;  %v5953_v25 = vld [vmem:[#allocation19_spill] sm:$0xff] }
 0x277   :  { %v4525_v18 = vpop.eup %3542  ;;  %3564 = vtanh.f32 %v4430_v41  ;;  %v1167_v30 = vadd.f32 %v1159_v50, %v994_v47  ;;  %v1700_v21 = vadd.f32 %v4404_v0, %v3876_v20  ;;  %v4570_v20 = vadd.f32 %v4404_v0, %v3894_v36  ;;  %v5959_v47 = vld [vmem:[#allocation23_spill] sm:$0xff] }
 0x278   :  { %v4532_v57 = vpop.eup %3544  ;;  %3566 = vtanh.f32 %v1526_v17  ;;  %v997_v52 = vadd.f32 %v989_v46, %v824_v2  ;;  %v1701_v17 = vadd.f32 %v4404_v0, %v3885_v29  ;;  %v4558_v12 = vadd.f32 %v1161_v54, %v996_v38  ;;  %v5963_v54 = vld [vmem:[#allocation27_spill] sm:$0xff]  ;;  %v1869_v38 = vld [vmem:[%s5841_s1 + $0x38] sm:$0xff] }
 0x279   :  { %v4535_v9 = vpop.eup %3546  ;;  %3568 = vtanh.f32 %v4470_v14  ;;  %v5952_v14 = vld [vmem:[#allocation18_spill] sm:$0xff]  ;;  %v1529_v29 = vadd.f32 %v4401_v27, %v3894_v36  ;;  %v1331_v50 = vmul.f32 %v5958_v19, %v5957_v35  ;;  %v1330_v37 = vmul.f32 %v4481_v5, %v5959_v47  ;;  %v1865_v36 = vld [vmem:[%s5841_s1 + $0x18] sm:$0xff]  ;;  %v5961_v5 = vld [vmem:[#allocation25_spill] sm:$0xff] }
 0x27a   :  { %v4543_v62 = vpop.eup %3548  ;;  %3570 = vtanh.f32 %v1699_v4  ;;  %v1170_v23 = vadd.f32 %v1162_v33, %v997_v52  ;;  %v991_v28 = vmul.f32 %v4472_v63, %v5952_v14  ;;  %v5954_v4 = vld [vmem:[#allocation61_spill] sm:$0xff]  ;;  %v1164_v63 = vmul.f32 %v4476_v48, %v5955_v39  ;;  %v1867_v33 = vld [vmem:[%s5841_s1 + $0x28] sm:$0xff]  ;;  %v5968_v19 = vld [vmem:[#allocation32_spill] sm:$0xff] }
 0x27b   :  { %v4548_v41 = vpop.eup %3550  ;;  %3572 = vtanh.f32 %v1698_v51  ;;  %v990_v51 = vmul.f32 %v5954_v4, %v5953_v25  ;;  %v1866_v48 = vld [vmem:[%s5841_s1 + $0x20] sm:$0xff]  ;;  %v1339_v46 = vadd.f32 %v1331_v50, %v1166_v26  ;;  %v1503_v58 = vmul.f32 %v4494_v59, %v5961_v5  ;;  %v5962_v59 = vld [vmem:[#allocation26_spill] sm:$0xff]  ;;  %v4632_v50 = vpop.xlane.xlu0 %2006 }
 0x27c   :  { %v4550_v44 = vpop.eup %3552  ;;  %3574 = vtanh.f32 %v1528_v16  ;;  %v999_v8 = vadd.f32 %v991_v28, %v826_v3  ;;  %v5956_v16 = vld [vmem:[#allocation21_spill] sm:$0xff]  ;;  %v1338_v15 = vadd.f32 %v1330_v37, %v1165_v24  ;;  %v1703_v26 = vadd.f32 %v4404_v0, %v3901_v40  ;;  %v5964_v0 = vld [vmem:[#allocation28_spill] sm:$0xff]  ;;  %5969 = vst [vmem:[#allocation56_spill] sm:$0xff] %v4632_v50 }
 0x27d   :  { %v4556_v55 = vpop.eup %3554  ;;  %3576 = vtanh.f32 %v1527_v45  ;;  %v1163_v1 = vmul.f32 %v4458_v43, %v5956_v16  ;;  %v998_v34 = vadd.f32 %v990_v51, %v825_v61  ;;  %v1530_v43 = vadd.f32 %v4401_v27, %v3901_v40  ;;  %v5960_v61 = vld [vmem:[#allocation24_spill] sm:$0xff]  ;;  %v1868_v27 = vld [vmem:[%s5841_s1 + $0x30] sm:$0xff]  ;;  %v5965_v28 = vld [vmem:[#allocation29_spill] sm:$0xff] }
 0x27e   :  { %v4562_v2 = vpop.eup %3556  ;;  %3578 = vtanh.f32 %v1701_v17  ;;  %v1172_v60 = vadd.f32 %v1164_v63, %v999_v8  ;;  %v1504_v13 = vmul.f32 %v4488_v42, %v5960_v61  ;;  %v1333_v53 = vmul.f32 %v4498_v49, %v5962_v59  ;;  %v1870_v17 = vld [vmem:[%s5841_s1 + $0x40] sm:$0xff]  ;;  %v5966_v8 = vld [vmem:[#allocation30_spill] sm:$0xff]  ;;  %v5967_v16 = vld [vmem:[#allocation31_spill] sm:$0xff] }
 0x27f   :  { %v4572_v7 = vpop.eup %3558  ;;  %v1171_v32 = vadd.f32 %v1163_v1, %v998_v34  ;;  %3580 = vtanh.f32 %v1700_v21  ;;  %v1332_v24 = vmul.f32 %v4505_v6, %v5963_v54  ;;  %v3338_v52 = vpack.c.bf16 %v1866_v48, %v1865_v36  ;;  %v5970_v47 = vld [vmem:[#allocation33_spill] sm:$0xff]  ;;  %v5971_v48 = vld [vmem:[#allocation34_spill] sm:$0xff]  ;;  %v5973_v61 = vld [vmem:[#allocation36_spill] sm:$0xff] }
 0x280   :  { %v4580_v45 = vpop.eup %3560  ;;  %v1512_v11 = vadd.f32 %v1504_v13, %v1339_v46  ;;  %v1511_v40 = vadd.f32 %v1503_v58, %v1338_v15  ;;  %v1506_v14 = vmul.f32 %v4513_v22, %v5964_v0  ;;  %v1505_v49 = vmul.f32 %v4518_v56, %v5965_v28  ;;  %v5972_v46 = vld [vmem:[#allocation35_spill] sm:$0xff]  ;;  %v1873_v15 = vld [vmem:[%s5841_s1 + $0x58] sm:$0xff] }
 0x281   :  { %v4592_v3 = vpop.eup %3562  ;;  %3582 = vtanh.f32 %v1530_v43  ;;  %v1341_v25 = vadd.f32 %v1333_v53, %v1168_v31  ;;  %v1340_v4 = vadd.f32 %v1332_v24, %v1167_v30  ;;  %3339 = vmatprep.subr.bf16.mxu1 %v3338_v52  ;;  %v3342_v51 = vpack.c.bf16 %v1868_v27, %v1867_v33  ;;  %v5974_v33 = vld [vmem:[#allocation37_spill] sm:$0xff]  ;;  %v5977_v0 = vld [vmem:[#allocation40_spill] sm:$0xff] }
 0x282   :  { %v4598_v10 = vpop.eup %3564  ;;  %v1335_v39 = vmul.f32 %v4525_v18, %v5966_v8  ;;  %3341 = vmatpush3.bf16.msra.mxu1 %v3338_v52  ;;  %v1334_v1 = vmul.f32 %v4532_v57, %v5967_v16  ;;  %v3346_v35 = vpack.c.bf16 %v1870_v17, %v1869_v38  ;;  %v1508_v22 = vmul.f32 %v4535_v9, %v5968_v19  ;;  %v1871_v9 = vld [vmem:[%s5841_s1 + $0x48] sm:$0xff]  ;;  %v5976_v52 = vld [vmem:[#allocation39_spill] sm:$0xff]  ;;  %v5982_v19 = vld [vmem:[#allocation45_spill] sm:$0xff] }
 0x283   :  { %v4608_v42 = vpop.eup %3566  ;;  %3584 = vtanh.f32 %v1529_v29  ;;  %v1514_v31 = vadd.f32 %v1506_v14, %v1341_v25  ;;  %v1513_v30 = vadd.f32 %v1505_v49, %v1340_v4  ;;  %3343 = vmatprep.subr.bf16.mxu1 %v3342_v51  ;;  %v1507_v18 = vmul.f32 %v4543_v62, %v5970_v47  ;;  %v1872_v29 = vld [vmem:[%s5841_s1 + $0x50] sm:$0xff]  ;;  %v5978_v4 = vld [vmem:[#allocation41_spill] sm:$0xff]  ;;  %v5983_v47 = vld [vmem:[#allocation46_spill] sm:$0xff] }
 0x284   :  { %v4620_v21 = vpop.eup %3568  ;;  %v1343_v34 = vadd.f32 %v1335_v39, %v1170_v23  ;;  %v2133_v36 = vand.u32 2139095040, %v4632_v50  ;;  %v1342_v57 = vadd.f32 %v1334_v1, %v4558_v12  ;;  %v1337_v43 = vmul.f32 %v4548_v41, %v5971_v48  ;;  %v1874_v41 = vld [vmem:[%s5841_s1 + $0x60] sm:$0xff]  ;;  %v5980_v16 = vld [vmem:[#allocation43_spill] sm:$0xff]  ;;  %v5981_v1 = vld [vmem:[#allocation44_spill] sm:$0xff] }
 0x285   :  { %v3571_v6 = vpop.eup %3570  ;;  %3586 = vtanh.f32 %v1703_v26  ;;  %v1336_v62 = vmul.f32 %v4550_v44, %v5972_v46  ;;  %v1510_v13 = vmul.f32 %v4556_v55, %v5973_v61  ;;  %v1509_v44 = vmul.f32 %v4562_v2, %v5974_v33  ;;  %v5975_v26 = vld [vmem:[#allocation38_spill] sm:$0xff] }
 0x286   :  { %v3573_v63 = vpop.eup %3572  ;;  %v1516_v23 = vadd.f32 %v1508_v22, %v1343_v34  ;;  %3588 = vtanh.f32 %v4570_v20  ;;  %3345 = vmatpush3.bf16.msra.mxu1 %v3342_v51  ;;  %v1515_v5 = vadd.f32 %v1507_v18, %v1342_v57  ;;  %v1345_v58 = vadd.f32 %v1337_v43, %v1172_v60  ;;  %v1875_v20 = vld [vmem:[%s5841_s1 + $0x68] sm:$0xff]  ;;  %v1876_v60 = vld [vmem:[%s5841_s1 + $0x70] sm:$0xff]  ;;  %v5985_v57 = vld [vmem:[#allocation48_spill] sm:$0xff] }
 0x287   :  { %v3575_v56 = vpop.eup %3574  ;;  %3347 = vmatprep.subr.bf16.mxu1 %v3346_v35  ;;  %v3350_v27 = vpack.c.bf16 %v1872_v29, %v1871_v9  ;;  %v1344_v55 = vadd.f32 %v1336_v62, %v1171_v32  ;;  %v1677_v59 = vmul.f32 %v4572_v7, %v5975_v26  ;;  %v2134_v54 = vshrl.u32 %v2133_v36, 23  ;;  %v5979_v7 = vld [vmem:[#allocation42_spill] sm:$0xff]  ;;  %v5984_v18 = vld [vmem:[#allocation47_spill] sm:$0xff] }
 0x288   :  { %v3577_v37 = vpop.eup %3576  ;;  %v1518_v24 = vadd.f32 %v1510_v13, %v1345_v58  ;;  %v1676_v2 = vmul.f32 %v4580_v45, %v5976_v52  ;;  %v3354_v38 = vpack.c.bf16 %v1874_v41, %v1873_v15  ;;  %v1850_v14 = vmul.f32 %v4592_v3, %v5977_v0  ;;  %v5987_v48 = vld [vmem:[#allocation50_spill] sm:$0xff]  ;;  %v1877_v15 = vld [vmem:[%s5841_s1 + $0x78] sm:$0xff]  ;;  %v4704_v0 = vpop.xlane.xlu0 %2009 }
 0x289   :  { %v3579_v12 = vpop.eup %3578  ;;  %v1517_v17 = vadd.f32 %v1509_v44, %v1344_v55  ;;  %v1685_v32 = vadd.f32 %v1677_v59, %v1512_v11  ;;  %v3358_v49 = vpack.c.bf16 %v1876_v60, %v1875_v20  ;;  %v1849_v51 = vmul.f32 %v4598_v10, %v5978_v4  ;;  %v5991_v33 = vld [vmem:[#allocation54_spill] sm:$0xff]  ;;  %5992 = vst [vmem:[#allocation55_spill] sm:$0xff] %v4704_v0 }
 0x28a   :  { %v3581_v53 = vpop.eup %3580  ;;  %3349 = vmatpush3.bf16.msra.mxu1 %v3346_v35  ;;  %v1684_v25 = vadd.f32 %v1676_v2, %v1511_v40  ;;  %v1679_v8 = vmul.f32 %v4608_v42, %v5979_v7  ;;  %v1678_v45 = vmul.f32 %v4620_v21, %v5980_v16  ;;  %v1852_v11 = vmul.f32 %v3571_v6, %v5981_v1  ;;  %v5986_v42 = vld [vmem:[#allocation49_spill] sm:$0xff] }
 0x28b   :  { %v3583_v28 = vpop.eup %3582  ;;  %3351 = vmatprep.subr.bf16.mxu1 %v3350_v27  ;;  %v1858_v39 = vadd.f32 %v1850_v14, %v1685_v32  ;;  %v1851_v22 = vmul.f32 %v3573_v63, %v5982_v19  ;;  %v1681_v40 = vmul.f32 %v3575_v56, %v5983_v47  ;;  %v1680_v36 = vmul.f32 %v3577_v37, %v5984_v18  ;;  %v5988_v56 = vld [vmem:[#allocation51_spill] sm:$0xff]  ;;  %v5989_v37 = vld [vmem:[#allocation53_spill] sm:$0xff] }
 0x28c   :  { %v1857_v34 = vadd.f32 %v1849_v51, %v1684_v25  ;;  %v1687_v35 = vadd.f32 %v1679_v8, %v1514_v31  ;;  %v1686_v10 = vadd.f32 %v1678_v45, %v1513_v30  ;;  %v1854_v9 = vmul.f32 %v3579_v12, %v5985_v57  ;;  %v4686_v12 = vpop.xlane.xlu1 %2003 }
 0x28d   :  { %v3585_v3 = vpop.eup %3584  ;;  %v1853_v29 = vmul.f32 %v3581_v53, %v5986_v42  ;;  %v1683_v43 = vmul.f32 %v3583_v28, %v5987_v48  ;;  %v1689_v6 = vadd.f32 %v1681_v40, %v1516_v23  ;;  %v1688_v63 = vadd.f32 %v1680_v36, %v1515_v5  ;;  %5990 = vst [vmem:[#allocation14_spill] sm:$0xff] %v4686_v12  ;;  %v1878_v23 = vld [vmem:[%s5841_s1 + $0x80] sm:$0xff]  ;;  %v1879_v53 = vld [vmem:[%s5841_s1 + $0x88] sm:$0xff] }
 0x28e   :  { %3353 = vmatpush3.bf16.msra.mxu1 %v3350_v27  ;;  %3318 = vmatprep.mubr.f32.mxu1 %v1857_v34  ;;  %v1860_v21 = vadd.f32 %v1852_v11, %v1687_v35  ;;  %v1859_v31 = vadd.f32 %v1851_v22, %v1686_v10  ;;  %v1682_v13 = vmul.f32 %v3585_v3, %v5988_v56  ;;  %v3018_v58 = vadd.s32 4294967169, %v2134_v54  ;;  %v1880_v54 = vld [vmem:[%s5841_s1 + $0x90] sm:$0xff] }
 0x28f   :  { %v3587_v46 = vpop.eup %3586  ;;  %3355 = vmatprep.subr.bf16.mxu1 %v3354_v38  ;;  %v1691_v61 = vadd.f32 %v1683_v43, %v1518_v24  ;;  %v1862_v5 = vadd.f32 %v1854_v9, %v1689_v6  ;;  %v1861_v41 = vadd.f32 %v1853_v29, %v1688_v63  ;;  %v2029_v27 = vand.u32 2139095040, %v4686_v12 }
 0x290   :  { %v3589_v62 = vpop.eup %3588  ;;  %v1856_v30 = vmul.f32 %v3587_v46, %v5989_v37  ;;  %v1690_v55 = vadd.f32 %v1682_v13, %v1517_v17  ;;  %v3362_v60 = vpack.c.bf16 %v1878_v23, %v1877_v15  ;;  %v2140_v59 = vadd.s32 1, %v3018_v58  ;;  %v4732_v6 = vpop.xlane.xlu1 %2012 }
 0x291   :  { %v1855_v44 = vmul.f32 %v3589_v62, %v5991_v33  ;;  %v2030_v24 = vshrl.u32 %v2029_v27, 23  ;;  %v3366_v52 = vpack.c.bf16 %v1880_v54, %v1879_v53  ;;  %v2237_v14 = vand.u32 2139095040, %v4704_v0  ;;  %5993 = vst [vmem:[#allocation13_spill] sm:$0xff] %v4732_v6 }
 0x292   :  { %v4696_v20 = vadd.f32 %v1856_v30, %v1691_v61  ;;  %3357 = vmatpush3.bf16.msra.mxu1 %v3354_v38  ;;  %vm2141_vm3 = vcmp.gt.s32.totalorder %v2140_v59, 0  ;;  %v5846_v25 = vand.u32 2147483647, %v4632_v50  ;;  %v5862_v51 = vmov 2102212464  }
 0x293   :  { %3359 = vmatprep.subr.bf16.mxu1 %v3358_v49  ;;  %v1863_v26 = vadd.f32 %v1855_v44, %v1690_v55  ;;  %v3014_v2 = vadd.s32 4294967169, %v2030_v24  ;;  %v2142_v38 = vsel %vm2141_vm3, %v2140_v59, 0  ;;  %v2238_v4 = vshrl.u32 %v2237_v14, 23 }
 0x294   :  { %v2144_v32 = vand.u32 31, %v2142_v38  ;;  %v3645_v8 = vmov 920167782   ;;  %v5869_v1 = vmov 1326507024   ;;  %v4716_v11 = vshrl.u32 %v2142_v38, 5 }
 0x295   :  { %v2036_v17 = vadd.s32 1, %v3014_v2  ;;  %v5848_v19 = vmov 683565275   ;;  %v5850_v3 = vmov 2475754826   ;;  %v3022_v48 = vadd.s32 4294967169, %v2238_v4 }
 0x296   :  { %3361 = vmatpush3.bf16.msra.mxu1 %v3358_v49  ;;  %v4707_v28 = vsub.s32 32, %v2144_v32  ;;  %v2156_v7 = vshll.u32 %v5862_v51, %v2144_v32  ;;  %v2159_v45 = vshll.u32 %v3645_v8, %v2144_v32  ;;  %v2147_v22 = vshll.u32 %v5848_v19, %v2144_v32 }
 0x297   :  { %3363 = vmatprep.subr.bf16.mxu1 %v3362_v60  ;;  %vm2037_vm4 = vcmp.gt.s32.totalorder %v2036_v17, 0  ;;  %v2150_v34 = vshll.u32 %v5850_v3, %v2144_v32  ;;  %v5852_v40 = vmov 2131351028   ;;  %v2137_v57 = vand.u32 8388607, %v5846_v25 }
 0x298   :  { %v2038_v49 = vsel %vm2037_vm4, %v2036_v17, 0  ;;  %v2157_v16 = vshrl.u32 %v3645_v8, %v4707_v28  ;;  %v2148_v47 = vshrl.u32 %v5850_v3, %v4707_v28  ;;  %v2151_v18 = vshrl.u32 %v5852_v40, %v4707_v28 }
 0x299   :  { %v2040_v35 = vand.u32 31, %v2038_v49  ;;  %v2153_v36 = vshll.u32 %v5852_v40, %v2144_v32  ;;  %v2154_v10 = vshrl.u32 %v5862_v51, %v4707_v28  ;;  %vm2165_vm5 = vcmp.lt.s32.totalorder %v4716_v11, 4 }
 0x29a   :  { %3365 = vmatpush3.bf16.msra.mxu1 %v3362_v60  ;;  %v2158_v9 = vor.u32 %v2157_v16, %v2156_v7  ;;  %v2149_v43 = vor.u32 %v2148_v47, %v2147_v22  ;;  %v2152_v46 = vor.u32 %v2151_v18, %v2150_v34  ;;  %v2138_v63 = vor.u32 8388608, %v2137_v57 }
 0x29b   :  { %3367 = vmatprep.subr.bf16.mxu1 %v3366_v52  ;;  %v4730_v29 = vsub.s32 32, %v2040_v35  ;;  %vm2162_vm6 = vcmp.lt.s32.totalorder %v4716_v11, 1  ;;  %v5845_v62 = vand.u32 2147483647, %v4686_v12  ;;  %vm2164_vm7 = vcmp.lt.s32.totalorder %v4716_v11, 3 }
 0x29c   :  { %v2171_v61 = vsel %vm2165_vm5, %v2158_v9, 920167782  ;;  %v4743_v13 = vshrl.u32 %v2038_v49, 5  ;;  %vm2163_vm8 = vcmp.lt.s32.totalorder %v4716_v11, 2  ;;  %v2052_v37 = vshll.u32 %v5862_v51, %v2040_v35 }
 0x29d   :  { %v2053_v30 = vshrl.u32 %v3645_v8, %v4730_v29  ;;  %v2244_v58 = vadd.s32 1, %v3022_v48  ;;  %v2170_v15 = vsel %vm2162_vm6, %v2149_v43, %v2152_v46  ;;  %v2055_v27 = vshll.u32 %v3645_v8, %v2040_v35 }
 0x29e   :  { %3369 = vmatpush3.bf16.msra.mxu1 %v3366_v52  ;;  %v2056_v55 = vshrl.u32 %v5869_v1, %v4730_v29  ;;  %v2047_v60 = vshrl.u32 %v5852_v40, %v4730_v29  ;;  %v2050_v59 = vshrl.u32 %v5862_v51, %v4730_v29  ;;  %v2033_v53 = vand.u32 8388607, %v5845_v62 }
 0x29f   :  { %v2054_v54 = vor.u32 %v2053_v30, %v2052_v37  ;;  %vm2245_vm9 = vcmp.gt.s32.totalorder %v2244_v58, 0  ;;  %v4771_v24 = vshll.u32 %v2138_v63, 8  ;;  %vm2061_vm10 = vcmp.lt.s32.totalorder %v4743_v13, 4 }
 0x2a0   :  { %v2057_v17 = vor.u32 %v2056_v55, %v2055_v27  ;;  %v2246_v4 = vsel %vm2245_vm9, %v2244_v58, 0  ;;  %v2034_v7 = vor.u32 8388608, %v2033_v53  ;;  %vm2058_vm11 = vcmp.lt.s32.totalorder %v4743_v13, 1 }
 0x2a1   :  { %3319 = vmatmul.mubr.f32.vlgmr.msra.gmra.mrb[34].mxu1 %v1858_v39  ;;  %v2160_v39 = vshrl.u32 %v5869_v1, %v4707_v28  ;;  %vm2060_vm12 = vcmp.lt.s32.totalorder %v4743_v13, 3  ;;  %v2067_v16 = vsel %vm2061_vm10, %v2054_v54, 920167782  ;;  %vm2059_vm13 = vcmp.lt.s32.totalorder %v4743_v13, 2 }
 0x2a2   :  { %3321 = vmatprep.mubr.f32.mxu1 %v1859_v31  ;;  %v2341_v31 = vand.u32 2139095040, %v4732_v6  ;;  %v2071_v18 = vsel %vm2061_vm10, %v2057_v17, 1326507024  ;;  %v4809_v63 = vshll.u32 %v2034_v7, 8  ;;  %v2042_v30 = vshrl.u32 %v5848_v19, %v4730_v29 }
 0x2a3   :  { %v2161_v42 = vor.u32 %v2160_v39, %v2159_v45  ;;  %v2146_v45 = vshrl.u32 %v5848_v19, %v4707_v28  ;;  %v2072_v48 = vsel %vm2060_vm12, %v2054_v54, %v2071_v18  ;;  %v4847_v55 = vshrl.u32 %v2246_v4, 5  ;;  %v4876_v18 = vpop.xlane.xlu1 %2018 }
 0x2a4   :  { %v2342_v52 = vshrl.u32 %v2341_v31, 23  ;;  %5999 = vst [vmem:[#allocation17_spill] sm:$0xff] %v4876_v18 }
 0x2a5   :  { %3322 = vmatmul.mubr.f32.gmra.mrb[36].mxu1 %v1860_v21  ;;  %v2155_v21 = vor.u32 %v2154_v10, %v2153_v36  ;;  %v2175_v56 = vsel %vm2165_vm5, %v2161_v42, 1326507024  ;;  %v4795_v36 = vand.u32 31, %v2246_v4  ;;  %vm2269_vm0 = vcmp.lt.s32.totalorder %v4847_v55, 4 }
 0x2a6   :  { %3324 = vmatprep.mubr.f32.mxu1 %v1861_v41  ;;  %v2046_v41 = vshll.u32 %v5850_v3, %v2040_v35  ;;  %v2176_v44 = vsel %vm2164_vm7, %v2158_v9, %v2175_v56  ;;  %v3026_v34 = vadd.s32 4294967169, %v2342_v52  ;;  %v5844_v9 = vand.u32 2147483647, %v4704_v0 }
 0x2a7   :  { %v2174_v23 = vsel %vm2162_vm6, %v2152_v46, %v2155_v21  ;;  %v2172_v33 = vsel %vm2164_vm7, %v2155_v21, %v2171_v61  ;;  %v2167_v10 = vsel %vm2165_vm5, %v2155_v21, 2102212464  ;;  %v2166_v21 = vsel %vm2162_vm6, %v2146_v45, %v2149_v43 }
 0x2a8   :  { %v2173_v2 = vsel %vm2163_vm8, %v2170_v15, %v2172_v33  ;;  %v2177_v38 = vsel %vm2163_vm8, %v2174_v23, %v2176_v44  ;;  %v2048_v14 = vor.u32 %v2047_v60, %v2046_v41  ;;  %v2348_v31 = vadd.s32 1, %v3026_v34 }
 0x2a9   :  { %3325 = vmatmul.mubr.f32.gmra.mrb[38].mxu1 %v1862_v5  ;;  %v2043_v5 = vshll.u32 %v5848_v19, %v2040_v35  ;;  %v4785_v39 = vmul.u32.u64.low %v4771_v24, %v2177_v38  ;;  %v4786_v22 = vmul.u32.u64.high %v4771_v24, %v2177_v38, %v4785_v39  ;;  %v2168_v61 = vsel %vm2164_vm7, %v2152_v46, %v2167_v10 }
 0x2aa   :  { %3327 = vmatprep.mubr.f32.mxu1 %v1863_v26  ;;  %v2049_v26 = vshll.u32 %v5852_v40, %v2040_v35  ;;  %v4789_v35 = vmul.u32.u64.low %v4771_v24, %v2173_v2  ;;  %v4790_v47 = vmul.u32.u64.high %v4771_v24, %v2173_v2, %v4789_v35  ;;  %v4818_v37 = vsub.s32 32, %v4795_v36 }
 0x2ab   :  { %5994 = vst [vmem:[#allocation59_spill] sm:$0xff] %v4786_v22  ;;  %v2241_v15 = vand.u32 8388607, %v5844_v9  ;;  %v2169_v43 = vsel %vm2163_vm8, %v2166_v21, %v2168_v61  ;;  %vm2349_vm14 = vcmp.gt.s32.totalorder %v2348_v31, 0  ;;  %v2251_v60 = vshll.u32 %v5848_v19, %v4795_v36 }
 0x2ac   :  { %v2051_v49 = vor.u32 %v2050_v59, %v2049_v26  ;;  %5995 = vst [vmem:[#allocation15_spill] sm:$0xff] %v4789_v35  ;;  %vm2187_vm15 = vc.u32 %v4786_v22, %v4789_v35  ;;  %v2261_v41 = vshrl.u32 %v3645_v8, %v4818_v37  ;;  %v2188_v33 = vadd.s32 1, %v4790_v47 }
 0x2ad   :  { %3328 = vmatmul.mubr.f32.gmra.mrb[40].mxu1 %v4696_v20  ;;  %v2044_v20 = vshrl.u32 %v5850_v3, %v4730_v29  ;;  %v2260_v29 = vshll.u32 %v5862_v51, %v4795_v36  ;;  %v2254_v26 = vshll.u32 %v5850_v3, %v4795_v36  ;;  %v2350_v59 = vsel %vm2349_vm14, %v2348_v31, 0 }
 0x2ae   :  { %v2068_v57 = vsel %vm2060_vm12, %v2051_v49, %v2067_v16  ;;  %v2070_v42 = vsel %vm2058_vm11, %v2048_v14, %v2051_v49  ;;  %v2252_v53 = vshrl.u32 %v5850_v3, %v4818_v37  ;;  %v2255_v54 = vshrl.u32 %v5852_v40, %v4818_v37 }
 0x2af   :  { %v2045_v32 = vor.u32 %v2044_v20, %v2043_v5  ;;  %v2073_v58 = vsel %vm2059_vm13, %v2070_v42, %v2072_v48  ;;  %v4833_v5 = vpop.xlane.xlu0 %2015  ;;  %v2063_v20 = vsel %vm2061_vm10, %v2051_v49, 2102212464  ;;  %v2257_v52 = vshll.u32 %v5852_v40, %v4795_v36 }
 0x2b0   :  { %5997 = vst [vmem:[#allocation16_spill] sm:$0xff] %v4833_v5  ;;  %v2445_v11 = vand.u32 2139095040, %v4833_v5  ;;  %v4844_v44 = vmul.u32.u64.low %v4809_v63, %v2073_v58  ;;  %v4845_v27 = vmul.u32.u64.high %v4809_v63, %v2073_v58, %v4844_v44  ;;  %v2258_v2 = vshrl.u32 %v5862_v51, %v4818_v37 }
 0x2b1   :  { %v2066_v28 = vsel %vm2058_vm11, %v2045_v32, %v2048_v14  ;;  %v4863_v38 = vor.u32 %v2261_v41, %v2260_v29  ;;  %v2185_v49 = vmul.u32 %v4771_v24, %v2169_v43  ;;  %v5843_v4 = vand.u32 2147483647, %v4732_v6 }
 0x2b2   :  { %v2069_v56 = vsel %vm2059_vm13, %v2066_v28, %v2068_v57  ;;  %5998 = vst [vmem:[#allocation60_spill] sm:$0xff] %v4845_v27  ;;  %v2446_v17 = vshrl.u32 %v2445_v11, 23  ;;  %v2352_v7 = vand.u32 31, %v2350_v59  ;;  %v2189_v16 = vsel %vm2187_vm15, %v2188_v33, %v4790_v47 }
 0x2b3   :  { %v4829_v46 = vmul.u32.u64.low %v4809_v63, %v2069_v56  ;;  %v4830_v23 = vmul.u32.u64.high %v4809_v63, %v2069_v56, %v4829_v46  ;;  %v2062_v45 = vsel %vm2058_vm11, %v2042_v30, %v2045_v32  ;;  %v2064_v39 = vsel %vm2060_vm12, %v2048_v14, %v2063_v20 }
 0x2b4   :  { %v2242_v34 = vor.u32 8388608, %v2241_v15  ;;  %v2253_v24 = vor.u32 %v2252_v53, %v2251_v60  ;;  %v2256_v10 = vor.u32 %v2255_v54, %v2254_v26  ;;  %v2259_v28 = vor.u32 %v2258_v2, %v2257_v52 }
 0x2b5   :  { %5996 = vst [vmem:[#allocation57_spill] sm:$0xff] %v4829_v46  ;;  %v2549_v57 = vand.u32 2139095040, %v4876_v18  ;;  %vm2266_vm2 = vcmp.lt.s32.totalorder %v4847_v55, 1  ;;  %vm2268_vm3 = vcmp.lt.s32.totalorder %v4847_v55, 3  ;;  %v2275_v47 = vsel %vm2269_vm0, %v4863_v38, 920167782 }
 0x2b6   :  { %v3030_v32 = vadd.s32 4294967169, %v2446_v17  ;;  %v4884_v42 = vadd.s32 %v2189_v16, %v2185_v49  ;;  %v2065_v14 = vsel %vm2059_vm13, %v2062_v45, %v2064_v39  ;;  %v4888_v48 = vsub.s32 32, %v2352_v7 }
 0x2b7   :  { %vm2083_vm4 = vc.u32 %v4845_v27, %v4829_v46  ;;  %v2084_v31 = vadd.s32 1, %v4830_v23  ;;  %v2263_v21 = vshll.u32 %v3645_v8, %v4795_v36  ;;  %v2264_v61 = vshrl.u32 %v5869_v1, %v4818_v37 }
 0x2b8   :  { %vm2267_vm5 = vcmp.lt.s32.totalorder %v4847_v55, 2  ;;  %v2274_v56 = vsel %vm2266_vm2, %v2253_v24, %v2256_v10  ;;  %v2276_v13 = vsel %vm2268_vm3, %v2259_v28, %v2275_v47  ;;  %v2550_v30 = vshrl.u32 %v2549_v57, 23 }
 0x2b9   :  { %v4902_v58 = vshll.u32 %v2242_v34, 8  ;;  %v2345_v15 = vand.u32 8388607, %v5843_v4  ;;  %v2452_v43 = vadd.s32 1, %v3030_v32  ;;  %v2191_v36 = vadd.s32 536870912, %v4884_v42 }
 0x2ba   :  { %v2081_v29 = vmul.u32 %v4809_v63, %v2065_v14  ;;  %v2364_v41 = vshll.u32 %v5862_v51, %v2352_v7  ;;  %v2365_v11 = vshrl.u32 %v3645_v8, %v4888_v48  ;;  %v2085_v33 = vsel %vm2083_vm4, %v2084_v31, %v4830_v23 }
 0x2bb   :  { %v2265_v44 = vor.u32 %v2264_v61, %v2263_v21  ;;  %v2277_v20 = vsel %vm2267_vm5, %v2274_v56, %v2276_v13  ;;  %v4914_v60 = vshrl.u32 %v2350_v59, 5  ;;  %v2355_v26 = vshll.u32 %v5848_v19, %v2352_v7 }
 0x2bc   :  { %v2358_v53 = vshll.u32 %v5850_v3, %v2352_v7  ;;  %v2361_v54 = vshll.u32 %v5852_v40, %v2352_v7  ;;  %v3034_v63 = vadd.s32 4294967169, %v2550_v30  ;;  %v2356_v52 = vshrl.u32 %v5850_v3, %v4888_v48 }
 0x2bd   :  { %v2359_v2 = vshrl.u32 %v5852_v40, %v4888_v48  ;;  %v2362_v23 = vshrl.u32 %v5862_v51, %v4888_v48  ;;  %vm2453_vm6 = vcmp.gt.s32.totalorder %v2452_v43, 0  ;;  %v4925_v17 = vshrl.u32 %v2191_v36, 30 }
 0x2be   :  { %v2366_v59 = vor.u32 %v2365_v11, %v2364_v41  ;;  %v2367_v49 = vshll.u32 %v3645_v8, %v2352_v7  ;;  %v2368_v16 = vshrl.u32 %v5869_v1, %v4888_v48  ;;  %v4930_v45 = vadd.s32 %v2085_v33, %v2081_v29  ;;  %v4960_v33 = vpop.xlane.xlu0 %2021 }
 0x2bf   :  { %v2250_v39 = vshrl.u32 %v5848_v19, %v4818_v37  ;;  %v2271_v34 = vsel %vm2269_vm0, %v2259_v28, 2102212464  ;;  %vm2373_vm7 = vcmp.lt.s32.totalorder %v4914_v60, 4  ;;  %v2454_v32 = vsel %vm2453_vm6, %v2452_v43, 0  ;;  %6002 = vst [vmem:[#allocation19_spill] sm:$0xff] %v4960_v33 }
 0x2c0   :  { %6000 = vst [vmem:[#allocation58_spill] sm:$0xff] %v4930_v45  ;;  %v4938_v57 = vmul.u32.u64.low %v4902_v58, %v2277_v20  ;;  %v4939_v47 = vmul.u32.u64.high %v4902_v58, %v2277_v20, %v4938_v57  ;;  %v2556_v7 = vadd.s32 1, %v3034_v63  ;;  %v2279_v14 = vsel %vm2269_vm0, %v2265_v44, 1326507024 }
 0x2c1   :  { %v2357_v31 = vor.u32 %v2356_v52, %v2355_v26  ;;  %v4944_v21 = vor.u32 %v2359_v2, %v2358_v53  ;;  %v2363_v61 = vor.u32 %v2362_v23, %v2361_v54  ;;  %v2369_v37 = vor.u32 %v2368_v16, %v2367_v49  ;;  %v4983_v52 = vpop.xlane.xlu1 %2024 }
 0x2c2   :  { %6001 = vst [vmem:[#allocation18_spill] sm:$0xff] %v4938_v57  ;;  %vm2370_vm8 = vcmp.lt.s32.totalorder %v4914_v60, 1  ;;  %vm2372_vm9 = vcmp.lt.s32.totalorder %v4914_v60, 3  ;;  %v2379_v56 = vsel %vm2373_vm7, %v2366_v59, 920167782  ;;  %v2270_v13 = vsel %vm2266_vm2, %v2250_v39, %v2253_v24 }
 0x2c3   :  { %v2272_v30 = vsel %vm2268_vm3, %v2256_v10, %v2271_v34  ;;  %v2346_v43 = vor.u32 8388608, %v2345_v15  ;;  %v2456_v36 = vand.u32 31, %v2454_v32  ;;  %v2087_v29 = vadd.s32 536870912, %v4930_v45 }
 0x2c4   :  { %v2278_v41 = vsel %vm2266_vm2, %v2256_v10, %v2259_v28  ;;  %v2280_v11 = vsel %vm2268_vm3, %v4863_v38, %v2279_v14  ;;  %vm2557_vm10 = vcmp.gt.s32.totalorder %v2556_v7, 0  ;;  %vm2371_vm11 = vcmp.lt.s32.totalorder %v4914_v60, 2 }
 0x2c5   :  { %v2378_v24 = vsel %vm2370_vm8, %v2357_v31, %v4944_v21  ;;  %v2380_v15 = vsel %vm2372_vm9, %v2363_v61, %v2379_v56  ;;  %v2653_v44 = vand.u32 2139095040, %v4960_v33  ;;  %v4972_v28 = vsel %vm2267_vm5, %v2270_v13, %v2272_v30 }
 0x2c6   :  { %v2383_v38 = vsel %vm2373_vm7, %v2369_v37, 1326507024  ;;  %v5847_v20 = vand.u32 2147483647, %v4833_v5  ;;  %v2281_v26 = vsel %vm2267_vm5, %v2278_v41, %v2280_v11  ;;  %v4979_v53 = vshll.u32 %v2346_v43, 8 }
 0x2c7   :  { %v4981_v54 = vsub.s32 32, %v2456_v36  ;;  %v2558_v63 = vsel %vm2557_vm10, %v2556_v7, 0  ;;  %v4985_v2 = vshrl.u32 %v2087_v29, 30  ;;  %v2354_v23 = vshrl.u32 %v5848_v19, %v4888_v48 }
 0x2c8   :  { %6003 = vst [vmem:[#allocation61_spill] sm:$0xff] %v4979_v53  ;;  %v4991_v49 = vsel %vm2371_vm11, %v2378_v24, %v2380_v15  ;;  %v2757_v16 = vand.u32 2139095040, %v4983_v52  ;;  %v2382_v39 = vsel %vm2370_vm8, %v4944_v21, %v2363_v61  ;;  %v2384_v34 = vsel %vm2372_vm9, %v2366_v59, %v2383_v38 }
 0x2c9   :  { %6004 = vst [vmem:[#allocation20_spill] sm:$0xff] %v4985_v2  ;;  %v2654_v7 = vshrl.u32 %v2653_v44, 23  ;;  %v5002_v14 = vmul.u32.u64.low %v4902_v58, %v2281_v26  ;;  %v5003_v48 = vmul.u32.u64.high %v4902_v58, %v2281_v26, %v5002_v14  ;;  %v5006_v37 = vadd.s32 1, %v4939_v47 }
 0x2ca   :  { %v2560_v56 = vand.u32 31, %v2558_v63  ;;  %v5010_v13 = vmul.u32.u64.low %v4979_v53, %v4991_v49  ;;  %v5011_v30 = vmul.u32.u64.high %v4979_v53, %v4991_v49, %v5010_v13  ;;  %v2468_v43 = vshll.u32 %v5862_v51, %v2456_v36 }
 0x2cb   :  { %6005 = vst [vmem:[#allocation21_spill] sm:$0xff] %v5003_v48  ;;  %v2469_v59 = vshrl.u32 %v3645_v8, %v4981_v54  ;;  %v5019_v29 = vsel %vm2370_vm8, %v2354_v23, %v2357_v31  ;;  %v5023_v41 = vsel %vm2371_vm11, %v2382_v39, %v2384_v34  ;;  %v5025_v11 = vshrl.u32 %v2454_v32, 5 }
 0x2cc   :  { %v2758_v24 = vshrl.u32 %v2757_v16, 23  ;;  %v2459_v15 = vshll.u32 %v5848_v19, %v2456_v36  ;;  %v2460_v44 = vshrl.u32 %v5850_v3, %v4981_v54  ;;  %v2462_v38 = vshll.u32 %v5850_v3, %v2456_v36 }
 0x2cd   :  { %v3038_v26 = vadd.s32 4294967169, %v2654_v7  ;;  %v2463_v49 = vshrl.u32 %v5852_v40, %v4981_v54  ;;  %v2465_v31 = vshll.u32 %v5852_v40, %v2456_v36  ;;  %v2466_v23 = vshrl.u32 %v5862_v51, %v4981_v54 }
 0x2ce   :  { %v5036_v39 = vsub.s32 32, %v2560_v56  ;;  %v2375_v32 = vsel %vm2373_vm7, %v2363_v61, 2102212464  ;;  %v2449_v16 = vand.u32 8388607, %v5847_v20  ;;  %v2470_v34 = vor.u32 %v2469_v59, %v2468_v43 }
 0x2cf   :  { %v5854_v14 = vand.u32 2147483647, %v4876_v18  ;;  %v5045_v7 = vmul.u32.u64.low %v4979_v53, %v5023_v41  ;;  %v5046_v4 = vmul.u32.u64.high %v4979_v53, %v5023_v41, %v5045_v7  ;;  %vm2477_vm12 = vcmp.lt.s32.totalorder %v5025_v11, 4 }
 0x2d0   :  { %v3042_v9 = vadd.s32 4294967169, %v2758_v24  ;;  %v5050_v62 = vor.u32 %v2460_v44, %v2459_v15  ;;  %v2471_v25 = vshll.u32 %v3645_v8, %v2456_v36  ;;  %vm2474_vm13 = vcmp.lt.s32.totalorder %v5025_v11, 1 }
 0x2d1   :  { %v2660_v61 = vadd.s32 1, %v3038_v26  ;;  %v5054_v20 = vor.u32 %v2463_v49, %v2462_v38  ;;  %v5056_v43 = vor.u32 %v2466_v23, %v2465_v31  ;;  %v2572_v59 = vshll.u32 %v5862_v51, %v2560_v56 }
 0x2d2   :  { %v2573_v41 = vshrl.u32 %v3645_v8, %v5036_v39  ;;  %v2472_v7 = vshrl.u32 %v5869_v1, %v4981_v54  ;;  %vm2476_vm14 = vcmp.lt.s32.totalorder %v5025_v11, 3  ;;  %v2483_v36 = vsel %vm2477_vm12, %v2470_v34, 920167782 }
 0x2d3   :  { %v5066_v24 = vshrl.u32 %v2558_v63, 5  ;;  %v2563_v15 = vshll.u32 %v5848_v19, %v2560_v56  ;;  %v2564_v44 = vshrl.u32 %v5850_v3, %v5036_v39  ;;  %v2566_v38 = vshll.u32 %v5850_v3, %v2560_v56 }
 0x2d4   :  { %v2764_v26 = vadd.s32 1, %v3042_v9  ;;  %v2567_v49 = vshrl.u32 %v5852_v40, %v5036_v39  ;;  %v2569_v31 = vshll.u32 %v5852_v40, %v2560_v56  ;;  %v2570_v23 = vshrl.u32 %v5862_v51, %v5036_v39 }
 0x2d5   :  { %vm2661_vm15 = vcmp.gt.s32.totalorder %v2660_v61, 0  ;;  %v2376_v63 = vsel %vm2372_vm9, %v4944_v21, %v2375_v32  ;;  %v2450_v10 = vor.u32 8388608, %v2449_v16  ;;  %v2553_v55 = vand.u32 8388607, %v5854_v14 }
 0x2d6   :  { %v2574_v19 = vor.u32 %v2573_v41, %v2572_v59  ;;  %v2473_v3 = vor.u32 %v2472_v7, %v2471_v25  ;;  %vm2475_vm0 = vcmp.lt.s32.totalorder %v5025_v11, 2  ;;  %v2482_v9 = vsel %vm2474_vm13, %v5050_v62, %v5054_v20 }
 0x2d7   :  { %vm2581_vm2 = vcmp.lt.s32.totalorder %v5066_v24, 4  ;;  %v2484_v40 = vsel %vm2476_vm14, %v5056_v43, %v2483_v36  ;;  %v5091_v21 = vor.u32 %v2564_v44, %v2563_v15  ;;  %v2662_v32 = vsel %vm2661_vm15, %v2660_v61, 0 }
 0x2d8   :  { %vm2765_vm3 = vcmp.gt.s32.totalorder %v2764_v26, 0  ;;  %v5093_v16 = vor.u32 %v2567_v49, %v2566_v38  ;;  %v2571_v25 = vor.u32 %v2570_v23, %v2569_v31  ;;  %v2575_v59 = vshll.u32 %v3645_v8, %v2560_v56 }
 0x2d9   :  { %v2576_v41 = vshrl.u32 %v5869_v1, %v5036_v39  ;;  %vm2291_vm4 = vc.u32 %v5003_v48, %v4938_v57  ;;  %vm2578_vm5 = vcmp.lt.s32.totalorder %v5066_v24, 1  ;;  %vm2580_vm6 = vcmp.lt.s32.totalorder %v5066_v24, 3 }
 0x2da   :  { %v2587_v7 = vsel %vm2581_vm2, %v2574_v19, 920167782  ;;  %v2487_v61 = vsel %vm2477_vm12, %v2473_v3, 1326507024  ;;  %v2554_v36 = vor.u32 8388608, %v2553_v55  ;;  %v2664_v15 = vand.u32 31, %v2662_v32 }
 0x2db   :  { %v2766_v44 = vsel %vm2765_vm3, %v2764_v26, 0  ;;  %v5109_v56 = vsel %vm2371_vm11, %v5019_v29, %v2376_v63  ;;  %v5113_v38 = vsel %vm2475_vm0, %v2482_v9, %v2484_v40  ;;  %v5115_v49 = vshll.u32 %v2450_v10, 8 }
 0x2dc   :  { %6006 = vst [vmem:[#allocation22_spill] sm:$0xff] %v5109_v56  ;;  %v5855_v31 = vand.u32 2147483647, %v4960_v33  ;;  %v2577_v23 = vor.u32 %v2576_v41, %v2575_v59  ;;  %vm2579_vm7 = vcmp.lt.s32.totalorder %v5066_v24, 2  ;;  %v2586_v3 = vsel %vm2578_vm5, %v5091_v21, %v5093_v16 }
 0x2dd   :  { %v2588_v60 = vsel %vm2580_vm6, %v2571_v25, %v2587_v7  ;;  %v5130_v40 = vsel %vm2291_vm4, %v5006_v37, %v4939_v47  ;;  %v2486_v10 = vsel %vm2474_vm13, %v5054_v20, %v5056_v43  ;;  %v2488_v55 = vsel %vm2476_vm14, %v2470_v34, %v2487_v61 }
 0x2de   :  { %v2768_v29 = vand.u32 31, %v2766_v44  ;;  %v5141_v63 = vadd.s32 1, %v5011_v30  ;;  %v5143_v9 = vshll.u32 %v2554_v36, 8  ;;  %v5145_v59 = vsub.s32 32, %v2664_v15 }
 0x2df   :  { %v6007_v47 = vmov 683565275   ;;  %v5153_v41 = vmul.u32.u64.low %v5115_v49, %v5113_v38  ;;  %v5154_v7 = vmul.u32.u64.high %v5115_v49, %v5113_v38, %v5153_v41  ;;  %v5159_v34 = vsel %vm2579_vm7, %v2586_v3, %v2588_v60 }
 0x2e0   :  { %v5149_v37 = vshrl.u32 %v6007_v47, %v4981_v54  ;;  %v5163_v61 = vsel %vm2475_vm0, %v2486_v10, %v2488_v55  ;;  %v2591_v36 = vsel %vm2581_vm2, %v2577_v23, 1326507024  ;;  %v2657_v54 = vand.u32 8388607, %v5855_v31 }
 0x2e1   :  { %6008 = vst [vmem:[#allocation52_spill] sm:$0xff] %v5153_v41  ;;  %v5172_v38 = vshrl.u32 %v6007_v47, %v5036_v39  ;;  %v5176_v3 = vsel %vm2581_vm2, %v2571_v25, 2102212464  ;;  %v2590_v60 = vsel %vm2578_vm5, %v5093_v16, %v2571_v25  ;;  %v5181_v10 = vsub.s32 32, %v2768_v29 }
 0x2e2   :  { %v5185_v23 = vmul.u32.u64.low %v5143_v9, %v5159_v34  ;;  %v5186_v55 = vmul.u32.u64.high %v5143_v9, %v5159_v34, %v5185_v23  ;;  %v2676_v31 = vshll.u32 %v5862_v51, %v2664_v15  ;;  %v2677_v39 = vshrl.u32 %v3645_v8, %v5145_v59 }
 0x2e3   :  { %v2592_v26 = vsel %vm2580_vm6, %v2574_v19, %v2591_v36  ;;  %v5194_v14 = vshrl.u32 %v2662_v32, 5  ;;  %v2679_v25 = vshll.u32 %v3645_v8, %v2664_v15  ;;  %v2680_v33 = vshrl.u32 %v5869_v1, %v5145_v59 }
 0x2e4   :  { %v2667_v18 = vshll.u32 %v6007_v47, %v2664_v15  ;;  %v6009_v34 = vmov 2475754826   ;;  %v6010_v6 = vmov 2131351028   ;;  %v6011_v19 = vmov 2102212464  }
 0x2e5   :  { %v2668_v5 = vshrl.u32 %v6009_v34, %v5145_v59  ;;  %v2670_v51 = vshll.u32 %v6009_v34, %v2664_v15  ;;  %v2673_v0 = vshll.u32 %v6010_v6, %v2664_v15  ;;  %v2671_v57 = vshrl.u32 %v6010_v6, %v5145_v59 }
 0x2e6   :  { %v2674_v32 = vshrl.u32 %v6011_v19, %v5145_v59  ;;  %v2780_v36 = vshll.u32 %v6011_v19, %v2768_v29  ;;  %v2781_v1 = vshrl.u32 %v3645_v8, %v5181_v10  ;;  %v2678_v48 = vor.u32 %v2677_v39, %v2676_v31 }
 0x2e7   :  { %v5211_v12 = vshrl.u32 %v2766_v44, 5  ;;  %v2783_v46 = vshll.u32 %v3645_v8, %v2768_v29  ;;  %v6012_v27 = vmov 1326507024   ;;  %v2681_v15 = vor.u32 %v2680_v33, %v2679_v25 }
 0x2e8   :  { %v2784_v50 = vshrl.u32 %v6012_v27, %v5181_v10  ;;  %vm2685_vm8 = vcmp.lt.s32.totalorder %v5194_v14, 4  ;;  %v2771_v35 = vshll.u32 %v6007_v47, %v2768_v29  ;;  %v2774_v22 = vshll.u32 %v6009_v34, %v2768_v29 }
 0x2e9   :  { %v2772_v45 = vshrl.u32 %v6009_v34, %v5181_v10  ;;  %v2775_v31 = vshrl.u32 %v6010_v6, %v5181_v10  ;;  %v2777_v44 = vshll.u32 %v6010_v6, %v2768_v29  ;;  %v2778_v8 = vshrl.u32 %v6011_v19, %v5181_v10 }
 0x2ea   :  { %v2593_v27 = vsel %vm2579_vm7, %v2590_v60, %v2592_v26  ;;  %v5228_v33 = vor.u32 %v2668_v5, %v2667_v18  ;;  %v6013_v39 = vand.u32 2147483647, %v4983_v52  ;;  %v2782_v56 = vor.u32 %v2781_v1, %v2780_v36 }
 0x2eb   :  { %v5232_v53 = vor.u32 %v2671_v57, %v2670_v51  ;;  %v2675_v34 = vor.u32 %v2674_v32, %v2673_v0  ;;  %v2785_v41 = vor.u32 %v2784_v50, %v2783_v46  ;;  %vm2789_vm9 = vcmp.lt.s32.totalorder %v5211_v12, 4 }
 0x2ec   :  { %v2761_v25 = vand.u32 8388607, %v6013_v39  ;;  %v2658_v2 = vor.u32 8388608, %v2657_v54  ;;  %vm2682_vm10 = vcmp.lt.s32.totalorder %v5194_v14, 1  ;;  %vm2684_vm11 = vcmp.lt.s32.totalorder %v5194_v14, 3 }
 0x2ed   :  { %v2691_v6 = vsel %vm2685_vm8, %v2678_v48, 920167782  ;;  %v2695_v5 = vsel %vm2685_vm8, %v2681_v15, 1326507024  ;;  %v5241_v18 = vor.u32 %v2772_v45, %v2771_v35  ;;  %v5243_v1 = vor.u32 %v2775_v31, %v2774_v22 }
 0x2ee   :  { %v2779_v51 = vor.u32 %v2778_v8, %v2777_v44  ;;  %v2762_v0 = vor.u32 8388608, %v2761_v25  ;;  %vm2786_vm15 = vcmp.lt.s32.totalorder %v5211_v12, 1  ;;  %vm2788_vm2 = vcmp.lt.s32.totalorder %v5211_v12, 3 }
 0x2ef   :  { %v2795_v50 = vsel %vm2789_vm9, %v2782_v56, 920167782  ;;  %vm2683_vm3 = vcmp.lt.s32.totalorder %v5194_v14, 2  ;;  %v2690_v46 = vsel %vm2682_vm10, %v5228_v33, %v5232_v53  ;;  %v2692_v22 = vsel %vm2684_vm11, %v2675_v34, %v2691_v6 }
 0x2f0   :  { %v2799_v35 = vsel %vm2789_vm9, %v2785_v41, 1326507024  ;;  %v5259_v45 = vmul.u32.u64.low %v5143_v9, %v2593_v27  ;;  %v5260_v57 = vmul.u32.u64.high %v5143_v9, %v2593_v27, %v5259_v45  ;;  %v2694_v29 = vsel %vm2682_vm10, %v5232_v53, %v2675_v34 }
 0x2f1   :  { %v2696_v26 = vsel %vm2684_vm11, %v2678_v48, %v2695_v5  ;;  %v5267_v54 = vshll.u32 %v2658_v2, 8  ;;  %vm2787_vm4 = vcmp.lt.s32.totalorder %v5211_v12, 2  ;;  %v2794_v41 = vsel %vm2786_vm15, %v5241_v18, %v5243_v1  ;;  %v6018_v45 = vld [vmem:[#allocation61_spill] sm:$0xff] }
 0x2f2   :  { %v2796_v60 = vsel %vm2788_vm2, %v2779_v51, %v2795_v50  ;;  %v2479_v19 = vsel %vm2477_vm12, %v5056_v43, 2102212464  ;;  %v2693_v32 = vsel %vm2683_vm3, %v2690_v46, %v2692_v22  ;;  %v2798_v2 = vsel %vm2786_vm15, %v5243_v1, %v2779_v51 }
 0x2f3   :  { %v2800_v48 = vsel %vm2788_vm2, %v2782_v56, %v2799_v35  ;;  %v5288_v36 = vmul.u32.u64.low %v5115_v49, %v5163_v61  ;;  %v5289_v15 = vmul.u32.u64.high %v5115_v49, %v5163_v61, %v5288_v36  ;;  %v2697_v31 = vsel %vm2683_vm3, %v2694_v29, %v2696_v26  ;;  %v6017_v35 = vld [vmem:[#allocation52_spill] sm:$0xff]  ;;  %v6019_v29 = vld [vmem:[#allocation22_spill] sm:$0xff] }
 0x2f4   :  { %v5293_v44 = vshll.u32 %v2762_v0, 8  ;;  %vm2395_vm12 = vc.u32 %v5046_v4, %v5010_v13  ;;  %v2582_v43 = vsel %vm2578_vm5, %v5172_v38, %v5091_v21  ;;  %v2584_v56 = vsel %vm2580_vm6, %v5093_v16, %v5176_v3  ;;  %v6021_v36 = vld [vmem:[#allocation58_spill] sm:$0xff] }
 0x2f5   :  { %v2797_v61 = vsel %vm2787_vm4, %v2794_v41, %v2796_v60  ;;  %v2478_v8 = vsel %vm2474_vm13, %v5149_v37, %v5050_v62  ;;  %v5312_v27 = vmul.u32.u64.low %v5267_v54, %v2693_v32  ;;  %v5313_v39 = vmul.u32.u64.high %v5267_v54, %v2693_v32, %v5312_v27 }
 0x2f6   :  { %v2801_v21 = vsel %vm2787_vm4, %v2798_v2, %v2800_v48  ;;  %v2480_v16 = vsel %vm2476_vm14, %v5054_v20, %v2479_v19  ;;  %v2666_v38 = vshrl.u32 %v6007_v47, %v5145_v59  ;;  %v2585_v62 = vsel %vm2579_vm7, %v2582_v43, %v2584_v56 }
 0x2f7   :  { %v5324_v3 = vmul.u32.u64.low %v5267_v54, %v2697_v31  ;;  %v5325_v25 = vmul.u32.u64.high %v5267_v54, %v2697_v31, %v5324_v3  ;;  %v2687_v37 = vsel %vm2685_vm8, %v2675_v34, 2102212464  ;;  %v2604_v20 = vadd.s32 1, %v5186_v55 }
 0x2f8   :  { %v5332_v6 = vmul.u32.u64.low %v5293_v44, %v2797_v61  ;;  %v5333_v5 = vmul.u32.u64.high %v5293_v44, %v2797_v61, %v5332_v6  ;;  %v2770_v59 = vshrl.u32 %v6007_v47, %v5181_v10  ;;  %v6014_v24 = vmul.u32 %v4902_v58, %v4972_v28 }
 0x2f9   :  { %v5340_v0 = vmul.u32.u64.low %v5293_v44, %v2801_v21  ;;  %v5341_v50 = vmul.u32.u64.high %v5293_v44, %v2801_v21, %v5340_v0  ;;  %v2397_v34 = vsel %vm2395_vm12, %v5141_v63, %v5011_v30  ;;  %vm2603_vm13 = vc.u32 %v5260_v57, %v5185_v23  ;;  %v6016_v63 = vld [vmem:[#allocation20_spill] sm:$0xff] }
 0x2fa   :  { %v2294_v46 = vadd.s32 %v5130_v40, %v6014_v24  ;;  %v2791_v47 = vsel %vm2789_vm9, %v2779_v51, 2102212464  ;;  %v2481_v10 = vsel %vm2475_vm0, %v2478_v8, %v2480_v16  ;;  %v2500_v22 = vadd.s32 1, %v5154_v7 }
 0x2fb   :  { %v2686_v58 = vsel %vm2682_vm10, %v2666_v38, %v5228_v33  ;;  %v2688_v28 = vsel %vm2684_vm11, %v5232_v53, %v2687_v37  ;;  %v6015_v30 = vshll.u32 %v4925_v17, 30  ;;  %v2089_v51 = vshll.u32 %v6016_v63, 30 }
 0x2fc   :  { %vm2499_vm14 = vc.u32 %v5289_v15, %v6017_v35  ;;  %v2601_v11 = vmul.u32 %v5143_v9, %v2585_v62  ;;  %v6020_v26 = vmul.u32 %v6018_v45, %v6019_v29  ;;  %v2605_v41 = vsel %vm2603_vm13, %v2604_v20, %v5186_v55 }
 0x2fd   :  { %v5368_v40 = vsub.s32 %v4884_v42, %v6015_v30  ;;  %v2790_v53 = vsel %vm2786_vm15, %v2770_v59, %v5241_v18  ;;  %v2792_v42 = vsel %vm2788_vm2, %v5243_v1, %v2791_v47  ;;  %v2295_v60 = vadd.s32 536870912, %v2294_v46 }
 0x2fe   :  { %v2398_v33 = vadd.s32 %v2397_v34, %v6020_v26  ;;  %v2497_v19 = vmul.u32 %v5115_v49, %v2481_v10  ;;  %v2689_v9 = vsel %vm2683_vm3, %v2686_v58, %v2688_v28  ;;  %v2708_v32 = vadd.s32 1, %v5313_v39 }
 0x2ff   :  { %v2501_v2 = vsel %vm2499_vm14, %v2500_v22, %v5154_v7  ;;  %vm2707_vm0 = vc.u32 %v5325_v25, %v5312_v27  ;;  %v2196_v55 = vsub.s32 0, %v5368_v40  ;;  %v2606_v18 = vadd.s32 %v2605_v41, %v2601_v11 }
 0x300   :  { %v2793_v48 = vsel %vm2787_vm4, %v2790_v53, %v2792_v42  ;;  %v2812_v1 = vadd.s32 1, %v5333_v5  ;;  %v5396_v49 = vsub.s32 %v6021_v36, %v2089_v51  ;;  %v2399_v14 = vadd.s32 536870912, %v2398_v33 }
 0x301   :  { %v2705_v31 = vmul.u32 %v5267_v54, %v2689_v9  ;;  %vm2811_vm5 = vc.u32 %v5341_v50, %v5332_v6  ;;  %v5401_v7 = vshrl.u32 %v2295_v60, 30  ;;  %v2502_v43 = vadd.s32 %v2501_v2, %v2497_v19 }
 0x302   :  { %v2709_v56 = vsel %vm2707_vm0, %v2708_v32, %v5313_v39  ;;  %v2809_v61 = vmul.u32 %v5293_v44, %v2793_v48  ;;  %v3019_v12 = vmin.u32 %v2196_v55, %v5368_v40  ;;  %v2607_v8 = vadd.s32 536870912, %v2606_v18 }
 0x303   :  { %v2813_v21 = vsel %vm2811_vm5, %v2812_v1, %v5333_v5  ;;  %v2092_v16 = vsub.s32 0, %v5396_v49  ;;  %v5408_v38 = vshrl.u32 %v2399_v14, 30  ;;  %v2710_v54 = vadd.s32 %v2709_v56, %v2705_v31  ;;  %v6022_v14 = vld [vmem:[#allocation59_spill] sm:$0xff] }
 0x304   :  { %v2297_v3 = vshll.u32 %v5401_v7, 30  ;;  %v2503_v62 = vadd.s32 536870912, %v2502_v43  ;;  %v2814_v37 = vadd.s32 %v2813_v21, %v2809_v61  ;;  %v2198_v20 = vclz %v3019_v12  ;;  %v6023_v31 = vld [vmem:[#allocation15_spill] sm:$0xff] }
 0x305   :  { %v5411_v59 = vshrl.u32 %v2607_v8, 30  ;;  %v3015_v39 = vmin.u32 %v2092_v16, %v5396_v49  ;;  %v2401_v44 = vshll.u32 %v5408_v38, 30  ;;  %v2711_v0 = vadd.s32 536870912, %v2710_v54 }
 0x306   :  { %v5415_v24 = vsub.s32 %v2294_v46, %v2297_v3  ;;  %v5417_v5 = vshrl.u32 %v2503_v62, 30  ;;  %v2815_v34 = vadd.s32 536870912, %v2814_v37  ;;  %v3020_v47 = vadd.s32 4294967294, %v2198_v20 }
 0x307   :  { %v2609_v10 = vshll.u32 %v5411_v59, 30  ;;  %v2094_v22 = vclz %v3015_v39  ;;  %v5420_v58 = vsub.s32 %v2398_v33, %v2401_v44  ;;  %v5422_v28 = vshrl.u32 %v2711_v0, 30 }
 0x308   :  { %v2300_v30 = vsub.s32 0, %v5415_v24  ;;  %v2505_v51 = vshll.u32 %v5417_v5, 30  ;;  %v5426_v11 = vshrl.u32 %v2815_v34, 30  ;;  %vm3021_vm6 = vcmp.lt.s32.totalorder %v3020_v47, 0 }
 0x309   :  { %v5428_v46 = vsub.s32 %v2606_v18, %v2609_v10  ;;  %v3016_v45 = vadd.s32 4294967294, %v2094_v22  ;;  %v2404_v29 = vsub.s32 0, %v5420_v58  ;;  %v2713_v26 = vshll.u32 %v5422_v28, 30 }
 0x30a   :  { %v3023_v41 = vmin.u32 %v2300_v30, %v5415_v24  ;;  %v5433_v33 = vsub.s32 %v2502_v43, %v2505_v51  ;;  %v2201_v53 = vsel %vm3021_vm6, 0, %v3020_v47  ;;  %v2817_v42 = vshll.u32 %v5426_v11, 30 }
 0x30b   :  { %v2612_v60 = vsub.s32 0, %v5428_v46  ;;  %vm3017_vm7 = vcmp.lt.s32.totalorder %v3016_v45, 0  ;;  %v3027_v19 = vmin.u32 %v2404_v29, %v5420_v58  ;;  %v5438_v9 = vsub.s32 %v2710_v54, %v2713_v26  ;;  %v6024_v54 = vld [vmem:[#allocation56_spill] sm:$0xff]  ;;  %v6029_v29 = vld [vmem:[#allocation57_spill] sm:$0xff] }
 0x30c   :  { %v2206_v32 = vsub.s32 4294967266, %v2201_v53  ;;  %v2302_v2 = vclz %v3023_v41  ;;  %v2508_v55 = vsub.s32 0, %v5433_v33  ;;  %v5441_v18 = vsub.s32 %v2814_v37, %v2817_v42 }
 0x30d   :  { %v2216_v48 = vsub.s32 4, %v4925_v17  ;;  %v2097_v1 = vsel %vm3017_vm7, 0, %v3016_v45  ;;  %v3035_v36 = vmin.u32 %v2612_v60, %v5428_v46  ;;  %v2186_v43 = vadd.s32 %v6023_v31, %v6022_v14  ;;  %v6028_v45 = vld [vmem:[#allocation60_spill] sm:$0xff]  ;;  %v6032_v14 = vld [vmem:[#allocation18_spill] sm:$0xff] }
 0x30e   :  { %v2406_v56 = vclz %v3027_v19  ;;  %v2716_v61 = vsub.s32 0, %v5438_v9  ;;  %v2202_v12 = vsub.s32 32, %v2201_v53  ;;  %v2207_v8 = vadd.s32 127, %v2206_v32 }
 0x30f   :  { %v3024_v21 = vadd.s32 4294967294, %v2302_v2  ;;  %v3031_v16 = vmin.u32 %v2508_v55, %v5433_v33  ;;  %vm2132_vm8 = vcmp.lt.s32.totalorder %v6024_v54, 0  ;;  %v2102_v3 = vsub.s32 4294967266, %v2097_v1 }
 0x310   :  { %v2820_v62 = vsub.s32 0, %v5441_v18  ;;  %v6025_v37 = vand.u32 2147483647, %v6024_v54  ;;  %v2217_v39 = vsel %vm2132_vm8, %v2216_v48, %v4925_v17  ;;  %v2614_v44 = vclz %v3035_v36  ;;  %v6031_v36 = vld [vmem:[#allocation21_spill] sm:$0xff] }
 0x311   :  { %v2203_v0 = vshll.u32 %v5368_v40, %v2201_v53  ;;  %v2112_v34 = vsub.s32 4, %v6016_v63  ;;  %v3028_v47 = vadd.s32 4294967294, %v2406_v56  ;;  %v3039_v10 = vmin.u32 %v2716_v61, %v5438_v9  ;;  %v6030_v40 = vld [vmem:[#allocation14_spill] sm:$0xff] }
 0x312   :  { %vm5453_vm9 = vcmp.le.f32.partialorder %v6025_v37, 0.7853982  ;;  %v2204_v22 = vshrl.u32 %v2186_v43, %v2202_v12  ;;  %v2208_v30 = vshll.u32 %v2207_v8, 23  ;;  %vm3025_vm10 = vcmp.lt.s32.totalorder %v3024_v21, 0 }
 0x313   :  { %v2510_v51 = vclz %v3031_v16  ;;  %v2082_v26 = vadd.s32 %v6029_v29, %v6028_v45  ;;  %v2098_v41 = vsub.s32 32, %v2097_v1  ;;  %v2103_v42 = vadd.s32 127, %v2102_v3 }
 0x314   :  { %v3043_v60 = vmin.u32 %v2820_v62, %v5441_v18  ;;  %v2219_v17 = vsel %vm5453_vm9, 0, %v2217_v39  ;;  %vm2028_vm11 = vcmp.lt.s32.totalorder %v6030_v40, 0  ;;  %v3036_v53 = vadd.s32 4294967294, %v2614_v44 }
 0x315   :  { %v2113_v19 = vsel %vm2028_vm11, %v2112_v34, %v6016_v63  ;;  %v2305_v32 = vsel %vm3025_vm10, 0, %v3024_v21  ;;  %vm3029_vm15 = vcmp.lt.s32.totalorder %v3028_v47, 0  ;;  %v2718_v2 = vclz %v3039_v10 }
 0x316   :  { %v2205_v55 = vor.u32 %v2204_v22, %v2203_v0  ;;  %v2209_v48 = vor.u32 4788187, %v2208_v30  ;;  %v2290_v31 = vadd.s32 %v6032_v14, %v6031_v36  ;;  %v3032_v43 = vadd.s32 4294967294, %v2510_v51 }
 0x317   :  { %v2099_v56 = vshll.u32 %v5396_v49, %v2097_v1  ;;  %v2100_v61 = vshrl.u32 %v2082_v26, %v2098_v41  ;;  %v2104_v12 = vshll.u32 %v2103_v42, 23  ;;  %v2822_v8 = vclz %v3043_v60 }
 0x318   :  { %v2306_v16 = vsub.s32 32, %v2305_v32  ;;  %v2310_v3 = vsub.s32 4294967266, %v2305_v32  ;;  %v2409_v62 = vsel %vm3029_vm15, 0, %v3028_v47  ;;  %vm3037_vm2 = vcmp.lt.s32.totalorder %v3036_v53, 0 }
 0x319   :  { %v2223_v37 = vadd.s32 3, %v2219_v17  ;;  %v6033_v63 = vand.u32 2147483647, %v6030_v40  ;;  %v3040_v39 = vadd.s32 4294967294, %v2718_v2  ;;  %v2210_v44 = vand.u32 2147483647, %v2209_v48 }
 0x31a   :  { %v2212_v0 = vcvt.s32.f32 %v2205_v55  ;;  %vm3033_vm4 = vcmp.lt.s32.totalorder %v3032_v43, 0  ;;  %v2101_v1 = vor.u32 %v2100_v61, %v2099_v56  ;;  %v2414_v34 = vsub.s32 4294967266, %v2409_v62 }
 0x31b   :  { %vm5477_vm3 = vcmp.le.f32.partialorder %v6033_v63, 0.7853982  ;;  %v5483_v10 = vsel %vm3037_vm2, 0, %v3036_v53  ;;  %v3044_v47 = vadd.s32 4294967294, %v2822_v8  ;;  %v2105_v22 = vor.u32 4788187, %v2104_v12 }
 0x31c   :  { %v2115_v49 = vsel %vm5477_vm3, 0, %v2113_v19  ;;  %v2307_v30 = vshll.u32 %v5415_v24, %v2305_v32  ;;  %v2308_v51 = vshrl.u32 %v2290_v31, %v2306_v16  ;;  %v2311_v45 = vadd.s32 127, %v2310_v3 }
 0x31d   :  { %v2394_v29 = vadd.s32 %v5010_v13, %v5046_v4  ;;  %v2410_v26 = vsub.s32 32, %v2409_v62  ;;  %v5488_v41 = vsel %vm3033_vm4, 0, %v3032_v43  ;;  %vm3041_vm12 = vcmp.lt.s32.totalorder %v3040_v39, 0  ;;  %v6036_v4 = vld [vmem:[#allocation55_spill] sm:$0xff] }
 0x31e   :  { %v5490_v42 = vand.u32 3, %v2223_v37  ;;  %v2622_v60 = vsub.s32 4294967266, %v5483_v10  ;;  %v2213_v17 = vmul.f32 %v2212_v0, %v2210_v44  ;;  %v2119_v53 = vadd.s32 3, %v2115_v49 }
 0x31f   :  { %v2415_v19 = vadd.s32 127, %v2414_v34  ;;  %vm3045_vm13 = vcmp.lt.s32.totalorder %v3044_v47, 0  ;;  %v2108_v2 = vcvt.s32.f32 %v2101_v1  ;;  %v2312_v55 = vshll.u32 %v2311_v45, 23 }
 0x320   :  { %v2518_v24 = vsub.s32 4294967266, %v5488_v41  ;;  %v5494_v32 = vsel %vm3041_vm12, 0, %v3040_v39  ;;  %v2106_v48 = vand.u32 2147483647, %v2105_v22  ;;  %vm2236_vm14 = vcmp.lt.s32.totalorder %v6036_v4, 0 }
 0x321   :  { %v2309_v13 = vor.u32 %v2308_v51, %v2307_v30  ;;  %v2411_v36 = vshll.u32 %v5420_v58, %v2409_v62  ;;  %v2412_v14 = vshrl.u32 %v2394_v29, %v2410_v26  ;;  %v2602_v31 = vadd.s32 %v5185_v23, %v5260_v57  ;;  %v6040_v29 = vld [vmem:[#allocation13_spill] sm:$0xff] }
 0x322   :  { %v2618_v43 = vsub.s32 32, %v5483_v10  ;;  %v2623_v56 = vadd.s32 127, %v2622_v60  ;;  %v5501_v61 = vsel %vm3045_vm13, 0, %v3044_v47  ;;  %v2214_v12 = vxor.u32 2147483648, %v2213_v17 }
 0x323   :  { %v5503_v8 = vand.u32 3, %v2119_v53  ;;  %v2416_v16 = vshll.u32 %v2415_v19, 23  ;;  %v2726_v3 = vsub.s32 4294967266, %v5494_v32  ;;  %v2313_v37 = vor.u32 4788187, %v2312_v55 }
 0x324   :  { %v2498_v63 = vadd.s32 %v6017_v35, %v5289_v15  ;;  %v2514_v58 = vsub.s32 32, %v5488_v41  ;;  %v2519_v62 = vadd.s32 127, %v2518_v24  ;;  %v2109_v39 = vmul.f32 %v2108_v2, %v2106_v48 }
 0x325   :  { %v2316_v23 = vcvt.s32.f32 %v2309_v13  ;;  %v2320_v57 = vsub.s32 4, %v5401_v7  ;;  %v2830_v44 = vsub.s32 4294967266, %v5501_v61  ;;  %v6037_v0 = vand.u32 2147483647, %v6036_v4 }
 0x326   :  { %v2413_v1 = vor.u32 %v2412_v14, %v2411_v36  ;;  %v2619_v34 = vshll.u32 %v5428_v46, %v5483_v10  ;;  %v2620_v15 = vshrl.u32 %v2602_v31, %v2618_v43  ;;  %v2624_v35 = vshll.u32 %v2623_v56, 23  ;;  %v6041_v10 = vld [vmem:[#allocation16_spill] sm:$0xff] }
 0x327   :  { %vm5513_vm0 = vcmp.le.f32.partialorder %v6037_v0, 0.7853982  ;;  %v2417_v47 = vor.u32 4788187, %v2416_v16  ;;  %v2706_v22 = vadd.s32 %v5312_v27, %v5325_v25  ;;  %v2722_v30 = vsub.s32 32, %v5494_v32 }
 0x328   :  { %v2727_v51 = vadd.s32 127, %v2726_v3  ;;  %v2314_v45 = vand.u32 2147483647, %v2313_v37  ;;  %vm2340_vm5 = vcmp.lt.s32.totalorder %v6040_v29, 0  ;;  %v2515_v26 = vshll.u32 %v5433_v33, %v5488_v41 }
 0x329   :  { %v2516_v60 = vshrl.u32 %v2498_v63, %v2514_v58  ;;  %v2520_v53 = vshll.u32 %v2519_v62, 23  ;;  %v2215_v46 = vsel %vm2132_vm8, %v2214_v12, %v2213_v17  ;;  %vm2444_vm6 = vcmp.lt.s32.totalorder %v6041_v10, 0 }
 0x32a   :  { %v2810_v19 = vadd.s32 %v5332_v6, %v5341_v50  ;;  %v2826_v27 = vsub.s32 32, %v5501_v61  ;;  %v2831_v25 = vadd.s32 127, %v2830_v44  ;;  %v2321_v2 = vsel %vm2236_vm14, %v2320_v57, %v5401_v7 }
 0x32b   :  { %v2420_v55 = vcvt.s32.f32 %v2413_v1  ;;  %v2621_v24 = vor.u32 %v2620_v15, %v2619_v34  ;;  %v2625_v33 = vor.u32 4788187, %v2624_v35  ;;  %v6042_v41 = vand.u32 2147483647, %v6040_v29  ;;  %v5559_v1 = vpop.xlane.xlu0 %469 }
 0x32c   :  { %v2418_v17 = vand.u32 2147483647, %v2417_v47  ;;  %v2723_v6 = vshll.u32 %v5438_v9, %v5494_v32  ;;  %v2724_v50 = vshrl.u32 %v2706_v22, %v2722_v30  ;;  %v2728_v13 = vshll.u32 %v2727_v51, 23  ;;  %v5551_v9 = vpop.xlane.xlu1 %472 }
 0x32d   :  { %vm5536_vm7 = vcmp.le.f32.partialorder %v6042_v41, 0.7853982  ;;  %v2110_v36 = vxor.u32 2147483648, %v2109_v39  ;;  %v2317_v14 = vmul.f32 %v2316_v23, %v2314_v45  ;;  %v6045_v31 = vand.u32 2147483647, %v6041_v10 }
 0x32e   :  { %v2517_v43 = vor.u32 %v2516_v60, %v2515_v26  ;;  %v2521_v56 = vor.u32 4788187, %v2520_v53  ;;  %v2424_v12 = vsub.s32 4, %v5408_v38  ;;  %v2827_v16 = vshll.u32 %v5441_v18, %v5501_v61 }
 0x32f   :  { %vm5544_vm8 = vcmp.le.f32.partialorder %v6045_v31, 0.7853982  ;;  %v2828_v3 = vshrl.u32 %v2810_v19, %v2826_v27  ;;  %v2832_v37 = vshll.u32 %v2831_v25, 23  ;;  %v2218_v32 = vsel %vm5453_vm9, %v6024_v54, %v2215_v46 }
 0x330   :  { %v2528_v63 = vsub.s32 4, %v5417_v5  ;;  %v2626_v58 = vand.u32 2147483647, %v2625_v33  ;;  %v2628_v62 = vcvt.s32.f32 %v2621_v24  ;;  %v2323_v23 = vsel %vm5513_vm0, 0, %v2321_v2  ;;  %v5572_v53 = vpop.xlane.xlu1 %478  ;;  %v6048_v33 = vld [vmem:[#allocation17_spill] sm:$0xff] }
 0x331   :  { %v2421_v57 = vmul.f32 %v2420_v55, %v2418_v17  ;;  %v2725_v44 = vor.u32 %v2724_v50, %v2723_v6  ;;  %v2729_v0 = vor.u32 4788187, %v2728_v13  ;;  %v2111_v18 = vsel %vm2028_vm11, %v2110_v36, %v2109_v39  ;;  %v476_v55 = vpop.xlane.xlu0 %475 }
 0x332   :  { %v2318_v61 = vxor.u32 2147483648, %v2317_v14  ;;  %v2522_v34 = vand.u32 2147483647, %v2521_v56  ;;  %v2524_v15 = vcvt.s32.f32 %v2517_v43  ;;  %3590 = vcosq.f32 %v2218_v32  ;;  %v6049_v43 = vld [vmem:[#allocation19_spill] sm:$0xff] }
 0x333   :  { %v2425_v20 = vsel %vm2340_vm5, %v2424_v12, %v5408_v38  ;;  %v2829_v35 = vor.u32 %v2828_v3, %v2827_v16  ;;  %v2833_v47 = vor.u32 4788187, %v2832_v37  ;;  %3592 = vsinq.f32 %v2218_v32 }
 0x334   :  { %v2327_v22 = vadd.s32 3, %v2323_v23  ;;  %v2529_v30 = vsel %vm2444_vm6, %v2528_v63, %v5417_v5  ;;  %v2629_v51 = vmul.f32 %v2628_v62, %v2626_v58  ;;  %v2114_v39 = vsel %vm5477_vm3, %v6030_v40, %v2111_v18  ;;  %v485_v3 = vpop.xlane.xlu1 %484 }
 0x335   :  { %v2422_v45 = vxor.u32 2147483648, %v2421_v57  ;;  %v2730_v26 = vand.u32 2147483647, %v2729_v0  ;;  %v2732_v60 = vcvt.s32.f32 %v2725_v44  ;;  %v2319_v38 = vsel %vm2236_vm14, %v2318_v61, %v2317_v14 }
 0x336   :  { %v2427_v46 = vsel %vm5536_vm7, 0, %v2425_v20  ;;  %v2525_v19 = vmul.f32 %v2524_v15, %v2522_v34  ;;  %v2632_v27 = vsub.s32 4, %v5411_v59  ;;  %v2531_v5 = vsel %vm5544_vm8, 0, %v2529_v30 }
 0x337   :  { %v2736_v21 = vsub.s32 4, %v5422_v28  ;;  %v2834_v25 = vand.u32 2147483647, %v2833_v47  ;;  %v2836_v2 = vcvt.s32.f32 %v2829_v35  ;;  %3594 = vcosq.f32 %v2114_v39 }
 0x338   :  { %v5582_v24 = vand.u32 3, %v2327_v22  ;;  %vm2548_vm9 = vcmp.lt.s32.totalorder %v6048_v33, 0  ;;  %v2630_v41 = vxor.u32 2147483648, %v2629_v51  ;;  %v2322_v17 = vsel %vm5513_vm0, %v6036_v4, %v2319_v38 }
 0x339   :  { %v2423_v6 = vsel %vm2340_vm5, %v2422_v45, %v2421_v57  ;;  %v2431_v50 = vadd.s32 3, %v2427_v46  ;;  %v2733_v13 = vmul.f32 %v2732_v60, %v2730_v26  ;;  %v2526_v36 = vxor.u32 2147483648, %v2525_v19  ;;  %v482_v57 = vpop.xlane.xlu0 %481  ;;  %v2933_v26 = vld [vmem:[%s5841_s1 + $0x9] ss:$0 sm:$0xff]  ;;  %v491_v60 = vpop.xlane.xlu1 %490 }
 0x33a   :  { %v2535_v14 = vadd.s32 3, %v2531_v5  ;;  %v2633_v31 = vsel %vm2548_vm9, %v2632_v27, %v5411_v59  ;;  %vm2652_vm10 = vcmp.lt.s32.totalorder %v6049_v43, 0  ;;  %3596 = vsinq.f32 %v2114_v39 }
 0x33b   :  { %v6050_v56 = vand.u32 2147483647, %v6048_v33  ;;  %v2737_v49 = vsel %vm2652_vm10, %v2736_v21, %v5422_v28  ;;  %v2837_v16 = vmul.f32 %v2836_v2, %v2834_v25  ;;  %3598 = vcosq.f32 %v2322_v17 }
 0x33c   :  { %v2426_v59 = vsel %vm5536_vm7, %v6040_v29, %v2423_v6  ;;  %v2631_v37 = vsel %vm2548_vm9, %v2630_v41, %v2629_v51  ;;  %v2840_v32 = vsub.s32 4, %v5426_v11  ;;  %v5609_v63 = vpop.eup %3590  ;;  %v5611_v58 = vand.u32 3, %v2431_v50 }
 0x33d   :  { %vm5596_vm11 = vcmp.le.f32.partialorder %v6050_v56, 0.7853982  ;;  %v6053_v28 = vand.u32 2147483647, %v6049_v43  ;;  %v2734_v48 = vxor.u32 2147483648, %v2733_v13  ;;  %v5621_v44 = vpop.eup %3592  ;;  %3600 = vsinq.f32 %v2322_v17  ;;  %v488_v21 = vpop.xlane.xlu0 %487  ;;  %v6060_v17 = vld [vmem:[#allocation6_spill] sm:$0xff] }
 0x33e   :  { %v2635_v62 = vsel %vm5596_vm11, 0, %v2633_v31  ;;  %v2527_v0 = vsel %vm2444_vm6, %v2526_v36, %v2525_v19  ;;  %v5625_v18 = vand.u32 3, %v2535_v14  ;;  %3602 = vcosq.f32 %v2426_v59  ;;  %v6059_v19 = vld [vmem:[#allocation5_spill] sm:$0xff]  ;;  %v6061_v56 = vld [vmem:[#allocation7_spill] sm:$0xff] }
 0x33f   :  { %vm5617_vm15 = vcmp.le.f32.partialorder %v6053_v28, 0.7853982  ;;  %v2634_v34 = vsel %vm5596_vm11, %v6048_v33, %v2631_v37  ;;  %vm2756_vm2 = vcmp.lt.s32.totalorder %v4983_v52, 0  ;;  %v2838_v15 = vxor.u32 2147483648, %v2837_v16  ;;  %v6064_v28 = vld [vmem:[#allocation10_spill] sm:$0xff] }
 0x340   :  { %v2739_v61 = vsel %vm5617_vm15, 0, %v2737_v49  ;;  %3604 = vsinq.f32 %v2426_v59  ;;  %v2639_v20 = vadd.s32 3, %v2635_v62  ;;  %v6056_v35 = vand.u32 2147483647, %v4983_v52  ;;  %v6062_v49 = vld [vmem:[#allocation8_spill] sm:$0xff]  ;;  %v6063_v59 = vld [vmem:[#allocation9_spill] sm:$0xff] }
 0x341   :  { %v2841_v22 = vsel %vm2756_vm2, %v2840_v32, %v5426_v11  ;;  %v2530_v30 = vsel %vm5544_vm8, %v6041_v10, %v2527_v0  ;;  %v2735_v51 = vsel %vm2652_vm10, %v2734_v48, %v2733_v13  ;;  %v2743_v39 = vadd.s32 3, %v2739_v61  ;;  %v5651_v38 = vpop.eup %3594  ;;  %v6065_v48 = vld [vmem:[#allocation11_spill] sm:$0xff]  ;;  %v6066_v0 = vld [vmem:[#allocation12_spill] sm:$0xff] }
 0x342   :  { %vm5635_vm3 = vcmp.le.f32.partialorder %v6056_v35, 0.7853982  ;;  %v1881_v45 = vmul.f32 0.03125, %v5559_v1  ;;  %3606 = vcosq.f32 %v2634_v34  ;;  %v1882_v11 = vmul.f32 0.03125, %v5551_v9 }
 0x343   :  { %v1883_v46 = vmul.f32 0.03125, %v476_v55  ;;  %v5655_v7 = vadd.f32 %v6059_v19, %v2933_v26  ;;  %3608 = vsinq.f32 %v2634_v34  ;;  %v2839_v27 = vsel %vm2756_vm2, %v2838_v15, %v2837_v16 }
 0x344   :  { %v2843_v1 = vsel %vm5635_vm3, 0, %v2841_v22  ;;  %v1884_v5 = vmul.f32 0.03125, %v5572_v53  ;;  %3610 = vcosq.f32 %v2530_v30  ;;  %v5662_v25 = vand.u32 3, %v2639_v20  ;;  %v5667_v55 = vpop.eup %3596 }
 0x345   :  { %v2738_v9 = vsel %vm5617_vm15, %v6049_v43, %v2735_v51  ;;  %v1888_v2 = vmul.f32 0.03125, %v491_v60  ;;  %3612 = vsinq.f32 %v2530_v30  ;;  %v5669_v41 = vand.u32 3, %v2743_v39  ;;  %v5674_v13 = vpop.eup %3598 }
 0x346   :  { %v5672_v6 = vadd.f32 %v2933_v26, %v6060_v17  ;;  %v1885_v50 = vmul.f32 0.03125, %v482_v57  ;;  %v2842_v53 = vsel %vm5635_vm3, %v4983_v52, %v2839_v27  ;;  %v2847_v36 = vadd.s32 3, %v2843_v1 }
 0x347   :  { %v1886_v14 = vmul.f32 0.03125, %v485_v3  ;;  %v1887_v31 = vmul.f32 0.03125, %v488_v21  ;;  %3614 = vcosq.f32 %v2738_v9  ;;  %v5680_v12 = vadd.f32 %v6061_v56, %v2933_v26  ;;  %v3601_v32 = vpop.eup %3600 }
 0x348   :  { %v5683_v16 = vadd.f32 %v2933_v26, %v6062_v49  ;;  %v5686_v37 = vadd.f32 %v6063_v59, %v2933_v26  ;;  %3616 = vsinq.f32 %v2738_v9  ;;  %v5688_v62 = vmul.f32 %v2933_v26, %v1888_v2  ;;  %v3603_v57 = vpop.eup %3602 }
 0x349   :  { %v5691_v23 = vadd.f32 %v2933_v26, %v6064_v28  ;;  %v5694_v3 = vadd.f32 %v6065_v48, %v2933_v26  ;;  %3618 = vcosq.f32 %v2842_v53  ;;  %v5697_v61 = vadd.f32 %v2933_v26, %v6066_v0 }
 0x34a   :  { %v2227_v34 = vxor.u32 2147483648, %v5621_v44  ;;  %v2230_v15 = vxor.u32 2147483648, %v5609_v63  ;;  %v3605_v20 = vpop.eup %3604  ;;  %3620 = vsinq.f32 %v2842_v53  ;;  %v5701_v35 = vand.u32 3, %v2847_v36 }
 0x34b   :  { %vm2226_vm4 = vcmp.eq.s32.totalorder %v5490_v42, 0  ;;  %vm2229_vm12 = vcmp.eq.s32.totalorder %v5490_v42, 2  ;;  %v1890_v47 = vmul.f32 %v2933_v26, %v1882_v11  ;;  %v5705_v22 = vmul.f32 %v2933_v26, %v1881_v45 }
 0x34c   :  { %v5707_v30 = vmul.f32 %v2933_v26, %v1884_v5  ;;  %v5709_v51 = vmul.f32 %v2933_v26, %v1883_v46  ;;  %v3607_v39 = vpop.eup %3606  ;;  %vm2225_vm13 = vcmp.lt.s32.totalorder %v5490_v42, 2  ;;  %v5712_v60 = vmul.f32 %v2933_v26, %v1886_v14 }
 0x34d   :  { %v5714_v19 = vmul.f32 %v2933_v26, %v1885_v50  ;;  %v5716_v27 = vmul.f32 %v2933_v26, %v1887_v31  ;;  %v3609_v1 = vpop.eup %3608  ;;  %v2228_v21 = vsel %vm2226_vm4, %v5609_v63, %v2227_v34  ;;  %v2231_v11 = vsel %vm2229_vm12, %v2230_v15, %v5621_v44 }
 0x34e   :  { %vm2122_vm14 = vcmp.eq.s32.totalorder %v5503_v8, 0  ;;  %v2123_v45 = vxor.u32 2147483648, %v5667_v55  ;;  %v3611_v46 = vpop.eup %3610  ;;  %vm2125_vm0 = vcmp.eq.s32.totalorder %v5503_v8, 2  ;;  %v2126_v5 = vxor.u32 2147483648, %v5651_v38 }
 0x34f   :  { %v2435_v9 = vxor.u32 2147483648, %v3605_v20  ;;  %v2438_v2 = vxor.u32 2147483648, %v3603_v57  ;;  %v3613_v17 = vpop.eup %3612  ;;  %vm2434_vm5 = vcmp.eq.s32.totalorder %v5611_v58, 0  ;;  %vm2437_vm6 = vcmp.eq.s32.totalorder %v5611_v58, 2 }
 0x350   :  { %v2331_v26 = vxor.u32 2147483648, %v3601_v32  ;;  %v2334_v63 = vxor.u32 2147483648, %v5674_v13  ;;  %vm2330_vm7 = vcmp.eq.s32.totalorder %v5582_v24, 0  ;;  %vm2333_vm8 = vcmp.eq.s32.totalorder %v5582_v24, 2 }
 0x351   :  { %v2643_v44 = vxor.u32 2147483648, %v3609_v1  ;;  %v2646_v50 = vxor.u32 2147483648, %v3607_v39  ;;  %v5729_v53 = vpop.eup %3614  ;;  %vm2121_vm9 = vcmp.lt.s32.totalorder %v5503_v8, 2  ;;  %v2124_v36 = vsel %vm2122_vm14, %v5651_v38, %v2123_v45 }
 0x352   :  { %vm2642_vm10 = vcmp.eq.s32.totalorder %v5662_v25, 0  ;;  %vm2645_vm11 = vcmp.eq.s32.totalorder %v5662_v25, 2  ;;  %v5737_v14 = vpop.eup %3616  ;;  %v2127_v31 = vsel %vm2125_vm0, %v2126_v5, %v5667_v55  ;;  %vm2433_vm15 = vcmp.lt.s32.totalorder %v5611_v58, 2 }
 0x353   :  { %v2436_v56 = vsel %vm2434_vm5, %v3603_v57, %v2435_v9  ;;  %v2439_v49 = vsel %vm2437_vm6, %v2438_v2, %v3605_v20  ;;  %v5747_v59 = vpop.eup %3618  ;;  %vm2222_vm2 = vweird.f32 %v6024_v54  ;;  %vm2329_vm3 = vcmp.lt.s32.totalorder %v5582_v24, 2 }
 0x354   :  { %v2332_v38 = vsel %vm2330_vm7, %v5674_v13, %v2331_v26  ;;  %v2335_v55 = vsel %vm2333_vm8, %v2334_v63, %v3601_v32  ;;  %v3621_v28 = vpop.eup %3620  ;;  %v2232_v48 = vsel %vm2225_vm13, %v2228_v21, %v2231_v11  ;;  %vm2641_vm4 = vcmp.lt.s32.totalorder %v5662_v25, 2 }
 0x355   :  { %v2644_v57 = vsel %vm2642_vm10, %v3607_v39, %v2643_v44  ;;  %v2647_v0 = vsel %vm2645_vm11, %v2646_v50, %v3609_v1  ;;  %vm2118_vm12 = vweird.f32 %v6030_v40  ;;  %v2128_v34 = vsel %vm2121_vm9, %v2124_v36, %v2127_v31 }
 0x356   :  { %vm2430_vm14 = vweird.f32 %v6040_v29  ;;  %v2440_v13 = vsel %vm2433_vm15, %v2436_v56, %v2439_v49  ;;  %vm2326_vm0 = vweird.f32 %v6036_v4  ;;  %v2336_v24 = vsel %vm2329_vm3, %v2332_v38, %v2335_v55 }
 0x357   :  { %v2539_v32 = vxor.u32 2147483648, %v3613_v17  ;;  %v2542_v42 = vxor.u32 2147483648, %v3611_v46  ;;  %vm2638_vm13 = vweird.f32 %v6048_v33  ;;  %v2648_v25 = vsel %vm2641_vm4, %v2644_v57, %v2647_v0 }
 0x358   :  { %vm2538_vm5 = vcmp.eq.s32.totalorder %v5625_v18, 0  ;;  %vm2541_vm6 = vcmp.eq.s32.totalorder %v5625_v18, 2  ;;  %v2233_v29 = vsel %vm2222_vm2, nan, %v2232_v48  ;;  %v2129_v58 = vsel %vm2118_vm12, nan, %v2128_v34 }
 0x359   :  { %v2441_v4 = vsel %vm2430_vm14, nan, %v2440_v13  ;;  %v2337_v1 = vsel %vm2326_vm0, nan, %v2336_v24  ;;  %vm2534_vm7 = vweird.f32 %v6041_v10  ;;  %vm2537_vm8 = vcmp.lt.s32.totalorder %v5625_v18, 2 }
 0x35a   :  { %v2649_v21 = vsel %vm2638_vm13, nan, %v2648_v25  ;;  %v2540_v11 = vsel %vm2538_vm5, %v3611_v46, %v2539_v32  ;;  %vm2846_vm9 = vweird.f32 %v4983_v52  ;;  %vm2849_vm10 = vcmp.lt.s32.totalorder %v5701_v35, 2 }
 0x35b   :  { %vm2850_vm11 = vcmp.eq.s32.totalorder %v5701_v35, 0  ;;  %v2851_v40 = vxor.u32 2147483648, %v3621_v28  ;;  %vm2853_vm15 = vcmp.eq.s32.totalorder %v5701_v35, 2  ;;  %vm2746_vm2 = vcmp.eq.s32.totalorder %v5669_v41, 0 }
 0x35c   :  { %v2747_v63 = vxor.u32 2147483648, %v5737_v14  ;;  %vm2749_vm3 = vcmp.eq.s32.totalorder %v5669_v41, 2  ;;  %vm2745_vm4 = vcmp.lt.s32.totalorder %v5669_v41, 2  ;;  %vm2742_vm12 = vweird.f32 %v6049_v43 }
 0x35e   :  { %v2748_v57 = vsel %vm2746_vm2, %v5729_v53, %v2747_v63 }
 0x374   :  { %v3320_v15 = vpop.f32.mrb[34].mxu1 }
 0x375   :  { %v1969_v8 = vadd.f32 %v3320_v15, %v1890_v47  ;;  %v1963_v20 = vpop.f32.mrb[35].mxu1  ;;  %v2543_v47 = vsel %vm2541_vm6, %v2542_v42, %v3613_v17 }
 0x376   :  { %v1964_v39 = vadd.f32 %v1963_v20, %v5705_v22 }
 0x377   :  { %v2859_v33 = vsub.f32 %v5680_v12, %v1969_v8  ;;  %v2854_v12 = vxor.u32 2147483648, %v5747_v59 }
 0x378   :  { %v2858_v54 = vsub.f32 %v5683_v16, %v1964_v39  ;;  %v3323_v45 = vpop.f32.mrb[36].mxu1  ;;  %v2544_v16 = vsel %vm2537_vm8, %v2540_v11, %v2543_v47 }
 0x379   :  { %v2867_v22 = vsub.f32 %v2859_v33, %v2233_v29  ;;  %v1979_v5 = vadd.f32 %v3323_v45, %v5707_v30  ;;  %v1973_v9 = vpop.f32.mrb[37].mxu1  ;;  %v2750_v30 = vxor.u32 2147483648, %v5729_v53  ;;  %v2855_v49 = vsel %vm2853_vm15, %v2854_v12, %v3621_v28 }
 0x37a   :  { %v2866_v46 = vsub.f32 %v2858_v54, %v2129_v58  ;;  %v1974_v2 = vadd.f32 %v1973_v9, %v5709_v51  ;;  %v2852_v51 = vsel %vm2850_vm11, %v5747_v59, %v2851_v40  ;;  %v2545_v32 = vsel %vm2534_vm7, nan, %v2544_v16 }
 0x37b   :  { %v2875_v17 = vmul.f32 %v2867_v22, %v2867_v22  ;;  %v2861_v26 = vsub.f32 %v5686_v37, %v1979_v5  ;;  %v2856_v24 = vsel %vm2849_vm10, %v2852_v51, %v2855_v49 }
 0x37c   :  { %v2874_v44 = vmul.f32 %v2866_v46, %v2866_v46  ;;  %v2860_v50 = vsub.f32 %v5691_v23, %v1974_v2  ;;  %v3326_v36 = vpop.f32.mrb[38].mxu1  ;;  %v2857_v35 = vsel %vm2846_vm9, nan, %v2856_v24 }
 0x37d   :  { %v2883_v18 = vsel %vm22_vm1, %v2875_v17, 0.0  ;;  %v2869_v31 = vsub.f32 %v2861_v26, %v2441_v4  ;;  %v1989_v56 = vadd.f32 %v3326_v36, %v5712_v60  ;;  %v1983_v37 = vpop.f32.mrb[39].mxu1  ;;  %v2751_v60 = vsel %vm2749_vm3, %v2750_v30, %v5737_v14 }
 0x37e   :  { %v2882_v38 = vsel %vm22_vm1, %v2874_v44, 0.0  ;;  %v2868_v55 = vsub.f32 %v2860_v50, %v2337_v1  ;;  %v1984_v23 = vadd.f32 %v1983_v37, %v5714_v19 }
 0x37f   :  { %v2884_v48 = vadd.f32 %v2883_v18, %v2882_v38  ;;  %v2863_v59 = vsub.f32 %v5694_v3, %v1989_v56  ;;  %v2877_v0 = vmul.f32 %v2869_v31, %v2869_v31 }
 0x380   :  { %v2876_v34 = vmul.f32 %v2868_v55, %v2868_v55  ;;  %v2862_v28 = vsub.f32 %v5697_v61, %v1984_v23  ;;  %v3329_v13 = vpop.f32.mrb[40].mxu1  ;;  %v2752_v61 = vsel %vm2745_vm4, %v2748_v57, %v2751_v60 }
 0x381   :  { %v2871_v19 = vsub.f32 %v2863_v59, %v2649_v21  ;;  %v1999_v3 = vadd.f32 %v3329_v13, %v5688_v62  ;;  %v1993_v42 = vpop.f32.mrb[41].mxu1  ;;  %v2887_v8 = vsel %vm22_vm1, %v2877_v0, 0.0  ;;  %v2753_v58 = vsel %vm2742_vm12, nan, %v2752_v61 }
 0x382   :  { %v2885_v53 = vsel %vm22_vm1, %v2876_v34, 0.0  ;;  %v2870_v14 = vsub.f32 %v2862_v28, %v2545_v32  ;;  %v1994_v15 = vadd.f32 %v1993_v42, %v5716_v27 }
 0x383   :  { %v2886_v25 = vadd.f32 %v2885_v53, %v2884_v48  ;;  %v2865_v10 = vsub.f32 %v5655_v7, %v1999_v3  ;;  %v2879_v62 = vmul.f32 %v2871_v19, %v2871_v19 }
 0x384   :  { %v2878_v29 = vmul.f32 %v2870_v14, %v2870_v14  ;;  %v2864_v43 = vsub.f32 %v5672_v6, %v1994_v15 }
 0x385   :  { %v2873_v20 = vsub.f32 %v2865_v10, %v2857_v35  ;;  %v2888_v4 = vadd.f32 %v2887_v8, %v2886_v25  ;;  %v2891_v52 = vsel %vm22_vm1, %v2879_v62, 0.0 }
 0x386   :  { %v2889_v27 = vsel %vm22_vm1, %v2878_v29, 0.0  ;;  %v2872_v39 = vsub.f32 %v2864_v43, %v2753_v58 }
 0x387   :  { %v2890_v41 = vadd.f32 %v2889_v27, %v2888_v4  ;;  %v2881_v33 = vmul.f32 %v2873_v20, %v2873_v20 }
 0x388   :  { %v2880_v1 = vmul.f32 %v2872_v39, %v2872_v39 }
 0x389   :  { %v2892_v21 = vadd.f32 %v2891_v52, %v2890_v41  ;;  %v2895_v47 = vsel %vm22_vm1, %v2881_v33, 0.0 }
 0x38a   :  { %v2893_v7 = vsel %vm22_vm1, %v2880_v1, 0.0 }
 0x38b   :  { %v2894_v11 = vadd.f32 %v2893_v7, %v2892_v21 }
 0x38d   :  { %v2896_v54 = vadd.f32 %v2895_v47, %v2894_v11 }
 0x38f   :  { %2897 = vadd.xlane.f32.xlu0 %v2896_v54 }
 0x41c   :  { %v2898_v6 = vpop.xlane.xlu0 %2897 }
 0x41d   :  { %v2899_v45 = vrot.slane %v2898_v6, 4 }
 0x41f   :  { %v2900_v40 = vadd.f32 %v2899_v45, %v2898_v6 }
 0x421   :  { %v2901_v22 = vrot.slane %v2900_v40, 2 }
 0x423   :  { %v2902_v5 = vadd.f32 %v2901_v22, %v2900_v40 }
 0x425   :  { %v2903_v9 = vrot.slane %v2902_v5, 1 }
 0x427   :  { %v2904_v12 = vadd.f32 %v2903_v9, %v2902_v5 }
 0x429   :  { %3406 = vpush %v2904_v12 }
 0x45a   :  { %s3407_s1 = spop %3406 }
 0x45b   :  { %s2906_s28 = smul.f32 0.015625, %s3407_s1 }
 0x45d   :  { %2908 = sst [smem:[#allocation2]] %s2906_s28 }
 0x45e   :  { %3631 = shalt.err (!%p3628_p2)
}
 0x45f   :  { %s3650_s7 = smov [#allocation2]  }
 0x460   :  { %2916 = dma.smem_to_hbm %s3650_s7, 16, %s5842_s2, [#allocation3]  }
 0x461   :  { %3632 = dma.done.wait [#allocation3], 16  }
 0x462   :  { %3633 = vsyncadd [#allocation3], 4294967280 }
 0x463   :  { %2920 = sfence }
 0x464   :  { %2921 = vsyncpa [#allocation3], 1 }

</bundles_post_ra>
